<compile_context>
chip_gen: v7x
topology: tpu7x:2x2x1
jax: 0.10.0
libtpu: 0.0.40
codegen_flags: <defaults>
</compile_context>

<pallas_src>
import math
import numpy as np
import jax
import jax.numpy as jnp
from jax.experimental import pallas as pl
from jax.experimental.pallas import tpu as pltpu


# ----------------------------------------------------------------------------
# Static network schedule
# ----------------------------------------------------------------------------

K_LIST = (7, 7, 3, 3, 3, 3)                     # conv1..conv6 kernel sizes
POOL_AFTER = (True, True, False, False, False, True)
TIDX_FOR_LAYER = (0, 1, 2, 2, 2, 2)             # which time-index vector each conv uses
BN_EPS = 1e-5
LOG_2PI = math.log(2.0 * math.pi)


# ----------------------------------------------------------------------------
# In-kernel helpers (operate on traced VMEM values; all shapes static)
# ----------------------------------------------------------------------------

def _conv1d_relu(x2, t_idx, T, K, w_ref, b_ref):
    """Same-padding Conv1d + ReLU on a batch-major (B*T, Cin) slab.

    y[r] = relu(b + sum_k x2[r + (k - pad)] @ W[k]), with rows whose source time
    index falls outside [0, T) masked to zero (== zero padding per batch).
    """
    BT, Cin = x2.shape
    pad = (K - 1) // 2
    Cout = w_ref.shape[-1]
    acc = jnp.zeros((BT, Cout), jnp.float32)
    for k in range(K):                                         # static tap loop
        d = k - pad
        if d == 0:
            src = x2
        else:
            if d > 0:
                shifted = jnp.concatenate(
                    [x2[d:, :], jnp.zeros((d, Cin), jnp.float32)], axis=0)
            else:
                shifted = jnp.concatenate(
                    [jnp.zeros((-d, Cin), jnp.float32), x2[:BT + d, :]], axis=0)
            td = t_idx + d                                     # (BT, 1) int32
            mask = jnp.logical_and(td >= 0, td < T).astype(jnp.float32)
            src = shifted * mask
        acc = acc + jnp.dot(src, w_ref[k], preferred_element_type=jnp.float32)
    return jnp.maximum(acc + b_ref[...], 0.0)


def _maxpool3(x2):
    """MaxPool1d(kernel=3, stride=3) on a batch-major (B*T, C) slab, T % 3 == 0.

    Sliding max over 3 consecutive rows (triples never cross batch boundaries)
    then a stride-3 row selection via an iota-built matmul (MXU).
    """
    BT, C = x2.shape
    BTo = BT // 3
    s1 = jnp.concatenate([x2[1:, :], jnp.zeros((1, C), jnp.float32)], axis=0)
    s2 = jnp.concatenate([x2[2:, :], jnp.zeros((2, C), jnp.float32)], axis=0)
    m = jnp.maximum(jnp.maximum(x2, s1), s2)       # m[r] = max(x[r], x[r+1], x[r+2])
    i_idx = jax.lax.broadcasted_iota(jnp.int32, (BTo, BT), 0)
    r_idx = jax.lax.broadcasted_iota(jnp.int32, (BTo, BT), 1)
    sel = (r_idx == 3 * i_idx).astype(jnp.float32)             # picks rows 0,3,6,...
    return jnp.dot(sel, m, preferred_element_type=jnp.float32)


def _batchnorm(x2, eps=BN_EPS):
    """Training-mode BatchNorm1d (default affine gamma=1, beta=0) over axis 0."""
    mean = jnp.mean(x2, axis=0, keepdims=True)
    ex2 = jnp.mean(x2 * x2, axis=0, keepdims=True)
    var = jnp.maximum(ex2 - mean * mean, 0.0)
    return (x2 - mean) * jax.lax.rsqrt(var + eps)


# ----------------------------------------------------------------------------
# Fused Pallas kernel
# ----------------------------------------------------------------------------

def make_fused_kernel(B, T0):
    def kernel(txt_ref, emb_ref, t1_ref, t2_ref, t3_ref,
               w1, b1, w2, b2, w3, b3, w4, b4, w5, b5, w6, b6,
               w7, b7, w8, b8,
               cart_ref, mu_ref, kappa_ref,
               probs_ref, loss_ref):
        conv_w = (w1, w2, w3, w4, w5, w6)
        conv_b = (b1, b2, b3, b4, b5, b6)
        t_refs = (t1_ref, t2_ref, t3_ref)

        # ---- embedding gather as one-hot @ table (MXU) ----
        BT0 = B * T0
        isize = emb_ref.shape[0]
        idx = txt_ref[...]                                     # (BT0, 1) int32
        cols = jax.lax.broadcasted_iota(jnp.int32, (BT0, isize), 1)
        onehot = (cols == idx).astype(jnp.float32)             # (BT0, isize)
        x2 = jnp.dot(onehot, emb_ref[...], preferred_element_type=jnp.float32)

        # ---- conv / relu / pool / batchnorm stack ----
        T = T0
        for li in range(6):                                    # static layer schedule
            t_idx = t_refs[TIDX_FOR_LAYER[li]][...]            # (B*T, 1) int32
            x2 = _conv1d_relu(x2, t_idx, T, K_LIST[li], conv_w[li], conv_b[li])
            if POOL_AFTER[li]:
                x2 = _maxpool3(x2)
                T //= 3
            x2 = _batchnorm(x2)

        # ---- temporal average per batch element (== w.sum(2) / w.shape[2]) ----
        BT = B * T
        if T == 1:
            avg = x2                                           # (B, hsize)
        else:
            b_i = jax.lax.broadcasted_iota(jnp.int32, (B, BT), 0)
            r_i = jax.lax.broadcasted_iota(jnp.int32, (B, BT), 1)
            sel = jnp.logical_and(r_i >= b_i * T, r_i < (b_i + 1) * T)
            A = sel.astype(jnp.float32) * (1.0 / T)
            avg = jnp.dot(A, x2, preferred_element_type=jnp.float32)

        # ---- MLP head + softmax ----
        h = jnp.dot(avg, w7[...], preferred_element_type=jnp.float32) + b7[...]
        h = jnp.maximum(h, 0.0)
        logits = jnp.dot(h, w8[...], preferred_element_type=jnp.float32) + b8[...]
        m = jnp.max(logits, axis=-1, keepdims=True)
        e = jnp.exp(logits - m)
        s = jnp.sum(e, axis=-1, keepdims=True)
        probs_ref[...] = e * pl.reciprocal(s, approx=True)     # softmax output

        # ---- von-Mises-Fisher mixture NLL, evaluated in log-space ----
        # loss = -sum_b log( sum_j softmax_j * C3(k_j) * exp(k_j * mu_j . x_b) )
        logw = (logits - m) - jnp.log(s)                       # log-softmax (B, O)
        cart = cart_ref[...]                                   # (B, 3)
        mu = mu_ref[...]                                       # (3, O)
        kappa = kappa_ref[...]                                 # (1, O)
        dotp = (cart[:, 0:1] * mu[0:1, :]
                + cart[:, 1:2] * mu[1:2, :]
                + cart[:, 2:3] * mu[2:3, :])                   # (B, O)
        # log C3(k) = log k - log(2*pi) - k - log(1 - exp(-2k))   (requires k > 0)
        log_c3 = (jnp.log(kappa) - LOG_2PI
                  - kappa - jnp.log(1.0 - jnp.exp(-2.0 * kappa)))
        z = logw + log_c3 + kappa * dotp                       # (B, O)
        zm = jnp.max(z, axis=-1, keepdims=True)
        lse = zm + jnp.log(jnp.sum(jnp.exp(z - zm), axis=-1, keepdims=True))
        loss_ref[...] = -jnp.sum(lse, axis=0, keepdims=True)   # (1, 1)

    return kernel


def fused_network_and_loss(params, txt_bm, cart, mu_t, kappa_row, B, T0):
    # Single pallas_call; every operand is a small array resident in VMEM.
    assert T0 % 27 == 0, "sequence length must survive three stride-3 max-pools"
    O = kappa_row.shape[1]
    vmem = pl.BlockSpec(memory_space=pltpu.MemorySpace.VMEM)

    def tvec(bt, t):   # time-index-within-batch per row (compile-time constant)
        return jnp.asarray((np.arange(bt, dtype=np.int32) % t).reshape(bt, 1))

    args = [txt_bm,
            params["embedding"].astype(jnp.float32),
            tvec(B * T0, T0),
            tvec(B * (T0 // 3), T0 // 3),
            tvec(B * (T0 // 9), T0 // 9)]
    for i in range(1, 7):
        args.append(params[f"conv{i}_w"].astype(jnp.float32))          # (K, Cin, Cout)
        args.append(params[f"conv{i}_b"].reshape(1, -1).astype(jnp.float32))
    args += [params["lin7_w"].astype(jnp.float32),
             params["lin7_b"].reshape(1, -1).astype(jnp.float32),
             params["lin8_w"].astype(jnp.float32),
             params["lin8_b"].reshape(1, -1).astype(jnp.float32),
             cart, mu_t, kappa_row]

    probs, loss = pl.pallas_call(
        make_fused_kernel(B, T0),
        out_shape=(jax.ShapeDtypeStruct((B, O), jnp.float32),
                   jax.ShapeDtypeStruct((1, 1), jnp.float32)),
        in_specs=[vmem] * len(args),
        out_specs=(vmem, vmem),
    )(*args)
    return probs, loss[0, 0]


# ----------------------------------------------------------------------------
# JAX glue (index layout, trig) + jitted forward
# ----------------------------------------------------------------------------

def lat_lon_to_cart(lat, lon):
    # TODO(synk): original lat_lon_to_cart not provided; using the standard
    #             (lat, lon) -> unit-sphere cartesian convention.
    x = jnp.cos(lat) * jnp.cos(lon)
    y = jnp.cos(lat) * jnp.sin(lon)
    z = jnp.sin(lat)
    return jnp.stack([x, y, z], axis=-1)


@jax.jit
def forward_device(params, txt_padded, geo_point):
    T, B = txt_padded.shape
    # batch-major token ids; the embedding gather itself happens inside the kernel
    txt_bm = jnp.transpose(txt_padded, (1, 0)).reshape(B * T, 1).astype(jnp.int32)
    cart = lat_lon_to_cart(geo_point[:, 0], geo_point[:, 1])     # (B, 3)
    mu = lat_lon_to_cart(params["mean_direction"][:, 0],
                         params["mean_direction"][:, 1])         # (O, 3)
    probs, loss = fused_network_and_loss(
        params, txt_bm,
        cart.astype(jnp.float32),
        mu.T.astype(jnp.float32),
        params["concentration"].reshape(1, -1).astype(jnp.float32),
        B, T)
    return probs, loss


def forward(params, p, txt_padded, geo_point, txt_lengths):
    probs, loss = forward_device(params, txt_padded, geo_point)
    er = float(loss)              # host sync kept OUTSIDE the jitted hot path
    den = txt_lengths.shape[0]
    return er, loss, den


# ----------------------------------------------------------------------------
# Parameters
# ----------------------------------------------------------------------------

class P:
    isize = 50
    emb_dim = 32
    hsize = 32
    lin_size = 32
    osize = 8
    min_lat, max_lat, mean_lat = 30.0, 50.0, 40.0
    min_lon, max_lon, mean_lon = -10.0, 10.0, 0.0
    init_conc = 10.0


def init_params(key, p):
    ks = jax.random.split(key, 16)

    def conv_w(k, cin, cout, ksz):
        scale = 1.0 / math.sqrt(cin * ksz)
        return jax.random.normal(k, (ksz, cin, cout), jnp.float32) * scale

    def lin_w(k, cin, cout):
        scale = 1.0 / math.sqrt(cin)
        return jax.random.normal(k, (cin, cout), jnp.float32) * scale

    h = p.hsize
    params = {
        "embedding": jax.random.normal(ks[0], (p.isize, p.emb_dim), jnp.float32),
        "conv1_w": conv_w(ks[1], p.emb_dim, h, 7), "conv1_b": jnp.zeros((h,), jnp.float32),
        "conv2_w": conv_w(ks[2], h, h, 7), "conv2_b": jnp.zeros((h,), jnp.float32),
        "conv3_w": conv_w(ks[3], h, h, 3), "conv3_b": jnp.zeros((h,), jnp.float32),
        "conv4_w": conv_w(ks[4], h, h, 3), "conv4_b": jnp.zeros((h,), jnp.float32),
        "conv5_w": conv_w(ks[5], h, h, 3), "conv5_b": jnp.zeros((h,), jnp.float32),
        "conv6_w": conv_w(ks[6], h, h, 3), "conv6_b": jnp.zeros((h,), jnp.float32),
        "lin7_w": lin_w(ks[7], h, p.lin_size), "lin7_b": jnp.zeros((p.lin_size,), jnp.float32),
        "lin8_w": lin_w(ks[8], p.lin_size, p.osize), "lin8_b": jnp.zeros((p.osize,), jnp.float32),
    }
    min_lat = math.radians(p.min_lat - p.mean_lat)
    max_lat = math.radians(p.max_lat - p.mean_lat)
    min_lon = math.radians(p.min_lon - p.mean_lon)
    max_lon = math.radians(p.max_lon - p.mean_lon)
    md = jax.random.uniform(ks[9], (p.osize, 2), jnp.float32)
    md = md.at[:, 0].set(md[:, 0] * (max_lat - min_lat) + min_lat)
    md = md.at[:, 1].set(md[:, 1] * (max_lon - min_lon) + min_lon)
    params["mean_direction"] = md
    params["concentration"] = jnp.full((p.osize,), p.init_conc, jnp.float32)
    return params


# ----------------------------------------------------------------------------
# Main
# ----------------------------------------------------------------------------

if __name__ == "__main__":
    p = P()
    root = jax.random.PRNGKey(0)
    k_params, k_txt, k_lat, k_lon = jax.random.split(root, 4)

    params = init_params(k_params, p)

    T, B = 27, 2   # 27 so the three stride-3 max-pools divide evenly (27 -> 9 -> 3 -> 1)
    txt_padded = jax.random.randint(k_txt, (T, B), 0, p.isize, dtype=jnp.int32)

    min_lat = math.radians(p.min_lat - p.mean_lat)
    max_lat = math.radians(p.max_lat - p.mean_lat)
    min_lon = math.radians(p.min_lon - p.mean_lon)
    max_lon = math.radians(p.max_lon - p.mean_lon)
    lat = jax.random.uniform(k_lat, (B,), jnp.float32, min_lat, max_lat)
    lon = jax.random.uniform(k_lon, (B,), jnp.float32, min_lon, max_lon)
    geo_point = jnp.stack([lat, lon], axis=1)       # (B, 2)
    txt_lengths = jnp.full((B,), T, dtype=jnp.int32)

    er, loss, den = forward(params, p, txt_padded, geo_point, txt_lengths)
    jax.block_until_ready(loss)
    assert jnp.isfinite(loss), f"loss not finite: {loss}"
    assert den == B
    print("KERNEL_OK")
</pallas_src>

<mosaic_0001>
module attributes {stable_mosaic.version = 11 : i64} {
  func.func @kernel(%arg0: memref<54x1xi32, #tpu.memory_space<vmem>>, %arg1: memref<50x32xf32, #tpu.memory_space<vmem>>, %arg2: memref<54x1xi32, #tpu.memory_space<vmem>>, %arg3: memref<18x1xi32, #tpu.memory_space<vmem>>, %arg4: memref<6x1xi32, #tpu.memory_space<vmem>>, %arg5: memref<7x32x32xf32, #tpu.memory_space<vmem>>, %arg6: memref<1x32xf32, #tpu.memory_space<vmem>>, %arg7: memref<7x32x32xf32, #tpu.memory_space<vmem>>, %arg8: memref<1x32xf32, #tpu.memory_space<vmem>>, %arg9: memref<3x32x32xf32, #tpu.memory_space<vmem>>, %arg10: memref<1x32xf32, #tpu.memory_space<vmem>>, %arg11: memref<3x32x32xf32, #tpu.memory_space<vmem>>, %arg12: memref<1x32xf32, #tpu.memory_space<vmem>>, %arg13: memref<3x32x32xf32, #tpu.memory_space<vmem>>, %arg14: memref<1x32xf32, #tpu.memory_space<vmem>>, %arg15: memref<3x32x32xf32, #tpu.memory_space<vmem>>, %arg16: memref<1x32xf32, #tpu.memory_space<vmem>>, %arg17: memref<32x32xf32, #tpu.memory_space<vmem>>, %arg18: memref<1x32xf32, #tpu.memory_space<vmem>>, %arg19: memref<32x8xf32, #tpu.memory_space<vmem>>, %arg20: memref<1x8xf32, #tpu.memory_space<vmem>>, %arg21: memref<2x3xf32, #tpu.memory_space<vmem>>, %arg22: memref<3x8xf32, #tpu.memory_space<vmem>>, %arg23: memref<1x8xf32, #tpu.memory_space<vmem>>, %arg24: memref<2x8xf32, #tpu.memory_space<vmem>>, %arg25: memref<1x1xf32, #tpu.memory_space<vmem>>) attributes {dimension_semantics = [], scalar_prefetch = 0 : i64, scratch_operands = 0 : i64, tpu.core_type = #tpu.core_type<tc>} {
    %c0 = arith.constant 0 : index
    %c0_0 = arith.constant 0 : index
    %0 = vector.load %arg0[%c0, %c0_0] : memref<54x1xi32, #tpu.memory_space<vmem>>, vector<54x1xi32>
    %1 = tpu.iota {dimensions = array<i32: 1>} : vector<54x50xi32>
    %2 = vector.broadcast %0 : vector<54x1xi32> to vector<54x50xi32>
    %3 = arith.cmpi eq, %1, %2 : vector<54x50xi32>
    %4 = arith.extui %3 : vector<54x50xi1> to vector<54x50xi32>
    %5 = arith.sitofp %4 : vector<54x50xi32> to vector<54x50xf32>
    %c0_1 = arith.constant 0 : index
    %c0_2 = arith.constant 0 : index
    %6 = vector.load %arg1[%c0_1, %c0_2] : memref<50x32xf32, #tpu.memory_space<vmem>>, vector<50x32xf32>
    %cst = arith.constant dense<0.000000e+00> : vector<54x32xf32>
    %7 = tpu.matmul %5, %6, %cst {dimension_numbers = #tpu.dot_dimension_numbers<[1], [0], [0], [1], [0, 0, 1, 1], [], []>} : vector<54x50xf32>, vector<50x32xf32>, vector<54x32xf32> -> vector<54x32xf32>
    %c0_3 = arith.constant 0 : index
    %c0_4 = arith.constant 0 : index
    %8 = vector.load %arg2[%c0_3, %c0_4] : memref<54x1xi32, #tpu.memory_space<vmem>>, vector<54x1xi32>
    %cst_5 = arith.constant 0.000000e+00 : f32
    %9 = vector.broadcast %cst_5 : f32 to vector<54x32xf32>
    %cst_6 = arith.constant 0.000000e+00 : f32
    %10 = vector.broadcast %cst_6 : f32 to vector<3x32xf32>
    %11 = vector.extract_strided_slice %7 {offsets = [0, 0], sizes = [51, 32], strides = [1, 1]} : vector<54x32xf32> to vector<51x32xf32>
    %12 = tpu.concatenate %10, %11 in 0 : vector<3x32xf32>, vector<51x32xf32> -> vector<54x32xf32>
    %c-3_i32 = arith.constant -3 : i32
    %13 = vector.broadcast %c-3_i32 : i32 to vector<54x1xi32>
    %14 = arith.addi %8, %13 : vector<54x1xi32>
    %c0_i32 = arith.constant 0 : i32
    %15 = vector.broadcast %c0_i32 : i32 to vector<54x1xi32>
    %16 = arith.cmpi sge, %14, %15 : vector<54x1xi32>
    %c27_i32 = arith.constant 27 : i32
    %17 = vector.broadcast %c27_i32 : i32 to vector<54x1xi32>
    %18 = arith.cmpi slt, %14, %17 : vector<54x1xi32>
    %19 = arith.andi %16, %18 : vector<54x1xi1>
    %20 = arith.extui %19 : vector<54x1xi1> to vector<54x1xi32>
    %21 = arith.sitofp %20 : vector<54x1xi32> to vector<54x1xf32>
    %22 = vector.broadcast %21 : vector<54x1xf32> to vector<54x32xf32>
    %23 = arith.mulf %12, %22 : vector<54x32xf32>
    %c0_7 = arith.constant 0 : index
    %c0_8 = arith.constant 0 : index
    %c0_9 = arith.constant 0 : index
    %24 = vector.load %arg5[%c0_7, %c0_8, %c0_9] : memref<7x32x32xf32, #tpu.memory_space<vmem>>, vector<1x32x32xf32>
    %25 = vector.shape_cast %24 : vector<1x32x32xf32> to vector<32x32xf32>
    %cst_10 = arith.constant dense<0.000000e+00> : vector<54x32xf32>
    %26 = tpu.matmul %23, %25, %cst_10 {dimension_numbers = #tpu.dot_dimension_numbers<[1], [0], [0], [1], [0, 0, 1, 1], [], []>} : vector<54x32xf32>, vector<32x32xf32>, vector<54x32xf32> -> vector<54x32xf32>
    %27 = arith.addf %9, %26 : vector<54x32xf32>
    %cst_11 = arith.constant 0.000000e+00 : f32
    %28 = vector.broadcast %cst_11 : f32 to vector<2x32xf32>
    %29 = vector.extract_strided_slice %7 {offsets = [0, 0], sizes = [52, 32], strides = [1, 1]} : vector<54x32xf32> to vector<52x32xf32>
    %30 = tpu.concatenate %28, %29 in 0 : vector<2x32xf32>, vector<52x32xf32> -> vector<54x32xf32>
    %c-2_i32 = arith.constant -2 : i32
    %31 = vector.broadcast %c-2_i32 : i32 to vector<54x1xi32>
    %32 = arith.addi %8, %31 : vector<54x1xi32>
    %c0_i32_12 = arith.constant 0 : i32
    %33 = vector.broadcast %c0_i32_12 : i32 to vector<54x1xi32>
    %34 = arith.cmpi sge, %32, %33 : vector<54x1xi32>
    %c27_i32_13 = arith.constant 27 : i32
    %35 = vector.broadcast %c27_i32_13 : i32 to vector<54x1xi32>
    %36 = arith.cmpi slt, %32, %35 : vector<54x1xi32>
    %37 = arith.andi %34, %36 : vector<54x1xi1>
    %38 = arith.extui %37 : vector<54x1xi1> to vector<54x1xi32>
    %39 = arith.sitofp %38 : vector<54x1xi32> to vector<54x1xf32>
    %40 = vector.broadcast %39 : vector<54x1xf32> to vector<54x32xf32>
    %41 = arith.mulf %30, %40 : vector<54x32xf32>
    %c1 = arith.constant 1 : index
    %c0_14 = arith.constant 0 : index
    %c0_15 = arith.constant 0 : index
    %42 = vector.load %arg5[%c1, %c0_14, %c0_15] : memref<7x32x32xf32, #tpu.memory_space<vmem>>, vector<1x32x32xf32>
    %43 = vector.shape_cast %42 : vector<1x32x32xf32> to vector<32x32xf32>
    %cst_16 = arith.constant dense<0.000000e+00> : vector<54x32xf32>
    %44 = tpu.matmul %41, %43, %cst_16 {dimension_numbers = #tpu.dot_dimension_numbers<[1], [0], [0], [1], [0, 0, 1, 1], [], []>} : vector<54x32xf32>, vector<32x32xf32>, vector<54x32xf32> -> vector<54x32xf32>
    %45 = arith.addf %27, %44 : vector<54x32xf32>
    %cst_17 = arith.constant 0.000000e+00 : f32
    %46 = vector.broadcast %cst_17 : f32 to vector<1x32xf32>
    %47 = vector.extract_strided_slice %7 {offsets = [0, 0], sizes = [53, 32], strides = [1, 1]} : vector<54x32xf32> to vector<53x32xf32>
    %48 = tpu.concatenate %46, %47 in 0 : vector<1x32xf32>, vector<53x32xf32> -> vector<54x32xf32>
    %c-1_i32 = arith.constant -1 : i32
    %49 = vector.broadcast %c-1_i32 : i32 to vector<54x1xi32>
    %50 = arith.addi %8, %49 : vector<54x1xi32>
    %c0_i32_18 = arith.constant 0 : i32
    %51 = vector.broadcast %c0_i32_18 : i32 to vector<54x1xi32>
    %52 = arith.cmpi sge, %50, %51 : vector<54x1xi32>
    %c27_i32_19 = arith.constant 27 : i32
    %53 = vector.broadcast %c27_i32_19 : i32 to vector<54x1xi32>
    %54 = arith.cmpi slt, %50, %53 : vector<54x1xi32>
    %55 = arith.andi %52, %54 : vector<54x1xi1>
    %56 = arith.extui %55 : vector<54x1xi1> to vector<54x1xi32>
    %57 = arith.sitofp %56 : vector<54x1xi32> to vector<54x1xf32>
    %58 = vector.broadcast %57 : vector<54x1xf32> to vector<54x32xf32>
    %59 = arith.mulf %48, %58 : vector<54x32xf32>
    %c2 = arith.constant 2 : index
    %c0_20 = arith.constant 0 : index
    %c0_21 = arith.constant 0 : index
    %60 = vector.load %arg5[%c2, %c0_20, %c0_21] : memref<7x32x32xf32, #tpu.memory_space<vmem>>, vector<1x32x32xf32>
    %61 = vector.shape_cast %60 : vector<1x32x32xf32> to vector<32x32xf32>
    %cst_22 = arith.constant dense<0.000000e+00> : vector<54x32xf32>
    %62 = tpu.matmul %59, %61, %cst_22 {dimension_numbers = #tpu.dot_dimension_numbers<[1], [0], [0], [1], [0, 0, 1, 1], [], []>} : vector<54x32xf32>, vector<32x32xf32>, vector<54x32xf32> -> vector<54x32xf32>
    %63 = arith.addf %45, %62 : vector<54x32xf32>
    %c3 = arith.constant 3 : index
    %c0_23 = arith.constant 0 : index
    %c0_24 = arith.constant 0 : index
    %64 = vector.load %arg5[%c3, %c0_23, %c0_24] : memref<7x32x32xf32, #tpu.memory_space<vmem>>, vector<1x32x32xf32>
    %65 = vector.shape_cast %64 : vector<1x32x32xf32> to vector<32x32xf32>
    %cst_25 = arith.constant dense<0.000000e+00> : vector<54x32xf32>
    %66 = tpu.matmul %7, %65, %cst_25 {dimension_numbers = #tpu.dot_dimension_numbers<[1], [0], [0], [1], [0, 0, 1, 1], [], []>} : vector<54x32xf32>, vector<32x32xf32>, vector<54x32xf32> -> vector<54x32xf32>
    %67 = arith.addf %63, %66 : vector<54x32xf32>
    %68 = vector.extract_strided_slice %7 {offsets = [1, 0], sizes = [53, 32], strides = [1, 1]} : vector<54x32xf32> to vector<53x32xf32>
    %cst_26 = arith.constant 0.000000e+00 : f32
    %69 = vector.broadcast %cst_26 : f32 to vector<1x32xf32>
    %70 = tpu.concatenate %68, %69 in 0 : vector<53x32xf32>, vector<1x32xf32> -> vector<54x32xf32>
    %c1_i32 = arith.constant 1 : i32
    %71 = vector.broadcast %c1_i32 : i32 to vector<54x1xi32>
    %72 = arith.addi %8, %71 : vector<54x1xi32>
    %c0_i32_27 = arith.constant 0 : i32
    %73 = vector.broadcast %c0_i32_27 : i32 to vector<54x1xi32>
    %74 = arith.cmpi sge, %72, %73 : vector<54x1xi32>
    %c27_i32_28 = arith.constant 27 : i32
    %75 = vector.broadcast %c27_i32_28 : i32 to vector<54x1xi32>
    %76 = arith.cmpi slt, %72, %75 : vector<54x1xi32>
    %77 = arith.andi %74, %76 : vector<54x1xi1>
    %78 = arith.extui %77 : vector<54x1xi1> to vector<54x1xi32>
    %79 = arith.sitofp %78 : vector<54x1xi32> to vector<54x1xf32>
    %80 = vector.broadcast %79 : vector<54x1xf32> to vector<54x32xf32>
    %81 = arith.mulf %70, %80 : vector<54x32xf32>
    %c4 = arith.constant 4 : index
    %c0_29 = arith.constant 0 : index
    %c0_30 = arith.constant 0 : index
    %82 = vector.load %arg5[%c4, %c0_29, %c0_30] : memref<7x32x32xf32, #tpu.memory_space<vmem>>, vector<1x32x32xf32>
    %83 = vector.shape_cast %82 : vector<1x32x32xf32> to vector<32x32xf32>
    %cst_31 = arith.constant dense<0.000000e+00> : vector<54x32xf32>
    %84 = tpu.matmul %81, %83, %cst_31 {dimension_numbers = #tpu.dot_dimension_numbers<[1], [0], [0], [1], [0, 0, 1, 1], [], []>} : vector<54x32xf32>, vector<32x32xf32>, vector<54x32xf32> -> vector<54x32xf32>
    %85 = arith.addf %67, %84 : vector<54x32xf32>
    %86 = vector.extract_strided_slice %7 {offsets = [2, 0], sizes = [52, 32], strides = [1, 1]} : vector<54x32xf32> to vector<52x32xf32>
    %cst_32 = arith.constant 0.000000e+00 : f32
    %87 = vector.broadcast %cst_32 : f32 to vector<2x32xf32>
    %88 = tpu.concatenate %86, %87 in 0 : vector<52x32xf32>, vector<2x32xf32> -> vector<54x32xf32>
    %c2_i32 = arith.constant 2 : i32
    %89 = vector.broadcast %c2_i32 : i32 to vector<54x1xi32>
    %90 = arith.addi %8, %89 : vector<54x1xi32>
    %c0_i32_33 = arith.constant 0 : i32
    %91 = vector.broadcast %c0_i32_33 : i32 to vector<54x1xi32>
    %92 = arith.cmpi sge, %90, %91 : vector<54x1xi32>
    %c27_i32_34 = arith.constant 27 : i32
    %93 = vector.broadcast %c27_i32_34 : i32 to vector<54x1xi32>
    %94 = arith.cmpi slt, %90, %93 : vector<54x1xi32>
    %95 = arith.andi %92, %94 : vector<54x1xi1>
    %96 = arith.extui %95 : vector<54x1xi1> to vector<54x1xi32>
    %97 = arith.sitofp %96 : vector<54x1xi32> to vector<54x1xf32>
    %98 = vector.broadcast %97 : vector<54x1xf32> to vector<54x32xf32>
    %99 = arith.mulf %88, %98 : vector<54x32xf32>
    %c5 = arith.constant 5 : index
    %c0_35 = arith.constant 0 : index
    %c0_36 = arith.constant 0 : index
    %100 = vector.load %arg5[%c5, %c0_35, %c0_36] : memref<7x32x32xf32, #tpu.memory_space<vmem>>, vector<1x32x32xf32>
    %101 = vector.shape_cast %100 : vector<1x32x32xf32> to vector<32x32xf32>
    %cst_37 = arith.constant dense<0.000000e+00> : vector<54x32xf32>
    %102 = tpu.matmul %99, %101, %cst_37 {dimension_numbers = #tpu.dot_dimension_numbers<[1], [0], [0], [1], [0, 0, 1, 1], [], []>} : vector<54x32xf32>, vector<32x32xf32>, vector<54x32xf32> -> vector<54x32xf32>
    %103 = arith.addf %85, %102 : vector<54x32xf32>
    %104 = vector.extract_strided_slice %7 {offsets = [3, 0], sizes = [51, 32], strides = [1, 1]} : vector<54x32xf32> to vector<51x32xf32>
    %cst_38 = arith.constant 0.000000e+00 : f32
    %105 = vector.broadcast %cst_38 : f32 to vector<3x32xf32>
    %106 = tpu.concatenate %104, %105 in 0 : vector<51x32xf32>, vector<3x32xf32> -> vector<54x32xf32>
    %c3_i32 = arith.constant 3 : i32
    %107 = vector.broadcast %c3_i32 : i32 to vector<54x1xi32>
    %108 = arith.addi %8, %107 : vector<54x1xi32>
    %c0_i32_39 = arith.constant 0 : i32
    %109 = vector.broadcast %c0_i32_39 : i32 to vector<54x1xi32>
    %110 = arith.cmpi sge, %108, %109 : vector<54x1xi32>
    %c27_i32_40 = arith.constant 27 : i32
    %111 = vector.broadcast %c27_i32_40 : i32 to vector<54x1xi32>
    %112 = arith.cmpi slt, %108, %111 : vector<54x1xi32>
    %113 = arith.andi %110, %112 : vector<54x1xi1>
    %114 = arith.extui %113 : vector<54x1xi1> to vector<54x1xi32>
    %115 = arith.sitofp %114 : vector<54x1xi32> to vector<54x1xf32>
    %116 = vector.broadcast %115 : vector<54x1xf32> to vector<54x32xf32>
    %117 = arith.mulf %106, %116 : vector<54x32xf32>
    %c6 = arith.constant 6 : index
    %c0_41 = arith.constant 0 : index
    %c0_42 = arith.constant 0 : index
    %118 = vector.load %arg5[%c6, %c0_41, %c0_42] : memref<7x32x32xf32, #tpu.memory_space<vmem>>, vector<1x32x32xf32>
    %119 = vector.shape_cast %118 : vector<1x32x32xf32> to vector<32x32xf32>
    %cst_43 = arith.constant dense<0.000000e+00> : vector<54x32xf32>
    %120 = tpu.matmul %117, %119, %cst_43 {dimension_numbers = #tpu.dot_dimension_numbers<[1], [0], [0], [1], [0, 0, 1, 1], [], []>} : vector<54x32xf32>, vector<32x32xf32>, vector<54x32xf32> -> vector<54x32xf32>
    %121 = arith.addf %103, %120 : vector<54x32xf32>
    %c0_44 = arith.constant 0 : index
    %c0_45 = arith.constant 0 : index
    %122 = vector.load %arg6[%c0_44, %c0_45] : memref<1x32xf32, #tpu.memory_space<vmem>>, vector<1x32xf32>
    %123 = vector.broadcast %122 : vector<1x32xf32> to vector<54x32xf32>
    %124 = arith.addf %121, %123 : vector<54x32xf32>
    %cst_46 = arith.constant 0.000000e+00 : f32
    %125 = vector.broadcast %cst_46 : f32 to vector<54x32xf32>
    %126 = arith.maximumf %124, %125 : vector<54x32xf32>
    %127 = vector.extract_strided_slice %126 {offsets = [1, 0], sizes = [53, 32], strides = [1, 1]} : vector<54x32xf32> to vector<53x32xf32>
    %cst_47 = arith.constant 0.000000e+00 : f32
    %128 = vector.broadcast %cst_47 : f32 to vector<1x32xf32>
    %129 = tpu.concatenate %127, %128 in 0 : vector<53x32xf32>, vector<1x32xf32> -> vector<54x32xf32>
    %130 = vector.extract_strided_slice %126 {offsets = [2, 0], sizes = [52, 32], strides = [1, 1]} : vector<54x32xf32> to vector<52x32xf32>
    %cst_48 = arith.constant 0.000000e+00 : f32
    %131 = vector.broadcast %cst_48 : f32 to vector<2x32xf32>
    %132 = tpu.concatenate %130, %131 in 0 : vector<52x32xf32>, vector<2x32xf32> -> vector<54x32xf32>
    %133 = arith.maximumf %126, %129 : vector<54x32xf32>
    %134 = arith.maximumf %133, %132 : vector<54x32xf32>
    %135 = tpu.iota {dimensions = array<i32: 0>} : vector<18x54xi32>
    %136 = tpu.iota {dimensions = array<i32: 1>} : vector<18x54xi32>
    %c3_i32_49 = arith.constant 3 : i32
    %137 = vector.broadcast %c3_i32_49 : i32 to vector<18x54xi32>
    %138 = arith.muli %137, %135 : vector<18x54xi32>
    %139 = arith.cmpi eq, %136, %138 : vector<18x54xi32>
    %140 = arith.extui %139 : vector<18x54xi1> to vector<18x54xi32>
    %141 = arith.sitofp %140 : vector<18x54xi32> to vector<18x54xf32>
    %cst_50 = arith.constant dense<0.000000e+00> : vector<18x32xf32>
    %142 = tpu.matmul %141, %134, %cst_50 {dimension_numbers = #tpu.dot_dimension_numbers<[1], [0], [0], [1], [0, 0, 1, 1], [], []>} : vector<18x54xf32>, vector<54x32xf32>, vector<18x32xf32> -> vector<18x32xf32>
    %cst_51 = arith.constant dense<0.000000e+00> : vector<32xf32>
    %143 = vector.multi_reduction <add>, %142, %cst_51 [0] : vector<18x32xf32> to vector<32xf32>
    %144 = vector.shape_cast %143 : vector<32xf32> to vector<1x32xf32>
    %cst_52 = arith.constant 1.800000e+01 : f32
    %145 = vector.broadcast %cst_52 : f32 to vector<1x32xf32>
    %146 = arith.divf %144, %145 : vector<1x32xf32>
    %147 = arith.mulf %142, %142 : vector<18x32xf32>
    %cst_53 = arith.constant dense<0.000000e+00> : vector<32xf32>
    %148 = vector.multi_reduction <add>, %147, %cst_53 [0] : vector<18x32xf32> to vector<32xf32>
    %149 = vector.shape_cast %148 : vector<32xf32> to vector<1x32xf32>
    %cst_54 = arith.constant 1.800000e+01 : f32
    %150 = vector.broadcast %cst_54 : f32 to vector<1x32xf32>
    %151 = arith.divf %149, %150 : vector<1x32xf32>
    %152 = arith.mulf %146, %146 : vector<1x32xf32>
    %153 = arith.subf %151, %152 : vector<1x32xf32>
    %cst_55 = arith.constant 0.000000e+00 : f32
    %154 = vector.broadcast %cst_55 : f32 to vector<1x32xf32>
    %155 = arith.maximumf %153, %154 : vector<1x32xf32>
    %156 = vector.broadcast %146 : vector<1x32xf32> to vector<18x32xf32>
    %157 = arith.subf %142, %156 : vector<18x32xf32>
    %cst_56 = arith.constant 9.99999974E-6 : f32
    %158 = vector.broadcast %cst_56 : f32 to vector<1x32xf32>
    %159 = arith.addf %155, %158 : vector<1x32xf32>
    %160 = math.rsqrt %159 : vector<1x32xf32>
    %161 = vector.broadcast %160 : vector<1x32xf32> to vector<18x32xf32>
    %162 = arith.mulf %157, %161 : vector<18x32xf32>
    %c0_57 = arith.constant 0 : index
    %c0_58 = arith.constant 0 : index
    %163 = vector.load %arg3[%c0_57, %c0_58] : memref<18x1xi32, #tpu.memory_space<vmem>>, vector<18x1xi32>
    %cst_59 = arith.constant 0.000000e+00 : f32
    %164 = vector.broadcast %cst_59 : f32 to vector<18x32xf32>
    %cst_60 = arith.constant 0.000000e+00 : f32
    %165 = vector.broadcast %cst_60 : f32 to vector<3x32xf32>
    %166 = vector.extract_strided_slice %162 {offsets = [0, 0], sizes = [15, 32], strides = [1, 1]} : vector<18x32xf32> to vector<15x32xf32>
    %167 = tpu.concatenate %165, %166 in 0 : vector<3x32xf32>, vector<15x32xf32> -> vector<18x32xf32>
    %c-3_i32_61 = arith.constant -3 : i32
    %168 = vector.broadcast %c-3_i32_61 : i32 to vector<18x1xi32>
    %169 = arith.addi %163, %168 : vector<18x1xi32>
    %c0_i32_62 = arith.constant 0 : i32
    %170 = vector.broadcast %c0_i32_62 : i32 to vector<18x1xi32>
    %171 = arith.cmpi sge, %169, %170 : vector<18x1xi32>
    %c9_i32 = arith.constant 9 : i32
    %172 = vector.broadcast %c9_i32 : i32 to vector<18x1xi32>
    %173 = arith.cmpi slt, %169, %172 : vector<18x1xi32>
    %174 = arith.andi %171, %173 : vector<18x1xi1>
    %175 = arith.extui %174 : vector<18x1xi1> to vector<18x1xi32>
    %176 = arith.sitofp %175 : vector<18x1xi32> to vector<18x1xf32>
    %177 = vector.broadcast %176 : vector<18x1xf32> to vector<18x32xf32>
    %178 = arith.mulf %167, %177 : vector<18x32xf32>
    %c0_63 = arith.constant 0 : index
    %c0_64 = arith.constant 0 : index
    %c0_65 = arith.constant 0 : index
    %179 = vector.load %arg7[%c0_63, %c0_64, %c0_65] : memref<7x32x32xf32, #tpu.memory_space<vmem>>, vector<1x32x32xf32>
    %180 = vector.shape_cast %179 : vector<1x32x32xf32> to vector<32x32xf32>
    %cst_66 = arith.constant dense<0.000000e+00> : vector<18x32xf32>
    %181 = tpu.matmul %178, %180, %cst_66 {dimension_numbers = #tpu.dot_dimension_numbers<[1], [0], [0], [1], [0, 0, 1, 1], [], []>} : vector<18x32xf32>, vector<32x32xf32>, vector<18x32xf32> -> vector<18x32xf32>
    %182 = arith.addf %164, %181 : vector<18x32xf32>
    %cst_67 = arith.constant 0.000000e+00 : f32
    %183 = vector.broadcast %cst_67 : f32 to vector<2x32xf32>
    %184 = vector.extract_strided_slice %162 {offsets = [0, 0], sizes = [16, 32], strides = [1, 1]} : vector<18x32xf32> to vector<16x32xf32>
    %185 = tpu.concatenate %183, %184 in 0 : vector<2x32xf32>, vector<16x32xf32> -> vector<18x32xf32>
    %c-2_i32_68 = arith.constant -2 : i32
    %186 = vector.broadcast %c-2_i32_68 : i32 to vector<18x1xi32>
    %187 = arith.addi %163, %186 : vector<18x1xi32>
    %c0_i32_69 = arith.constant 0 : i32
    %188 = vector.broadcast %c0_i32_69 : i32 to vector<18x1xi32>
    %189 = arith.cmpi sge, %187, %188 : vector<18x1xi32>
    %c9_i32_70 = arith.constant 9 : i32
    %190 = vector.broadcast %c9_i32_70 : i32 to vector<18x1xi32>
    %191 = arith.cmpi slt, %187, %190 : vector<18x1xi32>
    %192 = arith.andi %189, %191 : vector<18x1xi1>
    %193 = arith.extui %192 : vector<18x1xi1> to vector<18x1xi32>
    %194 = arith.sitofp %193 : vector<18x1xi32> to vector<18x1xf32>
    %195 = vector.broadcast %194 : vector<18x1xf32> to vector<18x32xf32>
    %196 = arith.mulf %185, %195 : vector<18x32xf32>
    %c1_71 = arith.constant 1 : index
    %c0_72 = arith.constant 0 : index
    %c0_73 = arith.constant 0 : index
    %197 = vector.load %arg7[%c1_71, %c0_72, %c0_73] : memref<7x32x32xf32, #tpu.memory_space<vmem>>, vector<1x32x32xf32>
    %198 = vector.shape_cast %197 : vector<1x32x32xf32> to vector<32x32xf32>
    %cst_74 = arith.constant dense<0.000000e+00> : vector<18x32xf32>
    %199 = tpu.matmul %196, %198, %cst_74 {dimension_numbers = #tpu.dot_dimension_numbers<[1], [0], [0], [1], [0, 0, 1, 1], [], []>} : vector<18x32xf32>, vector<32x32xf32>, vector<18x32xf32> -> vector<18x32xf32>
    %200 = arith.addf %182, %199 : vector<18x32xf32>
    %cst_75 = arith.constant 0.000000e+00 : f32
    %201 = vector.broadcast %cst_75 : f32 to vector<1x32xf32>
    %202 = vector.extract_strided_slice %162 {offsets = [0, 0], sizes = [17, 32], strides = [1, 1]} : vector<18x32xf32> to vector<17x32xf32>
    %203 = tpu.concatenate %201, %202 in 0 : vector<1x32xf32>, vector<17x32xf32> -> vector<18x32xf32>
    %c-1_i32_76 = arith.constant -1 : i32
    %204 = vector.broadcast %c-1_i32_76 : i32 to vector<18x1xi32>
    %205 = arith.addi %163, %204 : vector<18x1xi32>
    %c0_i32_77 = arith.constant 0 : i32
    %206 = vector.broadcast %c0_i32_77 : i32 to vector<18x1xi32>
    %207 = arith.cmpi sge, %205, %206 : vector<18x1xi32>
    %c9_i32_78 = arith.constant 9 : i32
    %208 = vector.broadcast %c9_i32_78 : i32 to vector<18x1xi32>
    %209 = arith.cmpi slt, %205, %208 : vector<18x1xi32>
    %210 = arith.andi %207, %209 : vector<18x1xi1>
    %211 = arith.extui %210 : vector<18x1xi1> to vector<18x1xi32>
    %212 = arith.sitofp %211 : vector<18x1xi32> to vector<18x1xf32>
    %213 = vector.broadcast %212 : vector<18x1xf32> to vector<18x32xf32>
    %214 = arith.mulf %203, %213 : vector<18x32xf32>
    %c2_79 = arith.constant 2 : index
    %c0_80 = arith.constant 0 : index
    %c0_81 = arith.constant 0 : index
    %215 = vector.load %arg7[%c2_79, %c0_80, %c0_81] : memref<7x32x32xf32, #tpu.memory_space<vmem>>, vector<1x32x32xf32>
    %216 = vector.shape_cast %215 : vector<1x32x32xf32> to vector<32x32xf32>
    %cst_82 = arith.constant dense<0.000000e+00> : vector<18x32xf32>
    %217 = tpu.matmul %214, %216, %cst_82 {dimension_numbers = #tpu.dot_dimension_numbers<[1], [0], [0], [1], [0, 0, 1, 1], [], []>} : vector<18x32xf32>, vector<32x32xf32>, vector<18x32xf32> -> vector<18x32xf32>
    %218 = arith.addf %200, %217 : vector<18x32xf32>
    %c3_83 = arith.constant 3 : index
    %c0_84 = arith.constant 0 : index
    %c0_85 = arith.constant 0 : index
    %219 = vector.load %arg7[%c3_83, %c0_84, %c0_85] : memref<7x32x32xf32, #tpu.memory_space<vmem>>, vector<1x32x32xf32>
    %220 = vector.shape_cast %219 : vector<1x32x32xf32> to vector<32x32xf32>
    %cst_86 = arith.constant dense<0.000000e+00> : vector<18x32xf32>
    %221 = tpu.matmul %162, %220, %cst_86 {dimension_numbers = #tpu.dot_dimension_numbers<[1], [0], [0], [1], [0, 0, 1, 1], [], []>} : vector<18x32xf32>, vector<32x32xf32>, vector<18x32xf32> -> vector<18x32xf32>
    %222 = arith.addf %218, %221 : vector<18x32xf32>
    %223 = vector.extract_strided_slice %162 {offsets = [1, 0], sizes = [17, 32], strides = [1, 1]} : vector<18x32xf32> to vector<17x32xf32>
    %cst_87 = arith.constant 0.000000e+00 : f32
    %224 = vector.broadcast %cst_87 : f32 to vector<1x32xf32>
    %225 = tpu.concatenate %223, %224 in 0 : vector<17x32xf32>, vector<1x32xf32> -> vector<18x32xf32>
    %c1_i32_88 = arith.constant 1 : i32
    %226 = vector.broadcast %c1_i32_88 : i32 to vector<18x1xi32>
    %227 = arith.addi %163, %226 : vector<18x1xi32>
    %c0_i32_89 = arith.constant 0 : i32
    %228 = vector.broadcast %c0_i32_89 : i32 to vector<18x1xi32>
    %229 = arith.cmpi sge, %227, %228 : vector<18x1xi32>
    %c9_i32_90 = arith.constant 9 : i32
    %230 = vector.broadcast %c9_i32_90 : i32 to vector<18x1xi32>
    %231 = arith.cmpi slt, %227, %230 : vector<18x1xi32>
    %232 = arith.andi %229, %231 : vector<18x1xi1>
    %233 = arith.extui %232 : vector<18x1xi1> to vector<18x1xi32>
    %234 = arith.sitofp %233 : vector<18x1xi32> to vector<18x1xf32>
    %235 = vector.broadcast %234 : vector<18x1xf32> to vector<18x32xf32>
    %236 = arith.mulf %225, %235 : vector<18x32xf32>
    %c4_91 = arith.constant 4 : index
    %c0_92 = arith.constant 0 : index
    %c0_93 = arith.constant 0 : index
    %237 = vector.load %arg7[%c4_91, %c0_92, %c0_93] : memref<7x32x32xf32, #tpu.memory_space<vmem>>, vector<1x32x32xf32>
    %238 = vector.shape_cast %237 : vector<1x32x32xf32> to vector<32x32xf32>
    %cst_94 = arith.constant dense<0.000000e+00> : vector<18x32xf32>
    %239 = tpu.matmul %236, %238, %cst_94 {dimension_numbers = #tpu.dot_dimension_numbers<[1], [0], [0], [1], [0, 0, 1, 1], [], []>} : vector<18x32xf32>, vector<32x32xf32>, vector<18x32xf32> -> vector<18x32xf32>
    %240 = arith.addf %222, %239 : vector<18x32xf32>
    %241 = vector.extract_strided_slice %162 {offsets = [2, 0], sizes = [16, 32], strides = [1, 1]} : vector<18x32xf32> to vector<16x32xf32>
    %cst_95 = arith.constant 0.000000e+00 : f32
    %242 = vector.broadcast %cst_95 : f32 to vector<2x32xf32>
    %243 = tpu.concatenate %241, %242 in 0 : vector<16x32xf32>, vector<2x32xf32> -> vector<18x32xf32>
    %c2_i32_96 = arith.constant 2 : i32
    %244 = vector.broadcast %c2_i32_96 : i32 to vector<18x1xi32>
    %245 = arith.addi %163, %244 : vector<18x1xi32>
    %c0_i32_97 = arith.constant 0 : i32
    %246 = vector.broadcast %c0_i32_97 : i32 to vector<18x1xi32>
    %247 = arith.cmpi sge, %245, %246 : vector<18x1xi32>
    %c9_i32_98 = arith.constant 9 : i32
    %248 = vector.broadcast %c9_i32_98 : i32 to vector<18x1xi32>
    %249 = arith.cmpi slt, %245, %248 : vector<18x1xi32>
    %250 = arith.andi %247, %249 : vector<18x1xi1>
    %251 = arith.extui %250 : vector<18x1xi1> to vector<18x1xi32>
    %252 = arith.sitofp %251 : vector<18x1xi32> to vector<18x1xf32>
    %253 = vector.broadcast %252 : vector<18x1xf32> to vector<18x32xf32>
    %254 = arith.mulf %243, %253 : vector<18x32xf32>
    %c5_99 = arith.constant 5 : index
    %c0_100 = arith.constant 0 : index
    %c0_101 = arith.constant 0 : index
    %255 = vector.load %arg7[%c5_99, %c0_100, %c0_101] : memref<7x32x32xf32, #tpu.memory_space<vmem>>, vector<1x32x32xf32>
    %256 = vector.shape_cast %255 : vector<1x32x32xf32> to vector<32x32xf32>
    %cst_102 = arith.constant dense<0.000000e+00> : vector<18x32xf32>
    %257 = tpu.matmul %254, %256, %cst_102 {dimension_numbers = #tpu.dot_dimension_numbers<[1], [0], [0], [1], [0, 0, 1, 1], [], []>} : vector<18x32xf32>, vector<32x32xf32>, vector<18x32xf32> -> vector<18x32xf32>
    %258 = arith.addf %240, %257 : vector<18x32xf32>
    %259 = vector.extract_strided_slice %162 {offsets = [3, 0], sizes = [15, 32], strides = [1, 1]} : vector<18x32xf32> to vector<15x32xf32>
    %cst_103 = arith.constant 0.000000e+00 : f32
    %260 = vector.broadcast %cst_103 : f32 to vector<3x32xf32>
    %261 = tpu.concatenate %259, %260 in 0 : vector<15x32xf32>, vector<3x32xf32> -> vector<18x32xf32>
    %c3_i32_104 = arith.constant 3 : i32
    %262 = vector.broadcast %c3_i32_104 : i32 to vector<18x1xi32>
    %263 = arith.addi %163, %262 : vector<18x1xi32>
    %c0_i32_105 = arith.constant 0 : i32
    %264 = vector.broadcast %c0_i32_105 : i32 to vector<18x1xi32>
    %265 = arith.cmpi sge, %263, %264 : vector<18x1xi32>
    %c9_i32_106 = arith.constant 9 : i32
    %266 = vector.broadcast %c9_i32_106 : i32 to vector<18x1xi32>
    %267 = arith.cmpi slt, %263, %266 : vector<18x1xi32>
    %268 = arith.andi %265, %267 : vector<18x1xi1>
    %269 = arith.extui %268 : vector<18x1xi1> to vector<18x1xi32>
    %270 = arith.sitofp %269 : vector<18x1xi32> to vector<18x1xf32>
    %271 = vector.broadcast %270 : vector<18x1xf32> to vector<18x32xf32>
    %272 = arith.mulf %261, %271 : vector<18x32xf32>
    %c6_107 = arith.constant 6 : index
    %c0_108 = arith.constant 0 : index
    %c0_109 = arith.constant 0 : index
    %273 = vector.load %arg7[%c6_107, %c0_108, %c0_109] : memref<7x32x32xf32, #tpu.memory_space<vmem>>, vector<1x32x32xf32>
    %274 = vector.shape_cast %273 : vector<1x32x32xf32> to vector<32x32xf32>
    %cst_110 = arith.constant dense<0.000000e+00> : vector<18x32xf32>
    %275 = tpu.matmul %272, %274, %cst_110 {dimension_numbers = #tpu.dot_dimension_numbers<[1], [0], [0], [1], [0, 0, 1, 1], [], []>} : vector<18x32xf32>, vector<32x32xf32>, vector<18x32xf32> -> vector<18x32xf32>
    %276 = arith.addf %258, %275 : vector<18x32xf32>
    %c0_111 = arith.constant 0 : index
    %c0_112 = arith.constant 0 : index
    %277 = vector.load %arg8[%c0_111, %c0_112] : memref<1x32xf32, #tpu.memory_space<vmem>>, vector<1x32xf32>
    %278 = vector.broadcast %277 : vector<1x32xf32> to vector<18x32xf32>
    %279 = arith.addf %276, %278 : vector<18x32xf32>
    %cst_113 = arith.constant 0.000000e+00 : f32
    %280 = vector.broadcast %cst_113 : f32 to vector<18x32xf32>
    %281 = arith.maximumf %279, %280 : vector<18x32xf32>
    %282 = vector.extract_strided_slice %281 {offsets = [1, 0], sizes = [17, 32], strides = [1, 1]} : vector<18x32xf32> to vector<17x32xf32>
    %cst_114 = arith.constant 0.000000e+00 : f32
    %283 = vector.broadcast %cst_114 : f32 to vector<1x32xf32>
    %284 = tpu.concatenate %282, %283 in 0 : vector<17x32xf32>, vector<1x32xf32> -> vector<18x32xf32>
    %285 = vector.extract_strided_slice %281 {offsets = [2, 0], sizes = [16, 32], strides = [1, 1]} : vector<18x32xf32> to vector<16x32xf32>
    %cst_115 = arith.constant 0.000000e+00 : f32
    %286 = vector.broadcast %cst_115 : f32 to vector<2x32xf32>
    %287 = tpu.concatenate %285, %286 in 0 : vector<16x32xf32>, vector<2x32xf32> -> vector<18x32xf32>
    %288 = arith.maximumf %281, %284 : vector<18x32xf32>
    %289 = arith.maximumf %288, %287 : vector<18x32xf32>
    %290 = tpu.iota {dimensions = array<i32: 0>} : vector<6x18xi32>
    %291 = tpu.iota {dimensions = array<i32: 1>} : vector<6x18xi32>
    %c3_i32_116 = arith.constant 3 : i32
    %292 = vector.broadcast %c3_i32_116 : i32 to vector<6x18xi32>
    %293 = arith.muli %292, %290 : vector<6x18xi32>
    %294 = arith.cmpi eq, %291, %293 : vector<6x18xi32>
    %295 = arith.extui %294 : vector<6x18xi1> to vector<6x18xi32>
    %296 = arith.sitofp %295 : vector<6x18xi32> to vector<6x18xf32>
    %cst_117 = arith.constant dense<0.000000e+00> : vector<6x32xf32>
    %297 = tpu.matmul %296, %289, %cst_117 {dimension_numbers = #tpu.dot_dimension_numbers<[1], [0], [0], [1], [0, 0, 1, 1], [], []>} : vector<6x18xf32>, vector<18x32xf32>, vector<6x32xf32> -> vector<6x32xf32>
    %cst_118 = arith.constant dense<0.000000e+00> : vector<32xf32>
    %298 = vector.multi_reduction <add>, %297, %cst_118 [0] : vector<6x32xf32> to vector<32xf32>
    %299 = vector.shape_cast %298 : vector<32xf32> to vector<1x32xf32>
    %cst_119 = arith.constant 6.000000e+00 : f32
    %300 = vector.broadcast %cst_119 : f32 to vector<1x32xf32>
    %301 = arith.divf %299, %300 : vector<1x32xf32>
    %302 = arith.mulf %297, %297 : vector<6x32xf32>
    %cst_120 = arith.constant dense<0.000000e+00> : vector<32xf32>
    %303 = vector.multi_reduction <add>, %302, %cst_120 [0] : vector<6x32xf32> to vector<32xf32>
    %304 = vector.shape_cast %303 : vector<32xf32> to vector<1x32xf32>
    %cst_121 = arith.constant 6.000000e+00 : f32
    %305 = vector.broadcast %cst_121 : f32 to vector<1x32xf32>
    %306 = arith.divf %304, %305 : vector<1x32xf32>
    %307 = arith.mulf %301, %301 : vector<1x32xf32>
    %308 = arith.subf %306, %307 : vector<1x32xf32>
    %cst_122 = arith.constant 0.000000e+00 : f32
    %309 = vector.broadcast %cst_122 : f32 to vector<1x32xf32>
    %310 = arith.maximumf %308, %309 : vector<1x32xf32>
    %311 = vector.broadcast %301 : vector<1x32xf32> to vector<6x32xf32>
    %312 = arith.subf %297, %311 : vector<6x32xf32>
    %cst_123 = arith.constant 9.99999974E-6 : f32
    %313 = vector.broadcast %cst_123 : f32 to vector<1x32xf32>
    %314 = arith.addf %310, %313 : vector<1x32xf32>
    %315 = math.rsqrt %314 : vector<1x32xf32>
    %316 = vector.broadcast %315 : vector<1x32xf32> to vector<6x32xf32>
    %317 = arith.mulf %312, %316 : vector<6x32xf32>
    %c0_124 = arith.constant 0 : index
    %c0_125 = arith.constant 0 : index
    %318 = vector.load %arg4[%c0_124, %c0_125] : memref<6x1xi32, #tpu.memory_space<vmem>>, vector<6x1xi32>
    %cst_126 = arith.constant 0.000000e+00 : f32
    %319 = vector.broadcast %cst_126 : f32 to vector<6x32xf32>
    %cst_127 = arith.constant 0.000000e+00 : f32
    %320 = vector.broadcast %cst_127 : f32 to vector<1x32xf32>
    %321 = vector.extract_strided_slice %317 {offsets = [0, 0], sizes = [5, 32], strides = [1, 1]} : vector<6x32xf32> to vector<5x32xf32>
    %322 = tpu.concatenate %320, %321 in 0 : vector<1x32xf32>, vector<5x32xf32> -> vector<6x32xf32>
    %c-1_i32_128 = arith.constant -1 : i32
    %323 = vector.broadcast %c-1_i32_128 : i32 to vector<6x1xi32>
    %324 = arith.addi %318, %323 : vector<6x1xi32>
    %c0_i32_129 = arith.constant 0 : i32
    %325 = vector.broadcast %c0_i32_129 : i32 to vector<6x1xi32>
    %326 = arith.cmpi sge, %324, %325 : vector<6x1xi32>
    %c3_i32_130 = arith.constant 3 : i32
    %327 = vector.broadcast %c3_i32_130 : i32 to vector<6x1xi32>
    %328 = arith.cmpi slt, %324, %327 : vector<6x1xi32>
    %329 = arith.andi %326, %328 : vector<6x1xi1>
    %330 = arith.extui %329 : vector<6x1xi1> to vector<6x1xi32>
    %331 = arith.sitofp %330 : vector<6x1xi32> to vector<6x1xf32>
    %332 = vector.broadcast %331 : vector<6x1xf32> to vector<6x32xf32>
    %333 = arith.mulf %322, %332 : vector<6x32xf32>
    %c0_131 = arith.constant 0 : index
    %c0_132 = arith.constant 0 : index
    %c0_133 = arith.constant 0 : index
    %334 = vector.load %arg9[%c0_131, %c0_132, %c0_133] : memref<3x32x32xf32, #tpu.memory_space<vmem>>, vector<1x32x32xf32>
    %335 = vector.shape_cast %334 : vector<1x32x32xf32> to vector<32x32xf32>
    %cst_134 = arith.constant dense<0.000000e+00> : vector<6x32xf32>
    %336 = tpu.matmul %333, %335, %cst_134 {dimension_numbers = #tpu.dot_dimension_numbers<[1], [0], [0], [1], [0, 0, 1, 1], [], []>} : vector<6x32xf32>, vector<32x32xf32>, vector<6x32xf32> -> vector<6x32xf32>
    %337 = arith.addf %319, %336 : vector<6x32xf32>
    %c1_135 = arith.constant 1 : index
    %c0_136 = arith.constant 0 : index
    %c0_137 = arith.constant 0 : index
    %338 = vector.load %arg9[%c1_135, %c0_136, %c0_137] : memref<3x32x32xf32, #tpu.memory_space<vmem>>, vector<1x32x32xf32>
    %339 = vector.shape_cast %338 : vector<1x32x32xf32> to vector<32x32xf32>
    %cst_138 = arith.constant dense<0.000000e+00> : vector<6x32xf32>
    %340 = tpu.matmul %317, %339, %cst_138 {dimension_numbers = #tpu.dot_dimension_numbers<[1], [0], [0], [1], [0, 0, 1, 1], [], []>} : vector<6x32xf32>, vector<32x32xf32>, vector<6x32xf32> -> vector<6x32xf32>
    %341 = arith.addf %337, %340 : vector<6x32xf32>
    %342 = vector.extract_strided_slice %317 {offsets = [1, 0], sizes = [5, 32], strides = [1, 1]} : vector<6x32xf32> to vector<5x32xf32>
    %cst_139 = arith.constant 0.000000e+00 : f32
    %343 = vector.broadcast %cst_139 : f32 to vector<1x32xf32>
    %344 = tpu.concatenate %342, %343 in 0 : vector<5x32xf32>, vector<1x32xf32> -> vector<6x32xf32>
    %c1_i32_140 = arith.constant 1 : i32
    %345 = vector.broadcast %c1_i32_140 : i32 to vector<6x1xi32>
    %346 = arith.addi %318, %345 : vector<6x1xi32>
    %c0_i32_141 = arith.constant 0 : i32
    %347 = vector.broadcast %c0_i32_141 : i32 to vector<6x1xi32>
    %348 = arith.cmpi sge, %346, %347 : vector<6x1xi32>
    %c3_i32_142 = arith.constant 3 : i32
    %349 = vector.broadcast %c3_i32_142 : i32 to vector<6x1xi32>
    %350 = arith.cmpi slt, %346, %349 : vector<6x1xi32>
    %351 = arith.andi %348, %350 : vector<6x1xi1>
    %352 = arith.extui %351 : vector<6x1xi1> to vector<6x1xi32>
    %353 = arith.sitofp %352 : vector<6x1xi32> to vector<6x1xf32>
    %354 = vector.broadcast %353 : vector<6x1xf32> to vector<6x32xf32>
    %355 = arith.mulf %344, %354 : vector<6x32xf32>
    %c2_143 = arith.constant 2 : index
    %c0_144 = arith.constant 0 : index
    %c0_145 = arith.constant 0 : index
    %356 = vector.load %arg9[%c2_143, %c0_144, %c0_145] : memref<3x32x32xf32, #tpu.memory_space<vmem>>, vector<1x32x32xf32>
    %357 = vector.shape_cast %356 : vector<1x32x32xf32> to vector<32x32xf32>
    %cst_146 = arith.constant dense<0.000000e+00> : vector<6x32xf32>
    %358 = tpu.matmul %355, %357, %cst_146 {dimension_numbers = #tpu.dot_dimension_numbers<[1], [0], [0], [1], [0, 0, 1, 1], [], []>} : vector<6x32xf32>, vector<32x32xf32>, vector<6x32xf32> -> vector<6x32xf32>
    %359 = arith.addf %341, %358 : vector<6x32xf32>
    %c0_147 = arith.constant 0 : index
    %c0_148 = arith.constant 0 : index
    %360 = vector.load %arg10[%c0_147, %c0_148] : memref<1x32xf32, #tpu.memory_space<vmem>>, vector<1x32xf32>
    %361 = vector.broadcast %360 : vector<1x32xf32> to vector<6x32xf32>
    %362 = arith.addf %359, %361 : vector<6x32xf32>
    %cst_149 = arith.constant 0.000000e+00 : f32
    %363 = vector.broadcast %cst_149 : f32 to vector<6x32xf32>
    %364 = arith.maximumf %362, %363 : vector<6x32xf32>
    %cst_150 = arith.constant dense<0.000000e+00> : vector<32xf32>
    %365 = vector.multi_reduction <add>, %364, %cst_150 [0] : vector<6x32xf32> to vector<32xf32>
    %366 = vector.shape_cast %365 : vector<32xf32> to vector<1x32xf32>
    %cst_151 = arith.constant 6.000000e+00 : f32
    %367 = vector.broadcast %cst_151 : f32 to vector<1x32xf32>
    %368 = arith.divf %366, %367 : vector<1x32xf32>
    %369 = arith.mulf %364, %364 : vector<6x32xf32>
    %cst_152 = arith.constant dense<0.000000e+00> : vector<32xf32>
    %370 = vector.multi_reduction <add>, %369, %cst_152 [0] : vector<6x32xf32> to vector<32xf32>
    %371 = vector.shape_cast %370 : vector<32xf32> to vector<1x32xf32>
    %cst_153 = arith.constant 6.000000e+00 : f32
    %372 = vector.broadcast %cst_153 : f32 to vector<1x32xf32>
    %373 = arith.divf %371, %372 : vector<1x32xf32>
    %374 = arith.mulf %368, %368 : vector<1x32xf32>
    %375 = arith.subf %373, %374 : vector<1x32xf32>
    %cst_154 = arith.constant 0.000000e+00 : f32
    %376 = vector.broadcast %cst_154 : f32 to vector<1x32xf32>
    %377 = arith.maximumf %375, %376 : vector<1x32xf32>
    %378 = vector.broadcast %368 : vector<1x32xf32> to vector<6x32xf32>
    %379 = arith.subf %364, %378 : vector<6x32xf32>
    %cst_155 = arith.constant 9.99999974E-6 : f32
    %380 = vector.broadcast %cst_155 : f32 to vector<1x32xf32>
    %381 = arith.addf %377, %380 : vector<1x32xf32>
    %382 = math.rsqrt %381 : vector<1x32xf32>
    %383 = vector.broadcast %382 : vector<1x32xf32> to vector<6x32xf32>
    %384 = arith.mulf %379, %383 : vector<6x32xf32>
    %c0_156 = arith.constant 0 : index
    %c0_157 = arith.constant 0 : index
    %385 = vector.load %arg4[%c0_156, %c0_157] : memref<6x1xi32, #tpu.memory_space<vmem>>, vector<6x1xi32>
    %cst_158 = arith.constant 0.000000e+00 : f32
    %386 = vector.broadcast %cst_158 : f32 to vector<6x32xf32>
    %cst_159 = arith.constant 0.000000e+00 : f32
    %387 = vector.broadcast %cst_159 : f32 to vector<1x32xf32>
    %388 = vector.extract_strided_slice %384 {offsets = [0, 0], sizes = [5, 32], strides = [1, 1]} : vector<6x32xf32> to vector<5x32xf32>
    %389 = tpu.concatenate %387, %388 in 0 : vector<1x32xf32>, vector<5x32xf32> -> vector<6x32xf32>
    %c-1_i32_160 = arith.constant -1 : i32
    %390 = vector.broadcast %c-1_i32_160 : i32 to vector<6x1xi32>
    %391 = arith.addi %385, %390 : vector<6x1xi32>
    %c0_i32_161 = arith.constant 0 : i32
    %392 = vector.broadcast %c0_i32_161 : i32 to vector<6x1xi32>
    %393 = arith.cmpi sge, %391, %392 : vector<6x1xi32>
    %c3_i32_162 = arith.constant 3 : i32
    %394 = vector.broadcast %c3_i32_162 : i32 to vector<6x1xi32>
    %395 = arith.cmpi slt, %391, %394 : vector<6x1xi32>
    %396 = arith.andi %393, %395 : vector<6x1xi1>
    %397 = arith.extui %396 : vector<6x1xi1> to vector<6x1xi32>
    %398 = arith.sitofp %397 : vector<6x1xi32> to vector<6x1xf32>
    %399 = vector.broadcast %398 : vector<6x1xf32> to vector<6x32xf32>
    %400 = arith.mulf %389, %399 : vector<6x32xf32>
    %c0_163 = arith.constant 0 : index
    %c0_164 = arith.constant 0 : index
    %c0_165 = arith.constant 0 : index
    %401 = vector.load %arg11[%c0_163, %c0_164, %c0_165] : memref<3x32x32xf32, #tpu.memory_space<vmem>>, vector<1x32x32xf32>
    %402 = vector.shape_cast %401 : vector<1x32x32xf32> to vector<32x32xf32>
    %cst_166 = arith.constant dense<0.000000e+00> : vector<6x32xf32>
    %403 = tpu.matmul %400, %402, %cst_166 {dimension_numbers = #tpu.dot_dimension_numbers<[1], [0], [0], [1], [0, 0, 1, 1], [], []>} : vector<6x32xf32>, vector<32x32xf32>, vector<6x32xf32> -> vector<6x32xf32>
    %404 = arith.addf %386, %403 : vector<6x32xf32>
    %c1_167 = arith.constant 1 : index
    %c0_168 = arith.constant 0 : index
    %c0_169 = arith.constant 0 : index
    %405 = vector.load %arg11[%c1_167, %c0_168, %c0_169] : memref<3x32x32xf32, #tpu.memory_space<vmem>>, vector<1x32x32xf32>
    %406 = vector.shape_cast %405 : vector<1x32x32xf32> to vector<32x32xf32>
    %cst_170 = arith.constant dense<0.000000e+00> : vector<6x32xf32>
    %407 = tpu.matmul %384, %406, %cst_170 {dimension_numbers = #tpu.dot_dimension_numbers<[1], [0], [0], [1], [0, 0, 1, 1], [], []>} : vector<6x32xf32>, vector<32x32xf32>, vector<6x32xf32> -> vector<6x32xf32>
    %408 = arith.addf %404, %407 : vector<6x32xf32>
    %409 = vector.extract_strided_slice %384 {offsets = [1, 0], sizes = [5, 32], strides = [1, 1]} : vector<6x32xf32> to vector<5x32xf32>
    %cst_171 = arith.constant 0.000000e+00 : f32
    %410 = vector.broadcast %cst_171 : f32 to vector<1x32xf32>
    %411 = tpu.concatenate %409, %410 in 0 : vector<5x32xf32>, vector<1x32xf32> -> vector<6x32xf32>
    %c1_i32_172 = arith.constant 1 : i32
    %412 = vector.broadcast %c1_i32_172 : i32 to vector<6x1xi32>
    %413 = arith.addi %385, %412 : vector<6x1xi32>
    %c0_i32_173 = arith.constant 0 : i32
    %414 = vector.broadcast %c0_i32_173 : i32 to vector<6x1xi32>
    %415 = arith.cmpi sge, %413, %414 : vector<6x1xi32>
    %c3_i32_174 = arith.constant 3 : i32
    %416 = vector.broadcast %c3_i32_174 : i32 to vector<6x1xi32>
    %417 = arith.cmpi slt, %413, %416 : vector<6x1xi32>
    %418 = arith.andi %415, %417 : vector<6x1xi1>
    %419 = arith.extui %418 : vector<6x1xi1> to vector<6x1xi32>
    %420 = arith.sitofp %419 : vector<6x1xi32> to vector<6x1xf32>
    %421 = vector.broadcast %420 : vector<6x1xf32> to vector<6x32xf32>
    %422 = arith.mulf %411, %421 : vector<6x32xf32>
    %c2_175 = arith.constant 2 : index
    %c0_176 = arith.constant 0 : index
    %c0_177 = arith.constant 0 : index
    %423 = vector.load %arg11[%c2_175, %c0_176, %c0_177] : memref<3x32x32xf32, #tpu.memory_space<vmem>>, vector<1x32x32xf32>
    %424 = vector.shape_cast %423 : vector<1x32x32xf32> to vector<32x32xf32>
    %cst_178 = arith.constant dense<0.000000e+00> : vector<6x32xf32>
    %425 = tpu.matmul %422, %424, %cst_178 {dimension_numbers = #tpu.dot_dimension_numbers<[1], [0], [0], [1], [0, 0, 1, 1], [], []>} : vector<6x32xf32>, vector<32x32xf32>, vector<6x32xf32> -> vector<6x32xf32>
    %426 = arith.addf %408, %425 : vector<6x32xf32>
    %c0_179 = arith.constant 0 : index
    %c0_180 = arith.constant 0 : index
    %427 = vector.load %arg12[%c0_179, %c0_180] : memref<1x32xf32, #tpu.memory_space<vmem>>, vector<1x32xf32>
    %428 = vector.broadcast %427 : vector<1x32xf32> to vector<6x32xf32>
    %429 = arith.addf %426, %428 : vector<6x32xf32>
    %cst_181 = arith.constant 0.000000e+00 : f32
    %430 = vector.broadcast %cst_181 : f32 to vector<6x32xf32>
    %431 = arith.maximumf %429, %430 : vector<6x32xf32>
    %cst_182 = arith.constant dense<0.000000e+00> : vector<32xf32>
    %432 = vector.multi_reduction <add>, %431, %cst_182 [0] : vector<6x32xf32> to vector<32xf32>
    %433 = vector.shape_cast %432 : vector<32xf32> to vector<1x32xf32>
    %cst_183 = arith.constant 6.000000e+00 : f32
    %434 = vector.broadcast %cst_183 : f32 to vector<1x32xf32>
    %435 = arith.divf %433, %434 : vector<1x32xf32>
    %436 = arith.mulf %431, %431 : vector<6x32xf32>
    %cst_184 = arith.constant dense<0.000000e+00> : vector<32xf32>
    %437 = vector.multi_reduction <add>, %436, %cst_184 [0] : vector<6x32xf32> to vector<32xf32>
    %438 = vector.shape_cast %437 : vector<32xf32> to vector<1x32xf32>
    %cst_185 = arith.constant 6.000000e+00 : f32
    %439 = vector.broadcast %cst_185 : f32 to vector<1x32xf32>
    %440 = arith.divf %438, %439 : vector<1x32xf32>
    %441 = arith.mulf %435, %435 : vector<1x32xf32>
    %442 = arith.subf %440, %441 : vector<1x32xf32>
    %cst_186 = arith.constant 0.000000e+00 : f32
    %443 = vector.broadcast %cst_186 : f32 to vector<1x32xf32>
    %444 = arith.maximumf %442, %443 : vector<1x32xf32>
    %445 = vector.broadcast %435 : vector<1x32xf32> to vector<6x32xf32>
    %446 = arith.subf %431, %445 : vector<6x32xf32>
    %cst_187 = arith.constant 9.99999974E-6 : f32
    %447 = vector.broadcast %cst_187 : f32 to vector<1x32xf32>
    %448 = arith.addf %444, %447 : vector<1x32xf32>
    %449 = math.rsqrt %448 : vector<1x32xf32>
    %450 = vector.broadcast %449 : vector<1x32xf32> to vector<6x32xf32>
    %451 = arith.mulf %446, %450 : vector<6x32xf32>
    %c0_188 = arith.constant 0 : index
    %c0_189 = arith.constant 0 : index
    %452 = vector.load %arg4[%c0_188, %c0_189] : memref<6x1xi32, #tpu.memory_space<vmem>>, vector<6x1xi32>
    %cst_190 = arith.constant 0.000000e+00 : f32
    %453 = vector.broadcast %cst_190 : f32 to vector<6x32xf32>
    %cst_191 = arith.constant 0.000000e+00 : f32
    %454 = vector.broadcast %cst_191 : f32 to vector<1x32xf32>
    %455 = vector.extract_strided_slice %451 {offsets = [0, 0], sizes = [5, 32], strides = [1, 1]} : vector<6x32xf32> to vector<5x32xf32>
    %456 = tpu.concatenate %454, %455 in 0 : vector<1x32xf32>, vector<5x32xf32> -> vector<6x32xf32>
    %c-1_i32_192 = arith.constant -1 : i32
    %457 = vector.broadcast %c-1_i32_192 : i32 to vector<6x1xi32>
    %458 = arith.addi %452, %457 : vector<6x1xi32>
    %c0_i32_193 = arith.constant 0 : i32
    %459 = vector.broadcast %c0_i32_193 : i32 to vector<6x1xi32>
    %460 = arith.cmpi sge, %458, %459 : vector<6x1xi32>
    %c3_i32_194 = arith.constant 3 : i32
    %461 = vector.broadcast %c3_i32_194 : i32 to vector<6x1xi32>
    %462 = arith.cmpi slt, %458, %461 : vector<6x1xi32>
    %463 = arith.andi %460, %462 : vector<6x1xi1>
    %464 = arith.extui %463 : vector<6x1xi1> to vector<6x1xi32>
    %465 = arith.sitofp %464 : vector<6x1xi32> to vector<6x1xf32>
    %466 = vector.broadcast %465 : vector<6x1xf32> to vector<6x32xf32>
    %467 = arith.mulf %456, %466 : vector<6x32xf32>
    %c0_195 = arith.constant 0 : index
    %c0_196 = arith.constant 0 : index
    %c0_197 = arith.constant 0 : index
    %468 = vector.load %arg13[%c0_195, %c0_196, %c0_197] : memref<3x32x32xf32, #tpu.memory_space<vmem>>, vector<1x32x32xf32>
    %469 = vector.shape_cast %468 : vector<1x32x32xf32> to vector<32x32xf32>
    %cst_198 = arith.constant dense<0.000000e+00> : vector<6x32xf32>
    %470 = tpu.matmul %467, %469, %cst_198 {dimension_numbers = #tpu.dot_dimension_numbers<[1], [0], [0], [1], [0, 0, 1, 1], [], []>} : vector<6x32xf32>, vector<32x32xf32>, vector<6x32xf32> -> vector<6x32xf32>
    %471 = arith.addf %453, %470 : vector<6x32xf32>
    %c1_199 = arith.constant 1 : index
    %c0_200 = arith.constant 0 : index
    %c0_201 = arith.constant 0 : index
    %472 = vector.load %arg13[%c1_199, %c0_200, %c0_201] : memref<3x32x32xf32, #tpu.memory_space<vmem>>, vector<1x32x32xf32>
    %473 = vector.shape_cast %472 : vector<1x32x32xf32> to vector<32x32xf32>
    %cst_202 = arith.constant dense<0.000000e+00> : vector<6x32xf32>
    %474 = tpu.matmul %451, %473, %cst_202 {dimension_numbers = #tpu.dot_dimension_numbers<[1], [0], [0], [1], [0, 0, 1, 1], [], []>} : vector<6x32xf32>, vector<32x32xf32>, vector<6x32xf32> -> vector<6x32xf32>
    %475 = arith.addf %471, %474 : vector<6x32xf32>
    %476 = vector.extract_strided_slice %451 {offsets = [1, 0], sizes = [5, 32], strides = [1, 1]} : vector<6x32xf32> to vector<5x32xf32>
    %cst_203 = arith.constant 0.000000e+00 : f32
    %477 = vector.broadcast %cst_203 : f32 to vector<1x32xf32>
    %478 = tpu.concatenate %476, %477 in 0 : vector<5x32xf32>, vector<1x32xf32> -> vector<6x32xf32>
    %c1_i32_204 = arith.constant 1 : i32
    %479 = vector.broadcast %c1_i32_204 : i32 to vector<6x1xi32>
    %480 = arith.addi %452, %479 : vector<6x1xi32>
    %c0_i32_205 = arith.constant 0 : i32
    %481 = vector.broadcast %c0_i32_205 : i32 to vector<6x1xi32>
    %482 = arith.cmpi sge, %480, %481 : vector<6x1xi32>
    %c3_i32_206 = arith.constant 3 : i32
    %483 = vector.broadcast %c3_i32_206 : i32 to vector<6x1xi32>
    %484 = arith.cmpi slt, %480, %483 : vector<6x1xi32>
    %485 = arith.andi %482, %484 : vector<6x1xi1>
    %486 = arith.extui %485 : vector<6x1xi1> to vector<6x1xi32>
    %487 = arith.sitofp %486 : vector<6x1xi32> to vector<6x1xf32>
    %488 = vector.broadcast %487 : vector<6x1xf32> to vector<6x32xf32>
    %489 = arith.mulf %478, %488 : vector<6x32xf32>
    %c2_207 = arith.constant 2 : index
    %c0_208 = arith.constant 0 : index
    %c0_209 = arith.constant 0 : index
    %490 = vector.load %arg13[%c2_207, %c0_208, %c0_209] : memref<3x32x32xf32, #tpu.memory_space<vmem>>, vector<1x32x32xf32>
    %491 = vector.shape_cast %490 : vector<1x32x32xf32> to vector<32x32xf32>
    %cst_210 = arith.constant dense<0.000000e+00> : vector<6x32xf32>
    %492 = tpu.matmul %489, %491, %cst_210 {dimension_numbers = #tpu.dot_dimension_numbers<[1], [0], [0], [1], [0, 0, 1, 1], [], []>} : vector<6x32xf32>, vector<32x32xf32>, vector<6x32xf32> -> vector<6x32xf32>
    %493 = arith.addf %475, %492 : vector<6x32xf32>
    %c0_211 = arith.constant 0 : index
    %c0_212 = arith.constant 0 : index
    %494 = vector.load %arg14[%c0_211, %c0_212] : memref<1x32xf32, #tpu.memory_space<vmem>>, vector<1x32xf32>
    %495 = vector.broadcast %494 : vector<1x32xf32> to vector<6x32xf32>
    %496 = arith.addf %493, %495 : vector<6x32xf32>
    %cst_213 = arith.constant 0.000000e+00 : f32
    %497 = vector.broadcast %cst_213 : f32 to vector<6x32xf32>
    %498 = arith.maximumf %496, %497 : vector<6x32xf32>
    %cst_214 = arith.constant dense<0.000000e+00> : vector<32xf32>
    %499 = vector.multi_reduction <add>, %498, %cst_214 [0] : vector<6x32xf32> to vector<32xf32>
    %500 = vector.shape_cast %499 : vector<32xf32> to vector<1x32xf32>
    %cst_215 = arith.constant 6.000000e+00 : f32
    %501 = vector.broadcast %cst_215 : f32 to vector<1x32xf32>
    %502 = arith.divf %500, %501 : vector<1x32xf32>
    %503 = arith.mulf %498, %498 : vector<6x32xf32>
    %cst_216 = arith.constant dense<0.000000e+00> : vector<32xf32>
    %504 = vector.multi_reduction <add>, %503, %cst_216 [0] : vector<6x32xf32> to vector<32xf32>
    %505 = vector.shape_cast %504 : vector<32xf32> to vector<1x32xf32>
    %cst_217 = arith.constant 6.000000e+00 : f32
    %506 = vector.broadcast %cst_217 : f32 to vector<1x32xf32>
    %507 = arith.divf %505, %506 : vector<1x32xf32>
    %508 = arith.mulf %502, %502 : vector<1x32xf32>
    %509 = arith.subf %507, %508 : vector<1x32xf32>
    %cst_218 = arith.constant 0.000000e+00 : f32
    %510 = vector.broadcast %cst_218 : f32 to vector<1x32xf32>
    %511 = arith.maximumf %509, %510 : vector<1x32xf32>
    %512 = vector.broadcast %502 : vector<1x32xf32> to vector<6x32xf32>
    %513 = arith.subf %498, %512 : vector<6x32xf32>
    %cst_219 = arith.constant 9.99999974E-6 : f32
    %514 = vector.broadcast %cst_219 : f32 to vector<1x32xf32>
    %515 = arith.addf %511, %514 : vector<1x32xf32>
    %516 = math.rsqrt %515 : vector<1x32xf32>
    %517 = vector.broadcast %516 : vector<1x32xf32> to vector<6x32xf32>
    %518 = arith.mulf %513, %517 : vector<6x32xf32>
    %c0_220 = arith.constant 0 : index
    %c0_221 = arith.constant 0 : index
    %519 = vector.load %arg4[%c0_220, %c0_221] : memref<6x1xi32, #tpu.memory_space<vmem>>, vector<6x1xi32>
    %cst_222 = arith.constant 0.000000e+00 : f32
    %520 = vector.broadcast %cst_222 : f32 to vector<6x32xf32>
    %cst_223 = arith.constant 0.000000e+00 : f32
    %521 = vector.broadcast %cst_223 : f32 to vector<1x32xf32>
    %522 = vector.extract_strided_slice %518 {offsets = [0, 0], sizes = [5, 32], strides = [1, 1]} : vector<6x32xf32> to vector<5x32xf32>
    %523 = tpu.concatenate %521, %522 in 0 : vector<1x32xf32>, vector<5x32xf32> -> vector<6x32xf32>
    %c-1_i32_224 = arith.constant -1 : i32
    %524 = vector.broadcast %c-1_i32_224 : i32 to vector<6x1xi32>
    %525 = arith.addi %519, %524 : vector<6x1xi32>
    %c0_i32_225 = arith.constant 0 : i32
    %526 = vector.broadcast %c0_i32_225 : i32 to vector<6x1xi32>
    %527 = arith.cmpi sge, %525, %526 : vector<6x1xi32>
    %c3_i32_226 = arith.constant 3 : i32
    %528 = vector.broadcast %c3_i32_226 : i32 to vector<6x1xi32>
    %529 = arith.cmpi slt, %525, %528 : vector<6x1xi32>
    %530 = arith.andi %527, %529 : vector<6x1xi1>
    %531 = arith.extui %530 : vector<6x1xi1> to vector<6x1xi32>
    %532 = arith.sitofp %531 : vector<6x1xi32> to vector<6x1xf32>
    %533 = vector.broadcast %532 : vector<6x1xf32> to vector<6x32xf32>
    %534 = arith.mulf %523, %533 : vector<6x32xf32>
    %c0_227 = arith.constant 0 : index
    %c0_228 = arith.constant 0 : index
    %c0_229 = arith.constant 0 : index
    %535 = vector.load %arg15[%c0_227, %c0_228, %c0_229] : memref<3x32x32xf32, #tpu.memory_space<vmem>>, vector<1x32x32xf32>
    %536 = vector.shape_cast %535 : vector<1x32x32xf32> to vector<32x32xf32>
    %cst_230 = arith.constant dense<0.000000e+00> : vector<6x32xf32>
    %537 = tpu.matmul %534, %536, %cst_230 {dimension_numbers = #tpu.dot_dimension_numbers<[1], [0], [0], [1], [0, 0, 1, 1], [], []>} : vector<6x32xf32>, vector<32x32xf32>, vector<6x32xf32> -> vector<6x32xf32>
    %538 = arith.addf %520, %537 : vector<6x32xf32>
    %c1_231 = arith.constant 1 : index
    %c0_232 = arith.constant 0 : index
    %c0_233 = arith.constant 0 : index
    %539 = vector.load %arg15[%c1_231, %c0_232, %c0_233] : memref<3x32x32xf32, #tpu.memory_space<vmem>>, vector<1x32x32xf32>
    %540 = vector.shape_cast %539 : vector<1x32x32xf32> to vector<32x32xf32>
    %cst_234 = arith.constant dense<0.000000e+00> : vector<6x32xf32>
    %541 = tpu.matmul %518, %540, %cst_234 {dimension_numbers = #tpu.dot_dimension_numbers<[1], [0], [0], [1], [0, 0, 1, 1], [], []>} : vector<6x32xf32>, vector<32x32xf32>, vector<6x32xf32> -> vector<6x32xf32>
    %542 = arith.addf %538, %541 : vector<6x32xf32>
    %543 = vector.extract_strided_slice %518 {offsets = [1, 0], sizes = [5, 32], strides = [1, 1]} : vector<6x32xf32> to vector<5x32xf32>
    %cst_235 = arith.constant 0.000000e+00 : f32
    %544 = vector.broadcast %cst_235 : f32 to vector<1x32xf32>
    %545 = tpu.concatenate %543, %544 in 0 : vector<5x32xf32>, vector<1x32xf32> -> vector<6x32xf32>
    %c1_i32_236 = arith.constant 1 : i32
    %546 = vector.broadcast %c1_i32_236 : i32 to vector<6x1xi32>
    %547 = arith.addi %519, %546 : vector<6x1xi32>
    %c0_i32_237 = arith.constant 0 : i32
    %548 = vector.broadcast %c0_i32_237 : i32 to vector<6x1xi32>
    %549 = arith.cmpi sge, %547, %548 : vector<6x1xi32>
    %c3_i32_238 = arith.constant 3 : i32
    %550 = vector.broadcast %c3_i32_238 : i32 to vector<6x1xi32>
    %551 = arith.cmpi slt, %547, %550 : vector<6x1xi32>
    %552 = arith.andi %549, %551 : vector<6x1xi1>
    %553 = arith.extui %552 : vector<6x1xi1> to vector<6x1xi32>
    %554 = arith.sitofp %553 : vector<6x1xi32> to vector<6x1xf32>
    %555 = vector.broadcast %554 : vector<6x1xf32> to vector<6x32xf32>
    %556 = arith.mulf %545, %555 : vector<6x32xf32>
    %c2_239 = arith.constant 2 : index
    %c0_240 = arith.constant 0 : index
    %c0_241 = arith.constant 0 : index
    %557 = vector.load %arg15[%c2_239, %c0_240, %c0_241] : memref<3x32x32xf32, #tpu.memory_space<vmem>>, vector<1x32x32xf32>
    %558 = vector.shape_cast %557 : vector<1x32x32xf32> to vector<32x32xf32>
    %cst_242 = arith.constant dense<0.000000e+00> : vector<6x32xf32>
    %559 = tpu.matmul %556, %558, %cst_242 {dimension_numbers = #tpu.dot_dimension_numbers<[1], [0], [0], [1], [0, 0, 1, 1], [], []>} : vector<6x32xf32>, vector<32x32xf32>, vector<6x32xf32> -> vector<6x32xf32>
    %560 = arith.addf %542, %559 : vector<6x32xf32>
    %c0_243 = arith.constant 0 : index
    %c0_244 = arith.constant 0 : index
    %561 = vector.load %arg16[%c0_243, %c0_244] : memref<1x32xf32, #tpu.memory_space<vmem>>, vector<1x32xf32>
    %562 = vector.broadcast %561 : vector<1x32xf32> to vector<6x32xf32>
    %563 = arith.addf %560, %562 : vector<6x32xf32>
    %cst_245 = arith.constant 0.000000e+00 : f32
    %564 = vector.broadcast %cst_245 : f32 to vector<6x32xf32>
    %565 = arith.maximumf %563, %564 : vector<6x32xf32>
    %566 = vector.extract_strided_slice %565 {offsets = [1, 0], sizes = [5, 32], strides = [1, 1]} : vector<6x32xf32> to vector<5x32xf32>
    %cst_246 = arith.constant 0.000000e+00 : f32
    %567 = vector.broadcast %cst_246 : f32 to vector<1x32xf32>
    %568 = tpu.concatenate %566, %567 in 0 : vector<5x32xf32>, vector<1x32xf32> -> vector<6x32xf32>
    %569 = vector.extract_strided_slice %565 {offsets = [2, 0], sizes = [4, 32], strides = [1, 1]} : vector<6x32xf32> to vector<4x32xf32>
    %cst_247 = arith.constant 0.000000e+00 : f32
    %570 = vector.broadcast %cst_247 : f32 to vector<2x32xf32>
    %571 = tpu.concatenate %569, %570 in 0 : vector<4x32xf32>, vector<2x32xf32> -> vector<6x32xf32>
    %572 = arith.maximumf %565, %568 : vector<6x32xf32>
    %573 = arith.maximumf %572, %571 : vector<6x32xf32>
    %574 = tpu.iota {dimensions = array<i32: 0>} : vector<2x6xi32>
    %575 = tpu.iota {dimensions = array<i32: 1>} : vector<2x6xi32>
    %c3_i32_248 = arith.constant 3 : i32
    %576 = vector.broadcast %c3_i32_248 : i32 to vector<2x6xi32>
    %577 = arith.muli %576, %574 : vector<2x6xi32>
    %578 = arith.cmpi eq, %575, %577 : vector<2x6xi32>
    %579 = arith.extui %578 : vector<2x6xi1> to vector<2x6xi32>
    %580 = arith.sitofp %579 : vector<2x6xi32> to vector<2x6xf32>
    %cst_249 = arith.constant dense<0.000000e+00> : vector<2x32xf32>
    %581 = tpu.matmul %580, %573, %cst_249 {dimension_numbers = #tpu.dot_dimension_numbers<[1], [0], [0], [1], [0, 0, 1, 1], [], []>} : vector<2x6xf32>, vector<6x32xf32>, vector<2x32xf32> -> vector<2x32xf32>
    %cst_250 = arith.constant dense<0.000000e+00> : vector<32xf32>
    %582 = vector.multi_reduction <add>, %581, %cst_250 [0] : vector<2x32xf32> to vector<32xf32>
    %583 = vector.shape_cast %582 : vector<32xf32> to vector<1x32xf32>
    %cst_251 = arith.constant 2.000000e+00 : f32
    %584 = vector.broadcast %cst_251 : f32 to vector<1x32xf32>
    %585 = arith.divf %583, %584 : vector<1x32xf32>
    %586 = arith.mulf %581, %581 : vector<2x32xf32>
    %cst_252 = arith.constant dense<0.000000e+00> : vector<32xf32>
    %587 = vector.multi_reduction <add>, %586, %cst_252 [0] : vector<2x32xf32> to vector<32xf32>
    %588 = vector.shape_cast %587 : vector<32xf32> to vector<1x32xf32>
    %cst_253 = arith.constant 2.000000e+00 : f32
    %589 = vector.broadcast %cst_253 : f32 to vector<1x32xf32>
    %590 = arith.divf %588, %589 : vector<1x32xf32>
    %591 = arith.mulf %585, %585 : vector<1x32xf32>
    %592 = arith.subf %590, %591 : vector<1x32xf32>
    %cst_254 = arith.constant 0.000000e+00 : f32
    %593 = vector.broadcast %cst_254 : f32 to vector<1x32xf32>
    %594 = arith.maximumf %592, %593 : vector<1x32xf32>
    %595 = vector.broadcast %585 : vector<1x32xf32> to vector<2x32xf32>
    %596 = arith.subf %581, %595 : vector<2x32xf32>
    %cst_255 = arith.constant 9.99999974E-6 : f32
    %597 = vector.broadcast %cst_255 : f32 to vector<1x32xf32>
    %598 = arith.addf %594, %597 : vector<1x32xf32>
    %599 = math.rsqrt %598 : vector<1x32xf32>
    %600 = vector.broadcast %599 : vector<1x32xf32> to vector<2x32xf32>
    %601 = arith.mulf %596, %600 : vector<2x32xf32>
    %c0_256 = arith.constant 0 : index
    %c0_257 = arith.constant 0 : index
    %602 = vector.load %arg17[%c0_256, %c0_257] : memref<32x32xf32, #tpu.memory_space<vmem>>, vector<32x32xf32>
    %cst_258 = arith.constant dense<0.000000e+00> : vector<2x32xf32>
    %603 = tpu.matmul %601, %602, %cst_258 {dimension_numbers = #tpu.dot_dimension_numbers<[1], [0], [0], [1], [0, 0, 1, 1], [], []>} : vector<2x32xf32>, vector<32x32xf32>, vector<2x32xf32> -> vector<2x32xf32>
    %c0_259 = arith.constant 0 : index
    %c0_260 = arith.constant 0 : index
    %604 = vector.load %arg18[%c0_259, %c0_260] : memref<1x32xf32, #tpu.memory_space<vmem>>, vector<1x32xf32>
    %605 = vector.broadcast %604 : vector<1x32xf32> to vector<2x32xf32>
    %606 = arith.addf %603, %605 : vector<2x32xf32>
    %cst_261 = arith.constant 0.000000e+00 : f32
    %607 = vector.broadcast %cst_261 : f32 to vector<2x32xf32>
    %608 = arith.maximumf %606, %607 : vector<2x32xf32>
    %c0_262 = arith.constant 0 : index
    %c0_263 = arith.constant 0 : index
    %609 = vector.load %arg19[%c0_262, %c0_263] : memref<32x8xf32, #tpu.memory_space<vmem>>, vector<32x8xf32>
    %cst_264 = arith.constant dense<0.000000e+00> : vector<2x8xf32>
    %610 = tpu.matmul %608, %609, %cst_264 {dimension_numbers = #tpu.dot_dimension_numbers<[1], [0], [0], [1], [0, 0, 1, 1], [], []>} : vector<2x32xf32>, vector<32x8xf32>, vector<2x8xf32> -> vector<2x8xf32>
    %c0_265 = arith.constant 0 : index
    %c0_266 = arith.constant 0 : index
    %611 = vector.load %arg20[%c0_265, %c0_266] : memref<1x8xf32, #tpu.memory_space<vmem>>, vector<1x8xf32>
    %612 = vector.broadcast %611 : vector<1x8xf32> to vector<2x8xf32>
    %613 = arith.addf %610, %612 : vector<2x8xf32>
    %cst_267 = arith.constant dense<0xFF800000> : vector<2xf32>
    %614 = vector.multi_reduction <maximumf>, %613, %cst_267 [1] : vector<2x8xf32> to vector<2xf32>
    %615 = vector.shape_cast %614 : vector<2xf32> to vector<2x1xf32>
    %616 = vector.broadcast %615 : vector<2x1xf32> to vector<2x8xf32>
    %617 = arith.subf %613, %616 : vector<2x8xf32>
    %618 = math.exp %617 : vector<2x8xf32>
    %cst_268 = arith.constant dense<0.000000e+00> : vector<2xf32>
    %619 = vector.multi_reduction <add>, %618, %cst_268 [1] : vector<2x8xf32> to vector<2xf32>
    %620 = vector.shape_cast %619 : vector<2xf32> to vector<2x1xf32>
    %621 = tpu.reciprocal %620 {approx = true} : vector<2x1xf32> -> vector<2x1xf32>
    %622 = vector.broadcast %621 : vector<2x1xf32> to vector<2x8xf32>
    %623 = arith.mulf %618, %622 : vector<2x8xf32>
    %c0_269 = arith.constant 0 : index
    %c0_270 = arith.constant 0 : index
    %624 = vector.load %arg24[%c0_269, %c0_270] : memref<2x8xf32, #tpu.memory_space<vmem>>, vector<2x8xf32>
    tpu.vector_store %arg24[%c0_269, %c0_270], %623 {strides = array<i32>} : memref<2x8xf32, #tpu.memory_space<vmem>>, vector<2x8xf32>,
    %625 = vector.broadcast %615 : vector<2x1xf32> to vector<2x8xf32>
    %626 = arith.subf %613, %625 : vector<2x8xf32>
    %627 = math.log %620 : vector<2x1xf32>
    %628 = vector.broadcast %627 : vector<2x1xf32> to vector<2x8xf32>
    %629 = arith.subf %626, %628 : vector<2x8xf32>
    %c0_271 = arith.constant 0 : index
    %c0_272 = arith.constant 0 : index
    %630 = vector.load %arg21[%c0_271, %c0_272] : memref<2x3xf32, #tpu.memory_space<vmem>>, vector<2x3xf32>
    %c0_273 = arith.constant 0 : index
    %c0_274 = arith.constant 0 : index
    %631 = vector.load %arg22[%c0_273, %c0_274] : memref<3x8xf32, #tpu.memory_space<vmem>>, vector<3x8xf32>
    %c0_275 = arith.constant 0 : index
    %c0_276 = arith.constant 0 : index
    %632 = vector.load %arg23[%c0_275, %c0_276] : memref<1x8xf32, #tpu.memory_space<vmem>>, vector<1x8xf32>
    %633 = vector.extract_strided_slice %630 {offsets = [0, 0], sizes = [2, 1], strides = [1, 1]} : vector<2x3xf32> to vector<2x1xf32>
    %634 = vector.extract_strided_slice %631 {offsets = [0, 0], sizes = [1, 8], strides = [1, 1]} : vector<3x8xf32> to vector<1x8xf32>
    %635 = vector.broadcast %633 : vector<2x1xf32> to vector<2x8xf32>
    %636 = vector.broadcast %634 : vector<1x8xf32> to vector<2x8xf32>
    %637 = arith.mulf %635, %636 : vector<2x8xf32>
    %638 = vector.extract_strided_slice %630 {offsets = [0, 1], sizes = [2, 1], strides = [1, 1]} : vector<2x3xf32> to vector<2x1xf32>
    %639 = vector.extract_strided_slice %631 {offsets = [1, 0], sizes = [1, 8], strides = [1, 1]} : vector<3x8xf32> to vector<1x8xf32>
    %640 = vector.broadcast %638 : vector<2x1xf32> to vector<2x8xf32>
    %641 = vector.broadcast %639 : vector<1x8xf32> to vector<2x8xf32>
    %642 = arith.mulf %640, %641 : vector<2x8xf32>
    %643 = arith.addf %637, %642 : vector<2x8xf32>
    %644 = vector.extract_strided_slice %630 {offsets = [0, 2], sizes = [2, 1], strides = [1, 1]} : vector<2x3xf32> to vector<2x1xf32>
    %645 = vector.extract_strided_slice %631 {offsets = [2, 0], sizes = [1, 8], strides = [1, 1]} : vector<3x8xf32> to vector<1x8xf32>
    %646 = vector.broadcast %644 : vector<2x1xf32> to vector<2x8xf32>
    %647 = vector.broadcast %645 : vector<1x8xf32> to vector<2x8xf32>
    %648 = arith.mulf %646, %647 : vector<2x8xf32>
    %649 = arith.addf %643, %648 : vector<2x8xf32>
    %650 = math.log %632 : vector<1x8xf32>
    %cst_277 = arith.constant 1.83787704 : f32
    %651 = vector.broadcast %cst_277 : f32 to vector<1x8xf32>
    %652 = arith.subf %650, %651 : vector<1x8xf32>
    %653 = arith.subf %652, %632 : vector<1x8xf32>
    %cst_278 = arith.constant -2.000000e+00 : f32
    %654 = vector.broadcast %cst_278 : f32 to vector<1x8xf32>
    %655 = arith.mulf %654, %632 : vector<1x8xf32>
    %656 = math.exp %655 : vector<1x8xf32>
    %cst_279 = arith.constant 1.000000e+00 : f32
    %657 = vector.broadcast %cst_279 : f32 to vector<1x8xf32>
    %658 = arith.subf %657, %656 : vector<1x8xf32>
    %659 = math.log %658 : vector<1x8xf32>
    %660 = arith.subf %653, %659 : vector<1x8xf32>
    %661 = vector.broadcast %660 : vector<1x8xf32> to vector<2x8xf32>
    %662 = arith.addf %629, %661 : vector<2x8xf32>
    %663 = vector.broadcast %632 : vector<1x8xf32> to vector<2x8xf32>
    %664 = arith.mulf %663, %649 : vector<2x8xf32>
    %665 = arith.addf %662, %664 : vector<2x8xf32>
    %cst_280 = arith.constant dense<0xFF800000> : vector<2xf32>
    %666 = vector.multi_reduction <maximumf>, %665, %cst_280 [1] : vector<2x8xf32> to vector<2xf32>
    %667 = vector.shape_cast %666 : vector<2xf32> to vector<2x1xf32>
    %668 = vector.broadcast %667 : vector<2x1xf32> to vector<2x8xf32>
    %669 = arith.subf %665, %668 : vector<2x8xf32>
    %670 = math.exp %669 : vector<2x8xf32>
    %cst_281 = arith.constant dense<0.000000e+00> : vector<2xf32>
    %671 = vector.multi_reduction <add>, %670, %cst_281 [1] : vector<2x8xf32> to vector<2xf32>
    %672 = vector.shape_cast %671 : vector<2xf32> to vector<2x1xf32>
    %673 = math.log %672 : vector<2x1xf32>
    %674 = arith.addf %667, %673 : vector<2x1xf32>
    %cst_282 = arith.constant dense<0.000000e+00> : vector<1xf32>
    %675 = vector.multi_reduction <add>, %674, %cst_282 [0] : vector<2x1xf32> to vector<1xf32>
    %676 = vector.shape_cast %675 : vector<1xf32> to vector<1x1xf32>
    %cst_283 = arith.constant 0.000000e+00 : f32
    %677 = vector.broadcast %cst_283 : f32 to vector<1x1xf32>
    %678 = arith.subf %677, %676 : vector<1x1xf32>
    %c0_284 = arith.constant 0 : index
    %c0_285 = arith.constant 0 : index
    %679 = vector.load %arg25[%c0_284, %c0_285] : memref<1x1xf32, #tpu.memory_space<vmem>>, vector<1x1xf32>
    tpu.vector_store %arg25[%c0_284, %c0_285], %678 {strides = array<i32>} : memref<1x1xf32, #tpu.memory_space<vmem>>, vector<1x1xf32>,
    return
  }
}

</mosaic_0001>

<bundles_post_ra>
// kernel: forward_device.1
= control target key start
LH: loop header
LB: loop body
LE: loop exit
PB: predicated region body
PF: predicated region fallthrough
CT: control target
= control target key end

     0   :  { %s7947_s0 = inlined_call_operand.vmem [shape: s32[54,1], index: 0, kind: input, shape index: {}]   ;;  %s7948_s1 = inlined_call_operand.vmem [shape: f32[50,32], index: 1, kind: input, shape index: {}]   ;;  %s7949_s2 = inlined_call_operand.hbm [shape: s32[54,1], index: 2, kind: input, shape index: {}]   ;;  %s7950_s3 = inlined_call_operand.vmem [shape: s32[18,1], index: 3, kind: input, shape index: {}]   ;;  %s7951_s4 = inlined_call_operand.vmem [shape: s32[6,1], index: 4, kind: input, shape index: {}]   ;;  %s7952_s5 = inlined_call_operand.vmem [shape: f32[7,32,32], index: 5, kind: input, shape index: {}]   ;;  %s7953_s6 = inlined_call_operand.hbm [shape: f32[1,32], index: 6, kind: input, shape index: {}]   ;;  %s7954_s7 = inlined_call_operand.hbm [shape: f32[7,32,32], index: 7, kind: input, shape index: {}]   ;;  %s7955_s8 = inlined_call_operand.hbm [shape: f32[1,32], index: 8, kind: input, shape index: {}]   ;;  %s7956_s9 = inlined_call_operand.hbm [shape: f32[3,32,32], index: 9, kind: input, shape index: {}]   ;;  %s7957_s10 = inlined_call_operand.hbm [shape: f32[1,32], index: 10, kind: input, shape index: {}]   ;;  %s7958_s11 = inlined_call_operand.hbm [shape: f32[3,32,32], index: 11, kind: input, shape index: {}]   ;;  %s7959_s12 = inlined_call_operand.hbm [shape: f32[1,32], index: 12, kind: input, shape index: {}]   ;;  %s7960_s13 = inlined_call_operand.hbm [shape: f32[3,32,32], index: 13, kind: input, shape index: {}]   ;;  %s7961_s14 = inlined_call_operand.hbm [shape: f32[1,32], index: 14, kind: input, shape index: {}]   ;;  %s7962_s15 = inlined_call_operand.vmem [shape: f32[3,32,32], index: 15, kind: input, shape index: {}]   ;;  %s7963_s16 = inlined_call_operand.hbm [shape: f32[1,32], index: 16, kind: input, shape index: {}]   ;;  %s7964_s17 = inlined_call_operand.hbm [shape: f32[32,32], index: 17, kind: input, shape index: {}]   ;;  %s7965_s18 = inlined_call_operand.hbm [shape: f32[1,32], index: 18, kind: input, shape index: {}]   ;;  %s7966_s19 = inlined_call_operand.vmem [shape: f32[32,8], index: 19, kind: input, shape index: {}]   ;;  %s7967_s20 = inlined_call_operand.hbm [shape: f32[1,8], index: 20, kind: input, shape index: {}]   ;;  %s7968_s21 = inlined_call_operand.vmem [shape: f32[2,3], index: 21, kind: input, shape index: {}]   ;;  %s7969_s22 = inlined_call_operand.vmem [shape: f32[3,8], index: 22, kind: input, shape index: {}]   ;;  %s7970_s23 = inlined_call_operand.hbm [shape: f32[1,8], index: 23, kind: input, shape index: {}]   ;;  %s7971_s24 = inlined_call_operand.hbm [shape: f32[2,8], index: 24, kind: output, shape index: {0}]   ;;  %s7972_s25 = inlined_call_operand.hbm [shape: f32[1,1], index: 25, kind: output, shape index: {1}]  }
   0x1   :  { %7982 = sst [smem:[#allocation39_spill]] %s7947_s0 }
   0x2   :  { %7983 = sst [smem:[#allocation40_spill]] %s7948_s1 }
   0x3   :  { %7984 = sst [smem:[#allocation41_spill]] %s7949_s2 }
   0x4   :  { %7985 = sst [smem:[#allocation42_spill]] %s7950_s3 }
   0x5   :  { %7986 = sst [smem:[#allocation43_spill]] %s7951_s4 }
   0x6   :  { %7987 = sst [smem:[#allocation44_spill]] %s7952_s5 }
   0x7   :  { %7988 = sst [smem:[#allocation45_spill]] %s7953_s6 }
   0x8   :  { %7989 = sst [smem:[#allocation46_spill]] %s7954_s7 }
   0x9   :  { %7990 = sst [smem:[#allocation47_spill]] %s7955_s8 }
   0xa   :  { %7991 = sst [smem:[#allocation48_spill]] %s7956_s9 }
   0xb   :  { %31 = vsyncpa [#allocation3], 0 }
   0xc   :  { %32 = vsyncpa [#allocation6], 0 }
   0xd   :  { %33 = vsyncpa [#allocation9], 0 }
   0xe   :  { %34 = vsyncpa [#allocation12], 0 }
   0xf   :  { %35 = vsyncpa [#allocation15], 0 }
  0x10   :  { %36 = vsyncpa [#allocation18], 0 }
  0x11   :  { %37 = vsyncpa [#allocation21], 0 }
  0x12   :  { %38 = vsyncpa [#allocation24], 0 }
  0x13   :  { %39 = vsyncpa [#allocation4], 0 }
  0x14   :  { %40 = vsyncpa [#allocation28], 0  ;;  %s6460_s29 = smov [#allocation5]   ;;  %s6461_s6 = smov [#allocation8]  }
  0x15   :  { %s69_s2 = sshll.u32 %s6460_s29, 4  ;;  %s91_s30 = sshll.u32 %s6461_s6, 4  ;;  %s70_s2 = int_to_ptr.vmem [resolvable:$true] %s69_s2  ;;  %s92_s30 = int_to_ptr.vmem [resolvable:$true] %s91_s30 }
  0x16   :  { %s7992_s26 = sld [smem:[#allocation45_spill]] }
  0x1c   :  { %s6066_s1 = scalar_lea.hbm %s7992_s26, 16 }
  0x1d   :  { %p6067_p0 = scmp.ne.s32.totalorder %s7992_s26, %s6066_s1  ;;  %p6070_p1 = scmp.lt.u32.totalorder %s6066_s1, %s7992_s26 }
  0x1f   :  { %p6072_p2 = pnand %p6070_p1, %p6067_p0 }
  0x21   :  { %6075 = shalt.err (!%p6072_p2)
}
  0x22   :  { %s6076_s9 = scalar_lea.vmem %s70_s2, 16  ;;  %s6080_s5 = scalar_lea.vmem %s70_s2, 32 }
  0x23   :  { %p6077_p3 = scmp.ne.s32.totalorder %s70_s2, %s6076_s9  ;;  %p6081_p4 = scmp.lt.s32.totalorder %s70_s2, %s70_s2 }
  0x24   :  { %p6082_p5 = scmp.lt.s32.totalorder %s6080_s5, %s6076_s9 }
  0x26   :  { %p6083_p6 = por %p6082_p5, %p6081_p4 }
  0x28   :  { %p6084_p7 = pnand %p6083_p6, %p6077_p3 }
  0x2a   :  { %6087 = shalt.err (!%p6084_p7)
}
  0x2b   :  { %72 = dma.hbm_to_vmem [thread:$0]  %s7992_s26, 16, %s70_s2, [#allocation6]  }
  0x2c   :  { %s7993_s3 = sld [smem:[#allocation47_spill]] }
  0x32   :  { %s6088_s8 = scalar_lea.hbm %s7993_s3, 16 }
  0x33   :  { %p6089_p8 = scmp.ne.s32.totalorder %s7993_s3, %s6088_s8  ;;  %p6092_p9 = scmp.lt.u32.totalorder %s6088_s8, %s7993_s3 }
  0x35   :  { %p6094_p10 = pnand %p6092_p9, %p6089_p8 }
  0x37   :  { %6097 = shalt.err (!%p6094_p10)
}
  0x38   :  { %s6098_s9 = scalar_lea.vmem %s92_s30, 16  ;;  %s6102_s5 = scalar_lea.vmem %s92_s30, 32 }
  0x39   :  { %p6099_p11 = scmp.ne.s32.totalorder %s92_s30, %s6098_s9  ;;  %p6103_p12 = scmp.lt.s32.totalorder %s92_s30, %s92_s30 }
  0x3a   :  { %p6104_p13 = scmp.lt.s32.totalorder %s6102_s5, %s6098_s9 }
  0x3c   :  { %p6105_p0 = por %p6104_p13, %p6103_p12 }
  0x3e   :  { %p6106_p1 = pnand %p6105_p0, %p6099_p11 }
  0x40   :  { %6109 = shalt.err (!%p6106_p1)
}
  0x41   :  { %94 = dma.hbm_to_vmem [thread:$0]  %s7993_s3, 16, %s92_s30, [#allocation9]  }
  0x42   :  { %s6462_s0 = smov [#allocation11]   ;;  %s6463_s6 = smov [#allocation14]  }
  0x43   :  { %s113_s29 = sshll.u32 %s6462_s0, 4  ;;  %s135_s7 = sshll.u32 %s6463_s6, 4  ;;  %s114_s29 = int_to_ptr.vmem [resolvable:$true] %s113_s29  ;;  %s136_s7 = int_to_ptr.vmem [resolvable:$true] %s135_s7 }
  0x44   :  { %s6110_s1 = scalar_lea.hbm %s7957_s10, 16 }
  0x45   :  { %p6111_p2 = scmp.ne.s32.totalorder %s7957_s10, %s6110_s1  ;;  %p6114_p3 = scmp.lt.u32.totalorder %s6110_s1, %s7957_s10 }
  0x47   :  { %p6116_p4 = pnand %p6114_p3, %p6111_p2 }
  0x49   :  { %6119 = shalt.err (!%p6116_p4)
}
  0x4a   :  { %s6120_s30 = scalar_lea.vmem %s114_s29, 16  ;;  %s6124_s3 = scalar_lea.vmem %s114_s29, 32 }
  0x4b   :  { %p6121_p5 = scmp.ne.s32.totalorder %s114_s29, %s6120_s30  ;;  %p6125_p6 = scmp.lt.s32.totalorder %s114_s29, %s114_s29 }
  0x4c   :  { %p6126_p7 = scmp.lt.s32.totalorder %s6124_s3, %s6120_s30 }
  0x4e   :  { %p6127_p8 = por %p6126_p7, %p6125_p6 }
  0x50   :  { %p6128_p9 = pnand %p6127_p8, %p6121_p5 }
  0x52   :  { %6131 = shalt.err (!%p6128_p9)
}
  0x53   :  { %116 = dma.hbm_to_vmem [thread:$0]  %s7957_s10, 16, %s114_s29, [#allocation12]  }
  0x54   :  { %s6132_s8 = scalar_lea.hbm %s7959_s12, 16 }
  0x55   :  { %p6133_p10 = scmp.ne.s32.totalorder %s7959_s12, %s6132_s8  ;;  %p6136_p11 = scmp.lt.u32.totalorder %s6132_s8, %s7959_s12 }
  0x57   :  { %p6138_p12 = pnand %p6136_p11, %p6133_p10 }
  0x59   :  { %6141 = shalt.err (!%p6138_p12)
}
  0x5a   :  { %s6142_s9 = scalar_lea.vmem %s136_s7, 16  ;;  %s6146_s5 = scalar_lea.vmem %s136_s7, 32 }
  0x5b   :  { %p6143_p13 = scmp.ne.s32.totalorder %s136_s7, %s6142_s9  ;;  %p6147_p0 = scmp.lt.s32.totalorder %s136_s7, %s136_s7 }
  0x5c   :  { %p6148_p1 = scmp.lt.s32.totalorder %s6146_s5, %s6142_s9 }
  0x5e   :  { %p6149_p2 = por %p6148_p1, %p6147_p0 }
  0x60   :  { %p6150_p3 = pnand %p6149_p2, %p6143_p13 }
  0x62   :  { %6153 = shalt.err (!%p6150_p3)
}
  0x63   :  { %138 = dma.hbm_to_vmem [thread:$0]  %s7959_s12, 16, %s136_s7, [#allocation15]  }
  0x64   :  { %s6464_s30 = smov [#allocation17]   ;;  %s6154_s0 = scalar_lea.hbm %s7961_s14, 16 }
  0x65   :  { %s157_s3 = sshll.u32 %s6464_s30, 4  ;;  %p6155_p4 = scmp.ne.s32.totalorder %s7961_s14, %s6154_s0  ;;  %s158_s3 = int_to_ptr.vmem [resolvable:$true] %s157_s3 }
  0x66   :  { %p6158_p5 = scmp.lt.u32.totalorder %s6154_s0, %s7961_s14 }
  0x68   :  { %p6160_p6 = pnand %p6158_p5, %p6155_p4 }
  0x6a   :  { %6163 = shalt.err (!%p6160_p6)
}
  0x6b   :  { %s6164_s4 = scalar_lea.vmem %s158_s3, 16  ;;  %s6168_s12 = scalar_lea.vmem %s158_s3, 32 }
  0x6c   :  { %p6165_p7 = scmp.ne.s32.totalorder %s158_s3, %s6164_s4  ;;  %p6169_p8 = scmp.lt.s32.totalorder %s158_s3, %s158_s3 }
  0x6d   :  { %p6170_p9 = scmp.lt.s32.totalorder %s6168_s12, %s6164_s4 }
  0x6f   :  { %p6171_p10 = por %p6170_p9, %p6169_p8 }
  0x71   :  { %p6172_p11 = pnand %p6171_p10, %p6165_p7 }
  0x73   :  { %6175 = shalt.err (!%p6172_p11)
}
  0x74   :  { %160 = dma.hbm_to_vmem [thread:$0]  %s7961_s14, 16, %s158_s3, [#allocation18]  }
  0x75   :  { %s6465_s9 = smov [#allocation20]   ;;  %s6466_s10 = smov [#allocation23]  }
  0x76   :  { %s178_s5 = sshll.u32 %s6465_s9, 4  ;;  %s203_s29 = sshll.u32 %s6466_s10, 4  ;;  %s179_s5 = int_to_ptr.vmem [resolvable:$true] %s178_s5  ;;  %s204_s29 = int_to_ptr.vmem [resolvable:$true] %s203_s29 }
  0x77   :  { %s6176_s26 = scalar_lea.hbm %s7964_s17, 512 }
  0x78   :  { %p6177_p12 = scmp.ne.s32.totalorder %s7964_s17, %s6176_s26  ;;  %p6180_p13 = scmp.lt.u32.totalorder %s6176_s26, %s7964_s17 }
  0x7a   :  { %p6182_p0 = pnand %p6180_p13, %p6177_p12 }
  0x7c   :  { %6185 = shalt.err (!%p6182_p0)
}
  0x7d   :  { %s6186_s14 = scalar_lea.vmem %s179_s5, 512  ;;  %p6191_p2 = scmp.lt.s32.totalorder %s179_s5, %s179_s5 }
  0x7e   :  { %p6187_p1 = scmp.ne.s32.totalorder %s179_s5, %s6186_s14  ;;  %p6192_p3 = scmp.lt.s32.totalorder %s6186_s14, %s6186_s14 }
  0x80   :  { %p6193_p4 = por %p6192_p3, %p6191_p2 }
  0x82   :  { %p6194_p5 = pnand %p6193_p4, %p6187_p1 }
  0x84   :  { %6197 = shalt.err (!%p6194_p5)
}
  0x85   :  { %s6467_s3 = smov 128   ;;  %s6468_s1 = smov 8  }
  0x86   :  { %184 = dma.hbm_to_vmem [thread:$0]  %s7964_s17, 512, %s179_s5, [#allocation21], %s6467_s3, %s6467_s3, %s6468_s1  }
  0x87   :  { %s6198_s9 = scalar_lea.hbm %s7967_s20, 16 }
  0x88   :  { %p6199_p6 = scmp.ne.s32.totalorder %s7967_s20, %s6198_s9  ;;  %p6202_p7 = scmp.lt.u32.totalorder %s6198_s9, %s7967_s20 }
  0x8a   :  { %p6204_p8 = pnand %p6202_p7, %p6199_p6 }
  0x8c   :  { %6207 = shalt.err (!%p6204_p8)
}
  0x8d   :  { %s6208_s0 = scalar_lea.vmem %s204_s29, 16  ;;  %s6212_s6 = scalar_lea.vmem %s204_s29, 32 }
  0x8e   :  { %p6209_p9 = scmp.ne.s32.totalorder %s204_s29, %s6208_s0  ;;  %p6213_p10 = scmp.lt.s32.totalorder %s204_s29, %s204_s29 }
  0x8f   :  { %p6214_p11 = scmp.lt.s32.totalorder %s6212_s6, %s6208_s0 }
  0x91   :  { %p6215_p12 = por %p6214_p11, %p6213_p10 }
  0x93   :  { %p6216_p13 = pnand %p6215_p12, %p6209_p9 }
  0x95   :  { %6219 = shalt.err (!%p6216_p13)
}
  0x96   :  { %206 = dma.hbm_to_vmem [thread:$0]  %s7967_s20, 16, %s204_s29, [#allocation24]  }
  0x97   :  { %s6469_s8 = smov [#allocation2]   ;;  %s6470_s14 = smov [#allocation7]  }
  0x98   :  { %s50_s27 = sshll.u32 %s6469_s8, 4  ;;  %s78_s4 = sshll.u32 %s6470_s14, 4  ;;  %s51_s27 = int_to_ptr.vmem [resolvable:$true] %s50_s27  ;;  %s79_s4 = int_to_ptr.vmem [resolvable:$true] %s78_s4 }
  0x99   :  { %s7994_s28 = sld [smem:[#allocation41_spill]] }
  0x9f   :  { %s6220_s9 = scalar_lea.hbm %s7994_s28, 896 }
  0xa0   :  { %p6221_p0 = scmp.ne.s32.totalorder %s7994_s28, %s6220_s9  ;;  %p6224_p1 = scmp.lt.u32.totalorder %s6220_s9, %s7994_s28 }
  0xa2   :  { %p6226_p2 = pnand %p6224_p1, %p6221_p0 }
  0xa4   :  { %6229 = shalt.err (!%p6226_p2)
}
  0xa5   :  { %s6230_s20 = scalar_lea.vmem %s51_s27, 896  ;;  %p6235_p4 = scmp.lt.s32.totalorder %s51_s27, %s51_s27 }
  0xa6   :  { %p6231_p3 = scmp.ne.s32.totalorder %s51_s27, %s6230_s20  ;;  %p6236_p5 = scmp.lt.s32.totalorder %s6230_s20, %s6230_s20 }
  0xa8   :  { %p6237_p6 = por %p6236_p5, %p6235_p4 }
  0xaa   :  { %p6238_p7 = pnand %p6237_p6, %p6231_p3 }
  0xac   :  { %6241 = shalt.err (!%p6238_p7)
}
  0xad   :  { %56 = dma.hbm_to_vmem [thread:$0]  %s7994_s28, 896, %s51_s27, [#allocation3], %s6467_s3, %s6467_s3, %s6468_s1  }
  0xae   :  { %s7995_s5 = sld [smem:[#allocation46_spill]] }
  0xb4   :  { %s6242_s8 = scalar_lea.hbm %s7995_s5, 3584 }
  0xb5   :  { %p6243_p8 = scmp.ne.s32.totalorder %s7995_s5, %s6242_s8  ;;  %p6246_p9 = scmp.lt.u32.totalorder %s6242_s8, %s7995_s5 }
  0xb7   :  { %p6248_p10 = pnand %p6246_p9, %p6243_p8 }
  0xb9   :  { %6251 = shalt.err (!%p6248_p10)
}
  0xba   :  { %s6252_s10 = scalar_lea.vmem %s79_s4, 3584  ;;  %p6257_p12 = scmp.lt.s32.totalorder %s79_s4, %s79_s4 }
  0xbb   :  { %p6253_p11 = scmp.ne.s32.totalorder %s79_s4, %s6252_s10  ;;  %p6258_p13 = scmp.lt.s32.totalorder %s6252_s10, %s6252_s10 }
  0xbd   :  { %p6259_p0 = por %p6258_p13, %p6257_p12 }
  0xbf   :  { %p6260_p1 = pnand %p6259_p0, %p6253_p11 }
  0xc1   :  { %6263 = shalt.err (!%p6260_p1)
}
  0xc2   :  { %84 = dma.hbm_to_vmem [thread:$0]  %s7995_s5, 3584, %s79_s4, [#allocation6], %s6467_s3, %s6467_s3, %s6468_s1  }
  0xc3   :  { %s6471_s30 = smov [#allocation10]   ;;  %s6472_s26 = smov [#allocation13]  }
  0xc4   :  { %s100_s2 = sshll.u32 %s6471_s30, 4  ;;  %s122_s20 = sshll.u32 %s6472_s26, 4  ;;  %s101_s2 = int_to_ptr.vmem [resolvable:$true] %s100_s2  ;;  %s123_s20 = int_to_ptr.vmem [resolvable:$true] %s122_s20 }
  0xc5   :  { %s7996_s6 = sld [smem:[#allocation48_spill]] }
  0xcb   :  { %s6264_s17 = scalar_lea.hbm %s7996_s6, 1536 }
  0xcc   :  { %p6265_p2 = scmp.ne.s32.totalorder %s7996_s6, %s6264_s17  ;;  %p6268_p3 = scmp.lt.u32.totalorder %s6264_s17, %s7996_s6 }
  0xce   :  { %p6270_p4 = pnand %p6268_p3, %p6265_p2 }
  0xd0   :  { %6273 = shalt.err (!%p6270_p4)
}
  0xd1   :  { %s6274_s4 = scalar_lea.vmem %s101_s2, 1536  ;;  %p6279_p6 = scmp.lt.s32.totalorder %s101_s2, %s101_s2 }
  0xd2   :  { %p6275_p5 = scmp.ne.s32.totalorder %s101_s2, %s6274_s4  ;;  %p6280_p7 = scmp.lt.s32.totalorder %s6274_s4, %s6274_s4 }
  0xd4   :  { %p6281_p8 = por %p6280_p7, %p6279_p6 }
  0xd6   :  { %p6282_p9 = pnand %p6281_p8, %p6275_p5 }
  0xd8   :  { %6285 = shalt.err (!%p6282_p9)
}
  0xd9   :  { %106 = dma.hbm_to_vmem [thread:$0]  %s7996_s6, 1536, %s101_s2, [#allocation9], %s6467_s3, %s6467_s3, %s6468_s1  }
  0xda   :  { %s6286_s28 = scalar_lea.hbm %s7958_s11, 1536 }
  0xdb   :  { %p6287_p10 = scmp.ne.s32.totalorder %s7958_s11, %s6286_s28  ;;  %p6290_p11 = scmp.lt.u32.totalorder %s6286_s28, %s7958_s11 }
  0xdd   :  { %p6292_p12 = pnand %p6290_p11, %p6287_p10 }
  0xdf   :  { %6295 = shalt.err (!%p6292_p12)
}
  0xe0   :  { %s6296_s17 = scalar_lea.vmem %s123_s20, 1536  ;;  %p6301_p0 = scmp.lt.s32.totalorder %s123_s20, %s123_s20 }
  0xe1   :  { %p6297_p13 = scmp.ne.s32.totalorder %s123_s20, %s6296_s17  ;;  %p6302_p1 = scmp.lt.s32.totalorder %s6296_s17, %s6296_s17 }
  0xe3   :  { %p6303_p2 = por %p6302_p1, %p6301_p0 }
  0xe5   :  { %p6304_p3 = pnand %p6303_p2, %p6297_p13 }
  0xe7   :  { %6307 = shalt.err (!%p6304_p3)
}
  0xe8   :  { %128 = dma.hbm_to_vmem [thread:$0]  %s7958_s11, 1536, %s123_s20, [#allocation12], %s6467_s3, %s6467_s3, %s6468_s1  }
  0xe9   :  { %s6473_s8 = smov [#allocation16]   ;;  %s6474_s12 = smov [#allocation19]  }
  0xea   :  { %s144_s14 = sshll.u32 %s6473_s8, 4  ;;  %s169_s7 = sshll.u32 %s6474_s12, 4  ;;  %s145_s14 = int_to_ptr.vmem [resolvable:$true] %s144_s14  ;;  %s170_s7 = int_to_ptr.vmem [resolvable:$true] %s169_s7 }
  0xeb   :  { %s6308_s9 = scalar_lea.hbm %s7960_s13, 1536 }
  0xec   :  { %p6309_p4 = scmp.ne.s32.totalorder %s7960_s13, %s6308_s9  ;;  %p6312_p5 = scmp.lt.u32.totalorder %s6308_s9, %s7960_s13 }
  0xee   :  { %p6314_p6 = pnand %p6312_p5, %p6309_p4 }
  0xf0   :  { %6317 = shalt.err (!%p6314_p6)
}
  0xf1   :  { %s6318_s11 = scalar_lea.vmem %s145_s14, 1536  ;;  %p6323_p8 = scmp.lt.s32.totalorder %s145_s14, %s145_s14 }
  0xf2   :  { %p6319_p7 = scmp.ne.s32.totalorder %s145_s14, %s6318_s11  ;;  %p6324_p9 = scmp.lt.s32.totalorder %s6318_s11, %s6318_s11 }
  0xf4   :  { %p6325_p10 = por %p6324_p9, %p6323_p8 }
  0xf6   :  { %p6326_p11 = pnand %p6325_p10, %p6319_p7 }
  0xf8   :  { %6329 = shalt.err (!%p6326_p11)
}
  0xf9   :  { %150 = dma.hbm_to_vmem [thread:$0]  %s7960_s13, 1536, %s145_s14, [#allocation15], %s6467_s3, %s6467_s3, %s6468_s1  }
  0xfa   :  { %s6330_s17 = scalar_lea.hbm %s7963_s16, 16 }
  0xfb   :  { %p6331_p12 = scmp.ne.s32.totalorder %s7963_s16, %s6330_s17  ;;  %p6334_p13 = scmp.lt.u32.totalorder %s6330_s17, %s7963_s16 }
  0xfd   :  { %p6336_p0 = pnand %p6334_p13, %p6331_p12 }
  0xff   :  { %6339 = shalt.err (!%p6336_p0)
}
 0x100   :  { %s6340_s4 = scalar_lea.vmem %s170_s7, 16  ;;  %s6344_s5 = scalar_lea.vmem %s170_s7, 32 }
 0x101   :  { %p6341_p1 = scmp.ne.s32.totalorder %s170_s7, %s6340_s4  ;;  %p6345_p2 = scmp.lt.s32.totalorder %s170_s7, %s170_s7 }
 0x102   :  { %p6346_p3 = scmp.lt.s32.totalorder %s6344_s5, %s6340_s4 }
 0x104   :  { %p6347_p4 = por %p6346_p3, %p6345_p2 }
 0x106   :  { %p6348_p5 = pnand %p6347_p4, %p6341_p1 }
 0x108   :  { %6351 = shalt.err (!%p6348_p5)
}
 0x109   :  { %172 = dma.hbm_to_vmem [thread:$0]  %s7963_s16, 16, %s170_s7, [#allocation18]  }
 0x10a   :  { %s6475_s1 = smov [#allocation22]   ;;  %s6476_s9 = smov [#allocation25]  }
 0x10b   :  { %s191_s14 = sshll.u32 %s6475_s1, 4  ;;  %s217_s10 = sshll.u32 %s6476_s9, 4  ;;  %s192_s14 = int_to_ptr.vmem [resolvable:$true] %s191_s14  ;;  %s218_s10 = int_to_ptr.vmem [resolvable:$true] %s217_s10 }
 0x10c   :  { %s6352_s30 = scalar_lea.hbm %s7965_s18, 16 }
 0x10d   :  { %p6353_p6 = scmp.ne.s32.totalorder %s7965_s18, %s6352_s30  ;;  %p6356_p7 = scmp.lt.u32.totalorder %s6352_s30, %s7965_s18 }
 0x10f   :  { %p6358_p8 = pnand %p6356_p7, %p6353_p6 }
 0x111   :  { %6361 = shalt.err (!%p6358_p8)
}
 0x112   :  { %s6362_s16 = scalar_lea.vmem %s192_s14, 16  ;;  %s6366_s7 = scalar_lea.vmem %s192_s14, 32 }
 0x113   :  { %p6363_p9 = scmp.ne.s32.totalorder %s192_s14, %s6362_s16  ;;  %p6367_p10 = scmp.lt.s32.totalorder %s192_s14, %s192_s14 }
 0x114   :  { %p6368_p11 = scmp.lt.s32.totalorder %s6366_s7, %s6362_s16 }
 0x116   :  { %p6369_p12 = por %p6368_p11, %p6367_p10 }
 0x118   :  { %p6370_p13 = pnand %p6369_p12, %p6363_p9 }
 0x11a   :  { %6373 = shalt.err (!%p6370_p13)
}
 0x11b   :  { %194 = dma.hbm_to_vmem [thread:$0]  %s7965_s18, 16, %s192_s14, [#allocation21]  }
 0x11c   :  { %s6374_s8 = scalar_lea.hbm %s7970_s23, 16 }
 0x11d   :  { %p6375_p0 = scmp.ne.s32.totalorder %s7970_s23, %s6374_s8  ;;  %p6378_p1 = scmp.lt.u32.totalorder %s6374_s8, %s7970_s23 }
 0x11f   :  { %p6380_p2 = pnand %p6378_p1, %p6375_p0 }
 0x121   :  { %6383 = shalt.err (!%p6380_p2)
}
 0x122   :  { %s6384_s3 = scalar_lea.vmem %s218_s10, 16  ;;  %s6388_s1 = scalar_lea.vmem %s218_s10, 32 }
 0x123   :  { %p6385_p3 = scmp.ne.s32.totalorder %s218_s10, %s6384_s3  ;;  %p6389_p4 = scmp.lt.s32.totalorder %s218_s10, %s218_s10 }
 0x124   :  { %p6390_p5 = scmp.lt.s32.totalorder %s6388_s1, %s6384_s3 }
 0x126   :  { %p6391_p6 = por %p6390_p5, %p6389_p4 }
 0x128   :  { %p6392_p7 = pnand %p6391_p6, %p6385_p3 }
 0x12a   :  { %6395 = shalt.err (!%p6392_p7)
}
 0x12b   :  { %220 = dma.hbm_to_vmem [thread:$0]  %s7970_s23, 16, %s218_s10, [#allocation24]  }
 0x12c   :  { %6440 = dma.done.wait [#allocation3], 896  }
 0x12d   :  { %6441 = vsyncadd [#allocation3], 4294966400 }
 0x12e   :  { %6442 = dma.done.wait [#allocation6], 3600  }
 0x12f   :  { %6443 = vsyncadd [#allocation6], 4294963696 }
 0x130   :  { %6444 = dma.done.wait [#allocation9], 1552  }
 0x131   :  { %6445 = vsyncadd [#allocation9], 4294965744 }
 0x132   :  { %6446 = dma.done.wait [#allocation12], 1552  }
 0x133   :  { %6447 = vsyncadd [#allocation12], 4294965744 }
 0x134   :  { %6448 = dma.done.wait [#allocation15], 1552  }
 0x135   :  { %6449 = vsyncadd [#allocation15], 4294965744 }
 0x136   :  { %6450 = dma.done.wait [#allocation18], 32  }
 0x137   :  { %6451 = vsyncadd [#allocation18], 4294967264 }
 0x138   :  { %6452 = dma.done.wait [#allocation21], 528  }
 0x139   :  { %6453 = vsyncadd [#allocation21], 4294966768 }
 0x13a   :  { %6454 = dma.done.wait [#allocation24], 32  }
 0x13b   :  { %6455 = vsyncadd [#allocation24], 4294967264  ;;  %v6477_v0 = vmov 0   ;;  %v6478_v1 = vmov 0.0|0.0   ;;  %s7997_s10 = sld [smem:[#allocation39_spill]]  ;;  %v6827_v6 = vld [vmem:[#allocation2] sm:$0xff] }
 0x13c   :  { %6034 = vset.pattern.permute.xlu1 %v6477_v0  ;;  %6033 = vset.pattern.permute.xlu0 %v6477_v0  ;;  %v6829_v7 = vld [vmem:[#allocation2 + $0x10] sm:$0xff]  ;;  %vm6479_vm0 = vmmov 0   ;;  %v6480_v8 = vmov 0.0   ;;  %v595_v9 = vadd.s32 4294967294, %v6827_v6  ;;  %v6837_v11 = vld [vmem:[#allocation2 + $0x8] sm:$0xff]  ;;  %v6840_v13 = vld [vmem:[#allocation2 + $0x20] sm:$0xff] }
 0x13d   :  { %5819 = vmatprep.subr.bf16.mxu0 %v6478_v1  ;;  %5828 = vmatprep.subr.bf16.mxu1 %v6478_v1  ;;  %v597_v10 = vadd.s32 4294967294, %v6829_v7  ;;  %v596_v12 = vadd.s32 4294967294, %v6837_v11  ;;  %v6842_v14 = vld [vmem:[#allocation2 + $0x18] sm:$0xff]  ;;  %v599_v17 = vadd.s32 4294967294, %v6840_v13  ;;  %v6852_v19 = vld [vmem:[#allocation2 + $0x30] sm:$0x3f] }
 0x13e   :  { %5285 = vmatprep.mubr.msk.f32.mxu0 %vm6479_vm0, %v6480_v8  ;;  %5314 = vmatprep.mubr.msk.f32.mxu1 %vm6479_vm0, %v6480_v8  ;;  %vm602_vm1 = vcmp.ge.s32.totalorder %v595_v9, 0  ;;  %vm609_vm2 = vcmp.lt.s32.totalorder %v595_v9, 27  ;;  %v598_v18 = vadd.s32 4294967294, %v6842_v14  ;;  %v6854_v20 = vld [vmem:[#allocation2 + $0x28] sm:$0xff]  ;;  %v601_v23 = vadd.s32 4294967294, %v6852_v19  ;;  %s7998_s12 = sld [smem:[#allocation40_spill]] }
 0x13f   :  { %vm616_vm3 = vmand %vm602_vm1, %vm609_vm2  ;;  %vm604_vm4 = vcmp.ge.s32.totalorder %v597_v10, 0  ;;  %vm611_vm5 = vcmp.lt.s32.totalorder %v597_v10, 27  ;;  %vm603_vm6 = vcmp.ge.s32.totalorder %v596_v12, 0  ;;  %vm610_vm7 = vcmp.lt.s32.totalorder %v596_v12, 27  ;;  %s7999_s20 = sld [smem:[#allocation42_spill]]  ;;  %s8000_s2 = sld [smem:[#allocation43_spill]] }
 0x140   :  { %v4854_v21 = vsel %vm616_vm3, 1.0, %v6480_v8  ;;  %vm618_vm8 = vmand %vm604_vm4, %vm611_vm5  ;;  %vm606_vm10 = vcmp.ge.s32.totalorder %v599_v17, 0  ;;  %vm613_vm11 = vcmp.lt.s32.totalorder %v599_v17, 27  ;;  %vm605_vm12 = vcmp.ge.s32.totalorder %v598_v18, 0 }
 0x141   :  { %v268_v2 = vld [vmem:[%s7997_s10 + $0x10] sm:$0xff]  ;;  %v266_v3 = vld [vmem:[%s7997_s10] sm:$0xff]  ;;  %v269_v4 = vld [vmem:[%s7997_s10 + $0x18] sm:$0xff]  ;;  %vm612_vm13 = vcmp.lt.s32.totalorder %v598_v18, 27  ;;  %v600_v24 = vadd.s32 4294967294, %v6854_v20  ;;  %v4856_v25 = vsel %vm618_vm8, 1.0, %v6480_v8 }
 0x142   :  { %282 = vperm.xlu1 %6034, %v268_v2   ;;  %276 = vperm.xlu0 %6033, %v266_v3   ;;  %v267_v5 = vld [vmem:[%s7997_s10 + $0x8] sm:$0xff]  ;;  %v270_v16 = vld [vmem:[%s7997_s10 + $0x20] sm:$0xff]  ;;  %v272_v22 = vld [vmem:[%s7997_s10 + $0x30] sm:$0x3f]  ;;  %vm608_vm1 = vcmp.ge.s32.totalorder %v601_v23, 0  ;;  %vm615_vm2 = vcmp.lt.s32.totalorder %v601_v23, 27 }
 0x143   :  { %v271_v15 = vld [vmem:[%s7997_s10 + $0x28] sm:$0xff]  ;;  %vm617_vm9 = vmand %vm603_vm6, %vm610_vm7  ;;  %v949_v27 = vadd.s32 4294967295, %v6827_v6  ;;  %vm607_vm3 = vcmp.ge.s32.totalorder %v600_v24, 0  ;;  %vm614_vm4 = vcmp.lt.s32.totalorder %v600_v24, 27  ;;  %v486_v28 = vadd.s32 4294967293, %v6827_v6 }
 0x144   :  { %v4855_v26 = vsel %vm617_vm9, 1.0, %v6480_v8  ;;  %vm620_vm14 = vmand %vm606_vm10, %vm613_vm11  ;;  %v950_v31 = vadd.s32 4294967295, %v6837_v11  ;;  %v487_v32 = vadd.s32 4294967293, %v6837_v11  ;;  %v951_v35 = vadd.s32 4294967295, %v6829_v7  ;;  %v317_v0 = vld [vmem:[%s7998_s12] sm:$0xff]  ;;  %v318_v2 = vld [vmem:[%s7998_s12 + $0x8] sm:$0xff] }
 0x145   :  { %vm619_vm15 = vmand %vm605_vm12, %vm612_vm13  ;;  %v4858_v29 = vsel %vm620_vm14, 1.0, %v6480_v8  ;;  %vm956_vm7 = vcmp.ge.s32.totalorder %v949_v27, 0  ;;  %vm963_vm8 = vcmp.lt.s32.totalorder %v949_v27, 27  ;;  %vm493_vm9 = vcmp.ge.s32.totalorder %v486_v28, 0  ;;  %v321_v18 = vld [vmem:[%s7998_s12 + $0x20] sm:$0xff] }
 0x146   :  { %285 = vperm.xlu1 %6034, %v269_v4   ;;  %279 = vperm.xlu0 %6033, %v267_v5   ;;  %v4857_v30 = vsel %vm619_vm15, 1.0, %v6480_v8  ;;  %vm622_vm5 = vmand %vm608_vm1, %vm615_vm2  ;;  %vm500_vm10 = vcmp.lt.s32.totalorder %v486_v28, 27  ;;  %vm957_vm13 = vcmp.ge.s32.totalorder %v950_v31, 0  ;;  %vm964_vm14 = vcmp.lt.s32.totalorder %v950_v31, 27  ;;  %v319_v4 = vld [vmem:[%s7998_s12 + $0x10] sm:$0xff]  ;;  %v320_v5 = vld [vmem:[%s7998_s12 + $0x18] sm:$0xff] }
 0x147   :  { %vm621_vm6 = vmand %vm607_vm3, %vm614_vm4  ;;  %v4860_v33 = vsel %vm622_vm5, 1.0, %v6480_v8  ;;  %vm494_vm15 = vcmp.ge.s32.totalorder %v487_v32, 0  ;;  %vm501_vm1 = vcmp.lt.s32.totalorder %v487_v32, 27  ;;  %v488_v36 = vadd.s32 4294967293, %v6829_v7 }
 0x148   :  { %v4859_v34 = vsel %vm621_vm6, 1.0, %v6480_v8  ;;  %vm970_vm11 = vmand %vm956_vm7, %vm963_vm8  ;;  %vm958_vm4 = vcmp.ge.s32.totalorder %v951_v35, 0  ;;  %vm965_vm5 = vcmp.lt.s32.totalorder %v951_v35, 27  ;;  %v952_v39 = vadd.s32 4294967295, %v6842_v14 }
 0x149   :  { %vm507_vm12 = vmand %vm493_vm9, %vm500_vm10  ;;  %v4879_v37 = vsel %vm970_vm11, 1.0, %v6480_v8  ;;  %vm495_vm6 = vcmp.ge.s32.totalorder %v488_v36, 0  ;;  %vm502_vm7 = vcmp.lt.s32.totalorder %v488_v36, 27  ;;  %v489_v40 = vadd.s32 4294967293, %v6842_v14 }
 0x14a   :  { %291 = vperm.xlu1 %6034, %v271_v15   ;;  %288 = vperm.xlu0 %6033, %v270_v16   ;;  %v4847_v38 = vsel %vm507_vm12, 1.0, %v6480_v8  ;;  %vm971_vm2 = vmand %vm957_vm13, %vm964_vm14  ;;  %vm959_vm10 = vcmp.ge.s32.totalorder %v952_v39, 0  ;;  %vm966_vm11 = vcmp.lt.s32.totalorder %v952_v39, 27  ;;  %v953_v43 = vadd.s32 4294967295, %v6840_v13 }
 0x14b   :  { %vm508_vm3 = vmand %vm494_vm15, %vm501_vm1  ;;  %v4880_v41 = vsel %vm971_vm2, 1.0, %v6480_v8  ;;  %vm496_vm12 = vcmp.ge.s32.totalorder %v489_v40, 0  ;;  %vm503_vm13 = vcmp.lt.s32.totalorder %v489_v40, 27  ;;  %v490_v44 = vadd.s32 4294967293, %v6840_v13 }
 0x14c   :  { %v4848_v42 = vsel %vm508_vm3, 1.0, %v6480_v8  ;;  %vm972_vm8 = vmand %vm958_vm4, %vm965_vm5  ;;  %vm960_vm1 = vcmp.ge.s32.totalorder %v953_v43, 0  ;;  %vm967_vm2 = vcmp.lt.s32.totalorder %v953_v43, 27  ;;  %v954_v47 = vadd.s32 4294967295, %v6854_v20 }
 0x14d   :  { %vm509_vm9 = vmand %vm495_vm6, %vm502_vm7  ;;  %v4881_v45 = vsel %vm972_vm8, 1.0, %v6480_v8  ;;  %vm497_vm3 = vcmp.ge.s32.totalorder %v490_v44, 0  ;;  %vm504_vm4 = vcmp.lt.s32.totalorder %v490_v44, 27  ;;  %v491_v48 = vadd.s32 4294967293, %v6854_v20 }
 0x14e   :  { %639 = vperm.xlu1 %6034, %v4854_v21   ;;  %294 = vperm.xlu0 %6033, %v272_v22   ;;  %v4849_v46 = vsel %vm509_vm9, 1.0, %v6480_v8  ;;  %vm973_vm14 = vmand %vm959_vm10, %vm966_vm11  ;;  %vm961_vm7 = vcmp.ge.s32.totalorder %v954_v47, 0  ;;  %vm968_vm8 = vcmp.lt.s32.totalorder %v954_v47, 27  ;;  %v955_v51 = vadd.s32 4294967295, %v6852_v19  ;;  %v322_v21 = vld [vmem:[%s7998_s12 + $0x28] sm:$0xff] }
 0x14f   :  { %vm510_vm15 = vmand %vm496_vm12, %vm503_vm13  ;;  %v4882_v49 = vsel %vm973_vm14, 1.0, %v6480_v8  ;;  %vm498_vm9 = vcmp.ge.s32.totalorder %v491_v48, 0  ;;  %vm505_vm10 = vcmp.lt.s32.totalorder %v491_v48, 27  ;;  %v492_v52 = vadd.s32 4294967293, %v6852_v19  ;;  %v6968_v47 = vld [vmem:[%s7999_s20 + $0x10] sm:$0x3] }
 0x150   :  { %v4850_v50 = vsel %vm510_vm15, 1.0, %v6480_v8  ;;  %vm974_vm5 = vmand %vm960_vm1, %vm967_vm2  ;;  %vm962_vm13 = vcmp.ge.s32.totalorder %v955_v51, 0  ;;  %vm969_vm14 = vcmp.lt.s32.totalorder %v955_v51, 27  ;;  %v1316_v55 = vadd.s32 1, %v6837_v11  ;;  %v6973_v48 = vld [vmem:[%s7999_s20 + $0x8] sm:$0xff] }
 0x151   :  { %vm511_vm6 = vmand %vm497_vm3, %vm504_vm4  ;;  %v4883_v53 = vsel %vm974_vm5, 1.0, %v6480_v8  ;;  %vm499_vm15 = vcmp.ge.s32.totalorder %v492_v52, 0  ;;  %vm506_vm1 = vcmp.lt.s32.totalorder %v492_v52, 27  ;;  %v1315_v56 = vadd.s32 1, %v6827_v6 }
 0x152   :  { %649 = vperm.xlu1 %6034, %v4856_v25   ;;  %644 = vperm.xlu0 %6033, %v4855_v26   ;;  %v4851_v54 = vsel %vm511_vm6, 1.0, %v6480_v8  ;;  %vm975_vm11 = vmand %vm961_vm7, %vm968_vm8  ;;  %vm1323_vm4 = vcmp.ge.s32.totalorder %v1316_v55, 0  ;;  %vm1330_vm5 = vcmp.lt.s32.totalorder %v1316_v55, 27  ;;  %v1318_v59 = vadd.s32 1, %v6842_v14 }
 0x153   :  { %vm512_vm12 = vmand %vm498_vm9, %vm505_vm10  ;;  %v4884_v57 = vsel %vm975_vm11, 1.0, %v6480_v8  ;;  %vm1322_vm6 = vcmp.ge.s32.totalorder %v1315_v56, 0  ;;  %vm1329_vm7 = vcmp.lt.s32.totalorder %v1315_v56, 27  ;;  %v1317_v60 = vadd.s32 1, %v6829_v7 }
 0x154   :  { %v4852_v58 = vsel %vm512_vm12, 1.0, %v6480_v8  ;;  %vm976_vm2 = vmand %vm962_vm13, %vm969_vm14  ;;  %vm1325_vm10 = vcmp.ge.s32.totalorder %v1318_v59, 0  ;;  %vm1332_vm11 = vcmp.lt.s32.totalorder %v1318_v59, 27  ;;  %v1320_v63 = vadd.s32 1, %v6854_v20 }
 0x155   :  { %vm513_vm3 = vmand %vm499_vm15, %vm506_vm1  ;;  %v4885_v61 = vsel %vm976_vm2, 1.0, %v6480_v8  ;;  %vm1324_vm12 = vcmp.ge.s32.totalorder %v1317_v60, 0  ;;  %vm1331_vm13 = vcmp.lt.s32.totalorder %v1317_v60, 27  ;;  %v1319_v3 = vadd.s32 1, %v6840_v13 }
 0x156   :  { %659 = vperm.xlu1 %6034, %v4858_v29   ;;  %654 = vperm.xlu0 %6033, %v4857_v30   ;;  %v4853_v62 = vsel %vm513_vm3, 1.0, %v6480_v8  ;;  %vm1337_vm8 = vmand %vm1323_vm4, %vm1330_vm5  ;;  %v5820_v12 = vpack.c.bf16 %v318_v2, %v317_v0  ;;  %vm1327_vm1 = vcmp.ge.s32.totalorder %v1320_v63, 0  ;;  %vm1334_vm2 = vcmp.lt.s32.totalorder %v1320_v63, 27  ;;  %v323_v30 = vld [vmem:[%s7998_s12 + $0x30] sm:$0x3]  ;;  %s8001_s12 = sld [smem:[#allocation44_spill]] }
 0x157   :  { %vm1336_vm9 = vmand %vm1322_vm6, %vm1329_vm7  ;;  %v4909_v9 = vsel %vm1337_vm8, 1.0, %v6480_v8  ;;  %v1555_v15 = vadd.s32 2, %v6827_v6  ;;  %vm1326_vm3 = vcmp.ge.s32.totalorder %v1319_v3, 0  ;;  %vm1333_vm4 = vcmp.lt.s32.totalorder %v1319_v3, 27 }
 0x158   :  { %v4908_v10 = vsel %vm1336_vm9, 1.0, %v6480_v8  ;;  %vm1339_vm14 = vmand %vm1325_vm10, %vm1332_vm11  ;;  %v1321_v16 = vadd.s32 1, %v6852_v19  ;;  %5821 = vmatpush3.bf16.msra.mxu0 %v5820_v12  ;;  %v5823_v17 = vpack.c.bf16 %v320_v5, %v319_v4  ;;  %v1556_v24 = vadd.s32 2, %v6837_v11 }
 0x159   :  { %vm1338_vm15 = vmand %vm1324_vm12, %vm1331_vm13  ;;  %v4911_v22 = vsel %vm1339_vm14, 1.0, %v6480_v8  ;;  %5822 = vmatprep.subr.bf16.mxu0 %v6478_v1  ;;  %vm1562_vm7 = vcmp.ge.s32.totalorder %v1555_v15, 0  ;;  %vm1569_vm8 = vcmp.lt.s32.totalorder %v1555_v15, 27  ;;  %v1793_v25 = vadd.s32 3, %v6827_v6 }
 0x15a   :  { %669 = vperm.xlu1 %6034, %v4860_v33   ;;  %664 = vperm.xlu0 %6033, %v4859_v34   ;;  %v4910_v23 = vsel %vm1338_vm15, 1.0, %v6480_v8  ;;  %vm1341_vm5 = vmand %vm1327_vm1, %vm1334_vm2  ;;  %vm1328_vm9 = vcmp.ge.s32.totalorder %v1321_v16, 0  ;;  %vm1335_vm10 = vcmp.lt.s32.totalorder %v1321_v16, 27  ;;  %v5826_v26 = vpack.c.bf16 %v322_v21, %v321_v18 }
 0x15b   :  { %vm1340_vm6 = vmand %vm1326_vm3, %vm1333_vm4  ;;  %v4913_v27 = vsel %vm1341_vm5, 1.0, %v6480_v8  ;;  %vm1563_vm13 = vcmp.ge.s32.totalorder %v1556_v24, 0  ;;  %vm1570_vm14 = vcmp.lt.s32.totalorder %v1556_v24, 27  ;;  %v1557_v29 = vadd.s32 2, %v6829_v7 }
 0x15c   :  { %5824 = vmatpush3.bf16.msra.mxu0 %v5823_v17  ;;  %v4912_v28 = vsel %vm1340_vm6, 1.0, %v6480_v8  ;;  %vm1576_vm11 = vmand %vm1562_vm7, %vm1569_vm8  ;;  %vm1800_vm15 = vcmp.ge.s32.totalorder %v1793_v25, 0  ;;  %vm1807_vm1 = vcmp.lt.s32.totalorder %v1793_v25, 27  ;;  %v1794_v6 = vadd.s32 3, %v6837_v11  ;;  %v3321_v25 = vld [vmem:[%s8000_s2] sm:$0x3f] }
 0x15d   :  { %5825 = vmatprep.subr.bf16.mxu0 %v6478_v1  ;;  %vm1342_vm12 = vmand %vm1328_vm9, %vm1335_vm10  ;;  %vm346_vm2 = vcmask 1041408   ;;  %v4926_v31 = vsel %vm1576_vm11, 1.0, %v6480_v8  ;;  %vm1564_vm5 = vcmp.ge.s32.totalorder %v1557_v29, 0  ;;  %vm1571_vm6 = vcmp.lt.s32.totalorder %v1557_v29, 27 }
 0x15e   :  { %993 = vperm.xlu1 %6034, %v4879_v37   ;;  %530 = vperm.xlu0 %6033, %v4847_v38   ;;  %v4914_v32 = vsel %vm1342_vm12, 1.0, %v6480_v8  ;;  %vm1577_vm3 = vmand %vm1563_vm13, %vm1570_vm14  ;;  %v1558_v11 = vadd.s32 2, %v6842_v14  ;;  %vm1801_vm7 = vcmp.ge.s32.totalorder %v1794_v6, 0  ;;  %vm1808_vm8 = vcmp.lt.s32.totalorder %v1794_v6, 27 }
 0x15f   :  { %vm1814_vm4 = vmand %vm1800_vm15, %vm1807_vm1  ;;  %v1795_v33 = vadd.s32 3, %v6829_v7  ;;  %v4927_v34 = vsel %vm1577_vm3, 1.0, %v6480_v8  ;;  %v1559_v36 = vadd.s32 2, %v6840_v13  ;;  %v1796_v7 = vadd.s32 3, %v6842_v14 }
 0x160   :  { %5827 = vmatpush3.bf16.msra.mxu0 %v5826_v26  ;;  %v4944_v35 = vsel %vm1814_vm4, 1.0, %v6480_v8  ;;  %vm1578_vm9 = vmand %vm1564_vm5, %vm1571_vm6  ;;  %vm1565_vm11 = vcmp.ge.s32.totalorder %v1558_v11, 0  ;;  %vm1572_vm12 = vcmp.lt.s32.totalorder %v1558_v11, 27  ;;  %v1560_v39 = vadd.s32 2, %v6854_v20 }
 0x161   :  { %5283 = vmatprep.subr.mxu0 %v6480_v8  ;;  %vm1815_vm10 = vmand %vm1801_vm7, %vm1808_vm8  ;;  %vm1802_vm13 = vcmp.ge.s32.totalorder %v1795_v33, 0  ;;  %vm1809_vm14 = vcmp.lt.s32.totalorder %v1795_v33, 27  ;;  %v4928_v37 = vsel %vm1578_vm9, 1.0, %v6480_v8  ;;  %vm1566_vm3 = vcmp.ge.s32.totalorder %v1559_v36, 0 }
 0x162   :  { %998 = vperm.xlu1 %6034, %v4880_v41   ;;  %535 = vperm.xlu0 %6033, %v4848_v42   ;;  %v4945_v38 = vsel %vm1815_vm10, 1.0, %v6480_v8  ;;  %vm1579_vm15 = vmand %vm1565_vm11, %vm1572_vm12  ;;  %vm1573_vm4 = vcmp.lt.s32.totalorder %v1559_v36, 27  ;;  %vm1803_vm5 = vcmp.ge.s32.totalorder %v1796_v7, 0  ;;  %vm1810_vm6 = vcmp.lt.s32.totalorder %v1796_v7, 27 }
 0x163   :  { %vm1816_vm1 = vmand %vm1802_vm13, %vm1809_vm14  ;;  %v1797_v40 = vadd.s32 3, %v6840_v13  ;;  %v4929_v14 = vsel %vm1579_vm15, 1.0, %v6480_v8  ;;  %vm1567_vm9 = vcmp.ge.s32.totalorder %v1560_v39, 0  ;;  %vm1574_vm10 = vcmp.lt.s32.totalorder %v1560_v39, 27  ;;  %v6959_v13 = vld [vmem:[%s7999_s20] sm:$0xff] }
 0x164   :  { %5284 = vmatpush3.msk.msra.mxu0 %vm346_vm2, %v323_v30  ;;  %v4946_v41 = vsel %vm1816_vm1, 1.0, %v6480_v8  ;;  %vm1580_vm7 = vmand %vm1566_vm3, %vm1573_vm4  ;;  %v1561_v42 = vadd.s32 2, %v6852_v19  ;;  %v1798_v43 = vadd.s32 3, %v6854_v20  ;;  %v1799_v20 = vadd.s32 3, %v6852_v19 }
 0x165   :  { %5840 = vmatprep.subr.bf16.mxu0 %v6478_v1  ;;  %vm1817_vm8 = vmand %vm1803_vm5, %vm1810_vm6  ;;  %vm1804_vm11 = vcmp.ge.s32.totalorder %v1797_v40, 0  ;;  %vm1811_vm12 = vcmp.lt.s32.totalorder %v1797_v40, 27  ;;  %v4930_v44 = vsel %vm1580_vm7, 1.0, %v6480_v8  ;;  %v2304_v19 = vadd.s32 4294967294, %v6968_v47 }
 0x166   :  { %1003 = vperm.xlu1 %6034, %v4881_v45   ;;  %540 = vperm.xlu0 %6033, %v4849_v46   ;;  %v4947_v45 = vsel %vm1817_vm8, 1.0, %v6480_v8  ;;  %vm1581_vm13 = vmand %vm1567_vm9, %vm1574_vm10  ;;  %vm1568_vm15 = vcmp.ge.s32.totalorder %v1561_v42, 0  ;;  %vm1575_vm1 = vcmp.lt.s32.totalorder %v1561_v42, 27  ;;  %v2302_v46 = vadd.s32 4294967294, %v6959_v13  ;;  %v4861_v42 = vld [vmem:[%s8001_s12 + $0x20] sm:$0xff] }
 0x167   :  { %vm1818_vm14 = vmand %vm1804_vm11, %vm1811_vm12  ;;  %vm1805_vm3 = vcmp.ge.s32.totalorder %v1798_v43, 0  ;;  %vm1812_vm4 = vcmp.lt.s32.totalorder %v1798_v43, 27  ;;  %vm1806_vm9 = vcmp.ge.s32.totalorder %v1799_v20, 0  ;;  %vm1813_vm10 = vcmp.lt.s32.totalorder %v1799_v20, 27  ;;  %v4862_v43 = vld [vmem:[%s8001_s12 + $0x28] sm:$0xff] }
 0x168   :  { %vm1582_vm5 = vmand %vm1568_vm15, %vm1575_vm1  ;;  %vm2305_vm7 = vcmp.ge.s32.totalorder %v2302_v46, 0  ;;  %vm2308_vm8 = vcmp.lt.s32.totalorder %v2302_v46, 9  ;;  %v2303_v51 = vadd.s32 4294967294, %v6973_v48  ;;  %v2255_v55 = vadd.s32 4294967293, %v6959_v13 }
 0x169   :  { %vm1819_vm6 = vmand %vm1805_vm3, %vm1812_vm4  ;;  %v4932_v52 = vsel %vm1582_vm5, 1.0, %v6480_v8  ;;  %v2256_v59 = vadd.s32 4294967293, %v6973_v48  ;;  %v2257_v63 = vadd.s32 4294967293, %v6968_v47  ;;  %v2768_v3 = vadd.s32 1, %v6973_v48 }
 0x16a   :  { %1008 = vperm.xlu1 %6034, %v4882_v49   ;;  %545 = vperm.xlu0 %6033, %v4850_v50   ;;  %v4931_v49 = vsel %vm1581_vm13, 1.0, %v6480_v8  ;;  %v4948_v50 = vsel %vm1818_vm14, 1.0, %v6480_v8  ;;  %vm2311_vm11 = vmand %vm2305_vm7, %vm2308_vm8  ;;  %vm2307_vm13 = vcmp.ge.s32.totalorder %v2304_v19, 0  ;;  %vm2310_vm14 = vcmp.lt.s32.totalorder %v2304_v19, 9 }
 0x16b   :  { %vm1820_vm12 = vmand %vm1806_vm9, %vm1813_vm10  ;;  %vm2306_vm15 = vcmp.ge.s32.totalorder %v2303_v51, 0  ;;  %vm2309_vm1 = vcmp.lt.s32.totalorder %v2303_v51, 9  ;;  %v4973_v56 = vsel %vm2311_vm11, 1.0, %v6480_v8  ;;  %vm2258_vm7 = vcmp.ge.s32.totalorder %v2255_v55, 0 }
 0x16c   :  { %vm2313_vm3 = vmand %vm2307_vm13, %vm2310_vm14  ;;  %vm2261_vm8 = vcmp.lt.s32.totalorder %v2255_v55, 9  ;;  %vm2259_vm13 = vcmp.ge.s32.totalorder %v2256_v59, 0  ;;  %vm2262_vm14 = vcmp.lt.s32.totalorder %v2256_v59, 9  ;;  %v2767_v4 = vadd.s32 1, %v6959_v13  ;;  %v4888_v55 = vld [vmem:[%s8001_s12 + $0x50] sm:$0xff] }
 0x16d   :  { %vm2312_vm4 = vmand %vm2306_vm15, %vm2309_vm1  ;;  %v4975_v60 = vsel %vm2313_vm3, 1.0, %v6480_v8  ;;  %v2769_v12 = vadd.s32 1, %v6968_v47  ;;  %v2908_v17 = vadd.s32 2, %v6973_v48  ;;  %v3048_v18 = vadd.s32 3, %v6959_v13 }
 0x16e   :  { %1013 = vperm.xlu1 %6034, %v4883_v53   ;;  %550 = vperm.xlu0 %6033, %v4851_v54   ;;  %v4949_v53 = vsel %vm1819_vm6, 1.0, %v6480_v8  ;;  %v2531_v54 = vadd.s32 4294967295, %v6959_v13  ;;  %vm2264_vm10 = vmand %vm2258_vm7, %vm2261_vm8  ;;  %v3049_v24 = vadd.s32 3, %v6973_v48  ;;  %v3050_v29 = vadd.s32 3, %v6968_v47 }
 0x16f   :  { %v4970_v2 = vsel %vm2264_vm10, 1.0, %v6480_v8  ;;  %vm2265_vm1 = vmand %vm2259_vm13, %vm2262_vm14  ;;  %vm2774_vm10 = vcmp.lt.s32.totalorder %v2768_v3, 9  ;;  %v273_v6 = vlaneseq }
 0x170   :  { %vm2534_vm5 = vcmp.ge.s32.totalorder %v2531_v54, 0  ;;  %vm2537_vm6 = vcmp.lt.s32.totalorder %v2531_v54, 9  ;;  %v4864_v54 = vld [vmem:[%s8001_s12 + $0x38] sm:$0xff] }
 0x171   :  { %vm2540_vm9 = vmand %vm2534_vm5, %vm2537_vm6  ;;  %vm2260_vm5 = vcmp.ge.s32.totalorder %v2257_v63, 0  ;;  %vm2263_vm6 = vcmp.lt.s32.totalorder %v2257_v63, 9  ;;  %v7016_v11 = vand.u32 127, %v273_v6 }
 0x172   :  { %1018 = vperm.xlu1 %6034, %v4884_v57   ;;  %555 = vperm.xlu0 %6033, %v4852_v58   ;;  %v4950_v57 = vsel %vm1820_vm12, 1.0, %v6480_v8  ;;  %v2532_v58 = vadd.s32 4294967295, %v6973_v48  ;;  %v4982_v0 = vsel %vm2540_vm9, 1.0, %v6480_v8  ;;  %vm2266_vm8 = vmand %vm2260_vm5, %vm2263_vm6  ;;  %vm2771_vm9 = vcmp.ge.s32.totalorder %v2768_v3, 0 }
 0x173   :  { %v4972_v16 = vsel %vm2266_vm8, 1.0, %v6480_v8  ;;  %vm2777_vm13 = vmand %vm2771_vm9, %vm2774_vm10  ;;  %vm2914_vm8 = vcmp.lt.s32.totalorder %v2908_v17, 9  ;;  %vm3051_vm9 = vcmp.ge.s32.totalorder %v3048_v18, 0  ;;  %vm3054_vm10 = vcmp.lt.s32.totalorder %v3048_v18, 9  ;;  %v4915_v18 = vld [vmem:[%s8001_s12 + $0x80] sm:$0xff] }
 0x174   :  { %vm2535_vm11 = vcmp.ge.s32.totalorder %v2532_v58, 0  ;;  %vm2538_vm12 = vcmp.lt.s32.totalorder %v2532_v58, 9  ;;  %v4992_v21 = vsel %vm2777_vm13, 1.0, %v6480_v8 }
 0x175   :  { %vm2541_vm15 = vmand %vm2535_vm11, %vm2538_vm12  ;;  %vm2770_vm11 = vcmp.ge.s32.totalorder %v2767_v4, 0  ;;  %vm2773_vm12 = vcmp.lt.s32.totalorder %v2767_v4, 9 }
 0x176   :  { %1023 = vperm.xlu1 %6034, %v4885_v61   ;;  %560 = vperm.xlu0 %6033, %v4853_v62   ;;  %v4974_v61 = vsel %vm2312_vm4, 1.0, %v6480_v8  ;;  %v2533_v62 = vadd.s32 4294967295, %v6968_v47  ;;  %v4983_v5 = vsel %vm2541_vm15, 1.0, %v6480_v8  ;;  %vm2776_vm14 = vmand %vm2770_vm11, %vm2773_vm12 }
 0x177   :  { %vm3057_vm12 = vmand %vm3051_vm9, %vm3054_vm10 }
 0x178   :  { %vm2536_vm3 = vcmp.ge.s32.totalorder %v2533_v62, 0  ;;  %vm2539_vm4 = vcmp.lt.s32.totalorder %v2533_v62, 9 }
 0x179   :  { %vm2542_vm7 = vmand %vm2536_vm3, %vm2539_vm4  ;;  %vm2772_vm3 = vcmp.ge.s32.totalorder %v2769_v12, 0  ;;  %vm2775_vm4 = vcmp.lt.s32.totalorder %v2769_v12, 9  ;;  %v570_v12 = vld [vmem:[%s8001_s12] sm:$0xff] }
 0x17a   :  { %1364 = vperm.xlu1 %6034, %v4909_v9   ;;  %1359 = vperm.xlu0 %6033, %v4908_v10   ;;  %v4971_v9 = vsel %vm2265_vm1, 1.0, %v6480_v8  ;;  %v2907_v10 = vadd.s32 2, %v6959_v13  ;;  %v4984_v15 = vsel %vm2542_vm7, 1.0, %v6480_v8  ;;  %vm2778_vm6 = vmand %vm2772_vm3, %vm2775_vm4  ;;  %vm2911_vm7 = vcmp.ge.s32.totalorder %v2908_v17, 0  ;;  %v4886_v13 = vld [vmem:[%s8001_s12 + $0x40] sm:$0xff]  ;;  %v571_v17 = vld [vmem:[%s8001_s12 + $0x8] sm:$0xff] }
 0x17b   :  { %vm2917_vm11 = vmand %vm2911_vm7, %vm2914_vm8  ;;  %vm3053_vm7 = vcmp.ge.s32.totalorder %v3050_v29, 0  ;;  %vm3056_vm8 = vcmp.lt.s32.totalorder %v3050_v29, 9 }
 0x17c   :  { %vm2910_vm15 = vcmp.ge.s32.totalorder %v2907_v10, 0  ;;  %vm2913_vm1 = vcmp.lt.s32.totalorder %v2907_v10, 9  ;;  %v4998_v30 = vsel %vm2917_vm11, 1.0, %v6480_v8  ;;  %vm3059_vm10 = vmand %vm3053_vm7, %vm3056_vm8  ;;  %vm324_vm11 = vcmask 408576  }
 0x17d   :  { %vm2916_vm5 = vmand %vm2910_vm15, %vm2913_vm1  ;;  %vm3052_vm15 = vcmp.ge.s32.totalorder %v3049_v24, 0  ;;  %vm3055_vm1 = vcmp.lt.s32.totalorder %v3049_v24, 9  ;;  %vm927_vm8 = vcmask 1040384  }
 0x17e   :  { %1374 = vperm.xlu1 %6034, %v4911_v22   ;;  %1369 = vperm.xlu0 %6033, %v4910_v23   ;;  %v4991_v22 = vsel %vm2776_vm14, 1.0, %v6480_v8  ;;  %v2909_v23 = vadd.s32 2, %v6968_v47  ;;  %v4997_v26 = vsel %vm2916_vm5, 1.0, %v6480_v8  ;;  %vm3058_vm4 = vmand %vm3052_vm15, %vm3055_vm1 }
 0x180   :  { %vm2912_vm13 = vcmp.ge.s32.totalorder %v2909_v23, 0  ;;  %vm2915_vm14 = vcmp.lt.s32.totalorder %v2909_v23, 9 }
 0x181   :  { %vm2918_vm3 = vmand %vm2912_vm13, %vm2915_vm14 }
 0x182   :  { %1384 = vperm.xlu1 %6034, %v4913_v27   ;;  %1379 = vperm.xlu0 %6033, %v4912_v28   ;;  %v4993_v27 = vsel %vm2778_vm6, 1.0, %v6480_v8  ;;  %v3326_v28 = vadd.s32 4294967295, %v3321_v25  ;;  %v4999_v33 = vsel %vm2918_vm3, 1.0, %v6480_v8 }
 0x184   :  { %vm3327_vm5 = vcmp.ge.s32.totalorder %v3326_v28, 0  ;;  %vm3328_vm6 = vcmp.lt.s32.totalorder %v3326_v28, 3  ;;  %v5835_v28 = vpack.c.bf16 %v571_v17, %v570_v12 }
 0x185   :  { %vm3329_vm9 = vmand %vm3327_vm5, %vm3328_vm6 }
 0x186   :  { %1599 = vperm.xlu1 %6034, %v4926_v31   ;;  %1389 = vperm.xlu0 %6033, %v4914_v32   ;;  %v5003_v31 = vsel %vm3057_vm12, 1.0, %v6480_v8  ;;  %v3495_v32 = vadd.s32 1, %v3321_v25  ;;  %v5012_v7 = vsel %vm3329_vm9, 1.0, %v6480_v8  ;;  %vm684_vm9 = vcmask 261120  }
 0x188   :  { %vm3496_vm12 = vcmp.ge.s32.totalorder %v3495_v32, 0  ;;  %vm3497_vm13 = vcmp.lt.s32.totalorder %v3495_v32, 3 }
 0x189   :  { %vm3498_vm15 = vmand %vm3496_vm12, %vm3497_vm13  ;;  %vm1532_vm12 = vcmask 1045504   ;;  %vm464_vm13 = vcmask 1042432  }
 0x18a   :  { %1604 = vperm.xlu1 %6034, %v4927_v34   ;;  %1837 = vperm.xlu0 %6033, %v4944_v35   ;;  %v5004_v34 = vsel %vm3058_vm4, 1.0, %v6480_v8 }
 0x18e   :  { %1609 = vperm.xlu1 %6034, %v4928_v37   ;;  %1842 = vperm.xlu0 %6033, %v4945_v38   ;;  %v5005_v37 = vsel %vm3059_vm10, 1.0, %v6480_v8  ;;  %vm1292_vm10 = vcmask 1046528  }
 0x192   :  { %1614 = vperm.xlu1 %6034, %v4929_v14   ;;  %1847 = vperm.xlu0 %6033, %v4946_v41   ;;  %v5015_v14 = vsel %vm3498_vm15, 1.0, %v6480_v8 }
 0x196   :  { %1619 = vperm.xlu1 %6034, %v4930_v44   ;;  %1852 = vperm.xlu0 %6033, %v4947_v45   ;;  %v5829_v44 = vpack.c.bf16 %v4862_v43, %v4861_v42  ;;  %v4887_v45 = vld [vmem:[%s8001_s12 + $0x48] sm:$0xff] }
 0x197   :  { %v5841_v20 = vpack.c.bf16 %v4887_v45, %v4886_v13 }
 0x198   :  { %5830 = vmatpush3.bf16.msra.mxu1 %v5829_v44 }
 0x199   :  { %5831 = vmatprep.subr.bf16.mxu1 %v6478_v1 }
 0x19a   :  { %1624 = vperm.xlu1 %6034, %v4931_v49   ;;  %1857 = vperm.xlu0 %6033, %v4948_v50  }
 0x19e   :  { %1629 = vperm.xlu1 %6034, %v4932_v52   ;;  %1862 = vperm.xlu0 %6033, %v4949_v53   ;;  %v4863_v53 = vld [vmem:[%s8001_s12 + $0x30] sm:$0xff] }
 0x1a2   :  { %2322 = vperm.xlu1 %6034, %v4973_v56   ;;  %1867 = vperm.xlu0 %6033, %v4950_v57   ;;  %v5832_v56 = vpack.c.bf16 %v4864_v54, %v4863_v53  ;;  %v4889_v57 = vld [vmem:[%s8001_s12 + $0x58] sm:$0xff] }
 0x1a3   :  { %v5844_v58 = vpack.c.bf16 %v4889_v57, %v4888_v55 }
 0x1a4   :  { %5833 = vmatpush3.bf16.msra.mxu1 %v5832_v56 }
 0x1a5   :  { %5834 = vmatprep.subr.bf16.mxu1 %v6478_v1 }
 0x1a6   :  { %2332 = vperm.xlu1 %6034, %v4975_v60   ;;  %2327 = vperm.xlu0 %6033, %v4974_v61  }
 0x1aa   :  { %2551 = vperm.xlu1 %6034, %v4982_v0   ;;  %2275 = vperm.xlu0 %6033, %v4970_v2  }
 0x1ae   :  { %2556 = vperm.xlu1 %6034, %v4983_v5   ;;  %2280 = vperm.xlu0 %6033, %v4971_v9  }
 0x1b2   :  { %2561 = vperm.xlu1 %6034, %v4984_v15   ;;  %2285 = vperm.xlu0 %6033, %v4972_v16  }
 0x1b6   :  { %2792 = vperm.xlu1 %6034, %v4992_v21   ;;  %2787 = vperm.xlu0 %6033, %v4991_v22   ;;  %v4916_v21 = vld [vmem:[%s8001_s12 + $0x88] sm:$0xff] }
 0x1b7   :  { %v5853_v29 = vpack.c.bf16 %v4916_v21, %v4915_v18 }
 0x1ba   :  { %2927 = vperm.xlu1 %6034, %v4997_v26   ;;  %2797 = vperm.xlu0 %6033, %v4993_v27  }
 0x1be   :  { %2932 = vperm.xlu1 %6034, %v4998_v30   ;;  %3068 = vperm.xlu0 %6033, %v5003_v31   ;;  %v572_v30 = vld [vmem:[%s8001_s12 + $0x10] sm:$0xff]  ;;  %v573_v31 = vld [vmem:[%s8001_s12 + $0x18] sm:$0xff] }
 0x1bf   :  { %v5838_v44 = vpack.c.bf16 %v573_v31, %v572_v30 }
 0x1c1   :  { %v277_v35 = vpop.permute.xlu0 %276  ;;  %v283_v38 = vpop.permute.xlu1 %282 }
 0x1c2   :  { %vm296_vm14 = vcmp.eq.s32.totalorder %v7016_v11, %v277_v35  ;;  %2937 = vperm.xlu1 %6034, %v4999_v33   ;;  %3073 = vperm.xlu0 %6033, %v5004_v34   ;;  %vm298_vm1 = vcmp.eq.s32.totalorder %v7016_v11, %v283_v38 }
 0x1c3   :  { %v4832_v36 = vsel %vm296_vm14, 1.0, %v6480_v8  ;;  %v4834_v41 = vsel %vm298_vm1, 1.0, %v6480_v8  ;;  %vm1553_vm14 = vcmask 1043456   ;;  %vm2110_vm1 = vcmask 441344  }
 0x1c4   :  { %5286 = vmatmul.mubr.msk.f32.vlgmr.msra.gmra.mrb[0].mxu0 %vm324_vm11, %v4832_v36 }
 0x1c5   :  { %v280_v39 = vpop.permute.xlu0 %279  ;;  %5288 = vmatprep.mubr.msk.f32.mxu0 %vm6479_vm0, %v6480_v8  ;;  %v286_v46 = vpop.permute.xlu1 %285  ;;  %5842 = vmatpush3.bf16.msra.mxu0 %v5841_v20 }
 0x1c6   :  { %vm297_vm3 = vcmp.eq.s32.totalorder %v7016_v11, %v280_v39  ;;  %3334 = vperm.xlu1 %6034, %v5012_v7   ;;  %3078 = vperm.xlu0 %6033, %v5005_v37   ;;  %vm299_vm4 = vcmp.eq.s32.totalorder %v7016_v11, %v286_v46 }
 0x1c7   :  { %v4833_v40 = vsel %vm297_vm3, 1.0, %v6480_v8  ;;  %5843 = vmatprep.subr.bf16.mxu0 %v6478_v1  ;;  %v4835_v48 = vsel %vm299_vm4, 1.0, %v6480_v8 }
 0x1c8   :  { %5289 = vmatmul.mubr.msk.f32.gmra.mrb[2].mxu0 %vm324_vm11, %v4833_v40 }
 0x1c9   :  { %5291 = vmatprep.mubr.msk.f32.mxu0 %vm6479_vm0, %v6480_v8  ;;  %v289_v47 = vpop.permute.xlu0 %288  ;;  %v292_v49 = vpop.permute.xlu1 %291  ;;  %5845 = vmatpush3.bf16.msra.mxu0 %v5844_v58 }
 0x1ca   :  { %3503 = vperm.xlu0 %6033, %v5015_v14   ;;  %vm300_vm5 = vcmp.eq.s32.totalorder %v7016_v11, %v289_v47  ;;  %vm301_vm6 = vcmp.eq.s32.totalorder %v7016_v11, %v292_v49  ;;  %5852 = vmatprep.subr.bf16.mxu0 %v6478_v1  ;;  %v4917_v14 = vld [vmem:[%s8001_s12 + $0x90] sm:$0xff] }
 0x1cb   :  { %v4836_v50 = vsel %vm300_vm5, 1.0, %v6480_v8  ;;  %v4837_v51 = vsel %vm301_vm6, 1.0, %v6480_v8  ;;  %vm2206_vm5 = vcmask 254976   ;;  %vm3219_vm6 = vcmask 146432  }
 0x1cc   :  { %5292 = vmatmul.mubr.msk.f32.gmra.mrb[4].mxu0 %vm324_vm11, %v4834_v41  ;;  %v4918_v41 = vld [vmem:[%s8001_s12 + $0x98] sm:$0xff] }
 0x1cd   :  { %5294 = vmatprep.mubr.msk.f32.mxu0 %vm6479_vm0, %v6480_v8  ;;  %v295_v19 = vpop.permute.xlu0 %294  ;;  %v640_v60 = vpop.permute.xlu1 %639 }
 0x1ce   :  { %vm302_vm7 = vcmp.eq.s32.totalorder %v7016_v11, %v295_v19 }
 0x1cf   :  { %v4838_v52 = vsel %vm302_vm7, 1.0, %v6480_v8  ;;  %vm3295_vm7 = vcmask 259072  }
 0x1d0   :  { %5295 = vmatmul.mubr.msk.f32.gmra.mrb[6].mxu0 %vm324_vm11, %v4835_v48 }
 0x1d1   :  { %5297 = vmatprep.mubr.msk.f32.mxu0 %vm6479_vm0, %v6480_v8  ;;  %v7086_v59 = vpop.permute.xlu0 %644  ;;  %v7090_v62 = vpop.permute.xlu1 %649 }
 0x1d4   :  { %5298 = vmatmul.mubr.msk.f32.gmra.mrb[8].mxu0 %vm324_vm11, %v4836_v50 }
 0x1d5   :  { %5300 = vmatprep.mubr.msk.f32.mxu0 %vm6479_vm0, %v6480_v8  ;;  %v7088_v61 = vpop.permute.xlu0 %654  ;;  %v7094_v0 = vpop.permute.xlu1 %659 }
 0x1d8   :  { %5301 = vmatmul.mubr.msk.f32.gmra.mrb[10].mxu0 %vm324_vm11, %v4837_v51  ;;  %v5856_v51 = vpack.c.bf16 %v4918_v41, %v4917_v14 }
 0x1d9   :  { %5303 = vmatprep.mubr.msk.f32.mxu0 %vm6479_vm0, %v6480_v8  ;;  %v7092_v63 = vpop.permute.xlu0 %664  ;;  %v7098_v3 = vpop.permute.xlu1 %669 }
 0x1dc   :  { %5304 = vmatmul.mubr.msk.f32.gmra.mrb[12].mxu0 %vm324_vm11, %v4838_v52  ;;  %vm1313_vm11 = vcmask 1044480  }
 0x1dd   :  { %5372 = vmatprep.mubr.msk.f32.mxu0 %vm6479_vm0, %v6480_v8  ;;  %v7096_v2 = vpop.permute.xlu0 %530  ;;  %v994_v5 = vpop.permute.xlu1 %993 }
 0x1e1   :  { %v7100_v4 = vpop.permute.xlu0 %535  ;;  %v999_v10 = vpop.permute.xlu1 %998 }
 0x1e5   :  { %v7102_v9 = vpop.permute.xlu0 %540  ;;  %v1004_v25 = vpop.permute.xlu1 %1003 }
 0x1e9   :  { %v7107_v15 = vpop.permute.xlu0 %545  ;;  %v1009_v52 = vpop.permute.xlu1 %1008 }
 0x1ed   :  { %v7144_v42 = vpop.permute.xlu0 %550  ;;  %v1014_v30 = vpop.permute.xlu1 %1013 }
 0x1f1   :  { %v7188_v17 = vpop.permute.xlu0 %555 }
 0x297   :  { %v7109_v16 = vpop.f32.mrb[0].mxu0 }
 0x298   :  { %v928_v22 = vrot.slane %v7109_v16, 7  ;;  %v5287_v23 = vpop.f32.mrb[1].mxu0  ;;  %v574_v24 = vrot.slane %v7109_v16, 6  ;;  %v1293_v27 = vrot.slane %v7109_v16, 1  ;;  %v1533_v32 = vrot.slane %v7109_v16, 2 }
 0x299   :  { %v1772_v33 = vrot.slane %v7109_v16, 3  ;;  %v465_v48 = vrot.slane %v7109_v16, 5 }
 0x29a   :  { %v948_v26 = vsel %vm927_vm8, 0.0, %v928_v22  ;;  %v594_v35 = vsel %vm346_vm2, 0.0, %v574_v24 }
 0x29b   :  { %v7132_v34 = vpop.f32.mrb[2].mxu0  ;;  %v1026_v36 = vmul.f32 %v994_v5, %v948_v26  ;;  %v672_v40 = vmul.f32 %v640_v60, %v594_v35 }
 0x29c   :  { %v1294_v7 = vrot.slane %v7132_v34, 1  ;;  %v1534_v37 = vrot.slane %v7132_v34, 2  ;;  %v1773_v38 = vrot.slane %v7132_v34, 3  ;;  %v5290_v39 = vpop.f32.mrb[3].mxu0  ;;  %v575_v43 = vrot.slane %v7132_v34, 6 }
 0x29d   :  { %5373 = vmatmul.mubr.msk.f32.vlgmr.msra.gmra.mrb[14].mxu0 %vm684_vm9, %v1026_v36  ;;  %v929_v13 = vrot.slane %v7132_v34, 7  ;;  %v466_v45 = vrot.slane %v7132_v34, 5  ;;  %5315 = vmatmul.mubr.msk.f32.vlgmr.msra.gmra.mrb[0].mxu1 %vm684_vm9, %v672_v40 }
 0x29e   :  { %5375 = vmatprep.mubr.msk.f32.mxu0 %vm6479_vm0, %v6480_v8  ;;  %v7154_v46 = vsel %vm1292_vm10, %v1293_v27, %v1294_v7  ;;  %v7157_v20 = vsel %vm1313_vm11, %v1772_v33, %v1773_v38  ;;  %v7162_v47 = vsel %vm1532_vm12, %v1533_v32, %v1534_v37  ;;  %5317 = vmatprep.mubr.msk.f32.mxu1 %vm6479_vm0, %v6480_v8 }
 0x29f   :  { %v7165_v49 = vpop.f32.mrb[4].mxu0  ;;  %v576_v50 = vsel %vm346_vm2, %v574_v24, %v575_v43  ;;  %v930_v19 = vsel %vm927_vm8, %v928_v22, %v929_v13  ;;  %5836 = vmatpush3.bf16.msra.mxu1 %v5835_v28  ;;  %5854 = vmatpush3.bf16.msra.mxu0 %v5853_v29  ;;  %v7179_v58 = vsel %vm464_vm13, %v465_v48, %v466_v45 }
 0x2a0   :  { %v5293_v53 = vpop.f32.mrb[5].mxu0  ;;  %v673_v54 = vmul.f32 %v7086_v59, %v576_v50  ;;  %v1027_v55 = vmul.f32 %v999_v10, %v930_v19  ;;  %v577_v56 = vrot.slane %v7165_v49, 6  ;;  %v931_v57 = vrot.slane %v7165_v49, 7  ;;  %5837 = vmatprep.subr.bf16.mxu1 %v6478_v1  ;;  %5855 = vmatprep.subr.bf16.mxu0 %v6478_v1 }
 0x2a1   :  { %v1296_v60 = vrot.slane %v7165_v49, 1  ;;  %v468_v5 = vrot.slane %v7165_v49, 5  ;;  %v1775_v12 = vrot.slane %v7165_v49, 3 }
 0x2a2   :  { %5318 = vmatmul.mubr.msk.f32.gmra.mrb[2].mxu1 %vm684_vm9, %v673_v54  ;;  %5376 = vmatmul.mubr.msk.f32.gmra.mrb[16].mxu0 %vm684_vm9, %v1027_v55  ;;  %v578_v59 = vsel %vm346_vm2, %v575_v43, %v577_v56  ;;  %v932_v10 = vsel %vm927_vm8, %v929_v13, %v931_v57  ;;  %v7232_v43 = vpop.permute.xlu0 %560  ;;  %v1019_v55 = vpop.permute.xlu1 %1018 }
 0x2a3   :  { %v7190_v18 = vpop.f32.mrb[6].mxu0  ;;  %5320 = vmatprep.mubr.msk.f32.mxu1 %vm6479_vm0, %v6480_v8  ;;  %5378 = vmatprep.mubr.msk.f32.mxu0 %vm6479_vm0, %v6480_v8  ;;  %v674_v21 = vmul.f32 %v7090_v62, %v578_v59  ;;  %v1028_v22 = vmul.f32 %v1004_v25, %v932_v10  ;;  %v7198_v23 = vsel %vm1292_vm10, %v1294_v7, %v1296_v60 }
 0x2a4   :  { %v5296_v24 = vpop.f32.mrb[7].mxu0  ;;  %v579_v26 = vrot.slane %v7190_v18, 6  ;;  %v933_v27 = vrot.slane %v7190_v18, 7  ;;  %5839 = vmatpush3.bf16.msra.mxu1 %v5838_v44  ;;  %5857 = vmatpush3.bf16.msra.mxu0 %v5856_v51  ;;  %v7203_v28 = vsel %vm464_vm13, %v466_v45, %v468_v5  ;;  %v1298_v29 = vrot.slane %v7190_v18, 1 }
 0x2a5   :  { %5846 = vmatprep.subr.bf16.mxu1 %v6478_v1  ;;  %v470_v62 = vrot.slane %v7190_v18, 5  ;;  %5864 = vmatprep.subr.bf16.mxu0 %v6478_v1  ;;  %v7210_v25 = vsel %vm1313_vm11, %v1773_v38, %v1775_v12  ;;  %v1777_v33 = vrot.slane %v7190_v18, 3 }
 0x2a6   :  { %5321 = vmatmul.mubr.msk.f32.gmra.mrb[4].mxu1 %vm684_vm9, %v674_v21  ;;  %5379 = vmatmul.mubr.msk.f32.gmra.mrb[18].mxu0 %vm684_vm9, %v1028_v22  ;;  %v580_v31 = vsel %vm346_vm2, %v577_v56, %v579_v26  ;;  %v934_v32 = vsel %vm927_vm8, %v931_v57, %v933_v27  ;;  %v7225_v38 = vsel %vm1292_vm10, %v1296_v60, %v1298_v29  ;;  %v1360_v24 = vpop.permute.xlu0 %1359 }
 0x2a7   :  { %v7217_v35 = vpop.f32.mrb[8].mxu0  ;;  %5323 = vmatprep.mubr.msk.f32.mxu1 %vm6479_vm0, %v6480_v8  ;;  %5381 = vmatprep.mubr.msk.f32.mxu0 %vm6479_vm0, %v6480_v8  ;;  %v675_v36 = vmul.f32 %v7088_v61, %v580_v31  ;;  %v1029_v7 = vmul.f32 %v1009_v52, %v934_v32  ;;  %v7230_v41 = vsel %vm464_vm13, %v468_v5, %v470_v62 }
 0x2a8   :  { %v5299_v39 = vpop.f32.mrb[9].mxu0  ;;  %v581_v40 = vrot.slane %v7217_v35, 6  ;;  %v935_v14 = vrot.slane %v7217_v35, 7  ;;  %v1300_v13 = vrot.slane %v7217_v35, 1  ;;  %v472_v44 = vrot.slane %v7217_v35, 5 }
 0x2a9   :  { %v7237_v61 = vsel %vm1313_vm11, %v1775_v12, %v1777_v33  ;;  %v1779_v19 = vrot.slane %v7217_v35, 3 }
 0x2aa   :  { %5324 = vmatmul.mubr.msk.f32.gmra.mrb[6].mxu1 %vm684_vm9, %v675_v36  ;;  %5382 = vmatmul.mubr.msk.f32.gmra.mrb[20].mxu0 %vm684_vm9, %v1029_v7  ;;  %v582_v45 = vsel %vm346_vm2, %v579_v26, %v581_v40  ;;  %v936_v50 = vsel %vm927_vm8, %v933_v27, %v935_v14  ;;  %v7252_v54 = vsel %vm1292_vm10, %v1298_v29, %v1300_v13 }
 0x2ab   :  { %v7244_v51 = vpop.f32.mrb[10].mxu0  ;;  %5326 = vmatprep.mubr.msk.f32.mxu1 %vm6479_vm0, %v6480_v8  ;;  %5384 = vmatprep.mubr.msk.f32.mxu0 %vm6479_vm0, %v6480_v8  ;;  %v676_v52 = vmul.f32 %v7094_v0, %v582_v45  ;;  %v1030_v53 = vmul.f32 %v1014_v30, %v936_v50  ;;  %v7257_v5 = vsel %vm464_vm13, %v470_v62, %v472_v44  ;;  %v1538_v45 = vrot.slane %v7190_v18, 2 }
 0x2ac   :  { %v5302_v56 = vpop.f32.mrb[11].mxu0  ;;  %v583_v57 = vrot.slane %v7244_v51, 6  ;;  %v937_v60 = vrot.slane %v7244_v51, 7  ;;  %v1302_v59 = vrot.slane %v7244_v51, 1  ;;  %v474_v10 = vrot.slane %v7244_v51, 5 }
 0x2ad   :  { %v7262_v12 = vsel %vm1313_vm11, %v1777_v33, %v1779_v19  ;;  %v1781_v22 = vrot.slane %v7244_v51, 3  ;;  %v4898_v56 = vld [vmem:[%s8001_s12 + $0x68] sm:$0xff] }
 0x2ae   :  { %5327 = vmatmul.mubr.msk.f32.gmra.mrb[8].mxu1 %vm684_vm9, %v676_v52  ;;  %5385 = vmatmul.mubr.msk.f32.gmra.mrb[22].mxu0 %vm684_vm9, %v1030_v53  ;;  %v584_v0 = vsel %vm346_vm2, %v581_v40, %v583_v57  ;;  %v938_v21 = vsel %vm927_vm8, %v935_v14, %v937_v60  ;;  %v7277_v62 = vsel %vm1292_vm10, %v1300_v13, %v1302_v59  ;;  %v1024_v40 = vpop.permute.xlu1 %1023  ;;  %v4897_v52 = vld [vmem:[%s8001_s12 + $0x60] sm:$0xff] }
 0x2af   :  { %v7269_v26 = vpop.f32.mrb[12].mxu0  ;;  %5329 = vmatprep.mubr.msk.f32.mxu1 %vm6479_vm0, %v6480_v8  ;;  %5387 = vmatprep.mubr.msk.f32.mxu0 %vm6479_vm0, %v6480_v8  ;;  %v677_v27 = vmul.f32 %v7092_v63, %v584_v0  ;;  %v1031_v29 = vmul.f32 %v1019_v55, %v938_v21  ;;  %v7282_v33 = vsel %vm464_vm13, %v472_v44, %v474_v10  ;;  %v1536_v63 = vrot.slane %v7165_v49, 2  ;;  %v1370_v21 = vpop.permute.xlu0 %1369 }
 0x2b0   :  { %v5305_v30 = vpop.f32.mrb[13].mxu0  ;;  %v585_v31 = vrot.slane %v7269_v26, 6  ;;  %v939_v32 = vrot.slane %v7269_v26, 7  ;;  %v1304_v36 = vrot.slane %v7269_v26, 1  ;;  %v476_v7 = vrot.slane %v7269_v26, 5 }
 0x2b1   :  { %v7287_v39 = vsel %vm1313_vm11, %v1779_v19, %v1781_v22  ;;  %v1783_v44 = vrot.slane %v7269_v26, 3  ;;  %v1540_v55 = vrot.slane %v7217_v35, 2  ;;  %v1542_v0 = vrot.slane %v7244_v51, 2 }
 0x2b2   :  { %5330 = vmatmul.mubr.msk.f32.gmra.mrb[10].mxu1 %vm684_vm9, %v677_v27  ;;  %5388 = vmatmul.mubr.msk.f32.gmra.mrb[24].mxu0 %vm684_vm9, %v1031_v29  ;;  %v586_v14 = vsel %vm346_vm2, %v583_v57, %v585_v31  ;;  %v940_v13 = vsel %vm927_vm8, %v937_v60, %v939_v32  ;;  %v7307_v53 = vsel %vm1292_vm10, %v1302_v59, %v1304_v36  ;;  %v4952_v57 = vld [vmem:[%s8001_s12 + $0xc8] sm:$0xff]  ;;  %v485_v27 = vsel %vm464_vm13, 0.0, %v465_v48 }
 0x2b3   :  { %5332 = vmatprep.mubr.msk.f32.mxu1 %vm6479_vm0, %v6480_v8  ;;  %5390 = vmatprep.mubr.msk.f32.mxu0 %vm6479_vm0, %v6480_v8  ;;  %v678_v50 = vmul.f32 %v7098_v3, %v586_v14  ;;  %v1032_v19 = vmul.f32 %v1024_v40, %v940_v13  ;;  %v4951_v3 = vld [vmem:[%s8001_s12 + $0xc0] sm:$0xff]  ;;  %v7320_v60 = vsel %vm464_vm13, %v474_v10, %v476_v7  ;;  %v4899_v7 = vld [vmem:[%s8001_s12 + $0x70] sm:$0xff]  ;;  %v1380_v13 = vpop.permute.xlu0 %1379 }
 0x2b4   :  { %v7325_v59 = vsel %vm1313_vm11, %v1781_v22, %v1783_v44  ;;  %v7336_v10 = vsel %vm1532_vm12, %v1534_v37, %v1536_v63  ;;  %v7339_v29 = vsel %vm1532_vm12, %v1536_v63, %v1538_v45  ;;  %v1544_v22 = vrot.slane %v7269_v26, 2  ;;  %v4900_v63 = vld [vmem:[%s8001_s12 + $0x78] sm:$0xff] }
 0x2b5   :  { %v5847_v48 = vpack.c.bf16 %v4898_v56, %v4897_v52  ;;  %v5865_v30 = vpack.c.bf16 %v4952_v57, %v4951_v3  ;;  %v7347_v31 = vsel %vm1532_vm12, %v1538_v45, %v1540_v55  ;;  %v563_v32 = vmul.f32 %v7096_v2, %v485_v27  ;;  %v4953_v2 = vld [vmem:[%s8001_s12 + $0xd0] sm:$0xff] }
 0x2b6   :  { %5333 = vmatmul.mubr.msk.f32.gmra.mrb[12].mxu1 %vm684_vm9, %v678_v50  ;;  %5391 = vmatmul.mubr.msk.f32.gmra.mrb[26].mxu0 %vm684_vm9, %v1032_v19  ;;  %v1392_v37 = vmul.f32 %v1360_v24, %v7154_v46  ;;  %v7358_v40 = vsel %vm1532_vm12, %v1540_v55, %v1542_v0  ;;  %v7363_v14 = vsel %vm1532_vm12, %v1542_v0, %v1544_v22  ;;  %v4954_v46 = vld [vmem:[%s8001_s12 + $0xd8] sm:$0xff]  ;;  %v1365_v24 = vpop.permute.xlu1 %1364 }
 0x2b7   :  { %5343 = vmatprep.mubr.msk.f32.mxu1 %vm6479_vm0, %v6480_v8  ;;  %5430 = vmatprep.mubr.msk.f32.mxu0 %vm6479_vm0, %v6480_v8  ;;  %v5850_v45 = vpack.c.bf16 %v4900_v63, %v4899_v7  ;;  %v564_v50 = vmul.f32 %v7100_v4, %v7179_v58  ;;  %v1393_v19 = vmul.f32 %v1365_v24, %v7198_v23  ;;  %v1390_v23 = vpop.permute.xlu0 %1389  ;;  %v4936_v0 = vld [vmem:[%s8001_s12 + $0xb8] sm:$0xff] }
 0x2b8   :  { %v5868_v52 = vpack.c.bf16 %v4954_v46, %v4953_v2  ;;  %v565_v4 = vmul.f32 %v7102_v9, %v7203_v28  ;;  %v1394_v58 = vmul.f32 %v1370_v21, %v7225_v38  ;;  %v566_v9 = vmul.f32 %v7107_v15, %v7230_v41 }
 0x2b9   :  { %v567_v56 = vmul.f32 %v7144_v42, %v7257_v5  ;;  %v1396_v3 = vmul.f32 %v1380_v13, %v7277_v62  ;;  %v568_v41 = vmul.f32 %v7188_v17, %v7282_v33  ;;  %v1314_v42 = vsel %vm1313_vm11, %v1304_v36, 0.0  ;;  %v4933_v62 = vld [vmem:[%s8001_s12 + $0xa0] sm:$0xff]  ;;  %v4934_v33 = vld [vmem:[%s8001_s12 + $0xa8] sm:$0xff] }
 0x2ba   :  { %5344 = vmatmul.mubr.msk.f32.vlgmr.msra.gmra.mrb[14].mxu1 %vm684_vm9, %v563_v32  ;;  %5431 = vmatmul.mubr.msk.f32.vlgmr.msra.gmra.mrb[28].mxu0 %vm684_vm9, %v1392_v37  ;;  %v1375_v55 = vpop.permute.xlu1 %1374  ;;  %v569_v17 = vmul.f32 %v7232_v43, %v7320_v60  ;;  %v1398_v5 = vmul.f32 %v1390_v23, %v1314_v42  ;;  %v4935_v60 = vld [vmem:[%s8001_s12 + $0xb0] sm:$0xff] }
 0x2bb   :  { %5346 = vmatprep.mubr.msk.f32.mxu1 %vm6479_vm0, %v6480_v8  ;;  %5433 = vmatprep.mubr.msk.f32.mxu0 %vm6479_vm0, %v6480_v8  ;;  %v1395_v28 = vmul.f32 %v1375_v55, %v7252_v54  ;;  %v1838_v38 = vpop.permute.xlu0 %1837  ;;  %v5862_v21 = vpack.c.bf16 %v4936_v0, %v4935_v60 }
 0x2bc   :  { %5848 = vmatpush3.bf16.msra.mxu1 %v5847_v48  ;;  %5866 = vmatpush3.bf16.msra.mxu0 %v5865_v30  ;;  %v1870_v43 = vmul.f32 %v1838_v38, %v7157_v20  ;;  %v1792_v30 = vsel %vm464_vm13, %v1783_v44, 0.0 }
 0x2bd   :  { %5849 = vmatprep.subr.bf16.mxu1 %v6478_v1  ;;  %5867 = vmatprep.subr.bf16.mxu0 %v6478_v1 }
 0x2be   :  { %5347 = vmatmul.mubr.msk.f32.gmra.mrb[16].mxu1 %vm684_vm9, %v564_v50  ;;  %5434 = vmatmul.mubr.msk.f32.gmra.mrb[30].mxu0 %vm684_vm9, %v1393_v19  ;;  %v1385_v15 = vpop.permute.xlu1 %1384 }
 0x2bf   :  { %5349 = vmatprep.mubr.msk.f32.mxu1 %vm6479_vm0, %v6480_v8  ;;  %5436 = vmatprep.mubr.msk.f32.mxu0 %vm6479_vm0, %v6480_v8  ;;  %v1397_v54 = vmul.f32 %v1385_v15, %v7307_v53  ;;  %v1843_v57 = vpop.permute.xlu0 %1842  ;;  %v5859_v53 = vpack.c.bf16 %v4934_v33, %v4933_v62 }
 0x2c0   :  { %5851 = vmatpush3.bf16.msra.mxu1 %v5850_v45  ;;  %5869 = vmatpush3.bf16.msra.mxu0 %v5868_v52  ;;  %v1871_v20 = vmul.f32 %v1843_v57, %v7210_v25 }
 0x2c1   :  { %5858 = vmatprep.subr.bf16.mxu1 %v6478_v1  ;;  %5879 = vmatprep.subr.bf16.mxu0 %v6478_v1 }
 0x2c2   :  { %5350 = vmatmul.mubr.msk.f32.gmra.mrb[18].mxu1 %vm684_vm9, %v565_v4  ;;  %5437 = vmatmul.mubr.msk.f32.gmra.mrb[32].mxu0 %vm684_vm9, %v1394_v58 }
 0x2c3   :  { %5352 = vmatprep.mubr.msk.f32.mxu1 %vm6479_vm0, %v6480_v8  ;;  %5439 = vmatprep.mubr.msk.f32.mxu0 %vm6479_vm0, %v6480_v8  ;;  %v1848_v36 = vpop.permute.xlu0 %1847 }
 0x2c6   :  { %5353 = vmatmul.mubr.msk.f32.gmra.mrb[20].mxu1 %vm684_vm9, %v566_v9  ;;  %5440 = vmatmul.mubr.msk.f32.gmra.mrb[34].mxu0 %vm684_vm9, %v1395_v28 }
 0x2c7   :  { %5355 = vmatprep.mubr.msk.f32.mxu1 %vm6479_vm0, %v6480_v8  ;;  %5442 = vmatprep.mubr.msk.f32.mxu0 %vm6479_vm0, %v6480_v8  ;;  %v1853_v27 = vpop.permute.xlu0 %1852 }
 0x2ca   :  { %5356 = vmatmul.mubr.msk.f32.gmra.mrb[22].mxu1 %vm684_vm9, %v567_v56  ;;  %5443 = vmatmul.mubr.msk.f32.gmra.mrb[36].mxu0 %vm684_vm9, %v1396_v3 }
 0x2cb   :  { %5358 = vmatprep.mubr.msk.f32.mxu1 %vm6479_vm0, %v6480_v8  ;;  %5445 = vmatprep.mubr.msk.f32.mxu0 %vm6479_vm0, %v6480_v8  ;;  %v1858_v25 = vpop.permute.xlu0 %1857 }
 0x2ce   :  { %5359 = vmatmul.mubr.msk.f32.gmra.mrb[24].mxu1 %vm684_vm9, %v568_v41  ;;  %5446 = vmatmul.mubr.msk.f32.gmra.mrb[38].mxu0 %vm684_vm9, %v1397_v54 }
 0x2cf   :  { %5361 = vmatprep.mubr.msk.f32.mxu1 %vm6479_vm0, %v6480_v8  ;;  %5448 = vmatprep.mubr.msk.f32.mxu0 %vm6479_vm0, %v6480_v8  ;;  %v1863_v48 = vpop.permute.xlu0 %1862 }
 0x2d2   :  { %5362 = vmatmul.mubr.msk.f32.gmra.mrb[26].mxu1 %vm684_vm9, %v569_v17  ;;  %5449 = vmatmul.mubr.msk.f32.gmra.mrb[40].mxu0 %vm684_vm9, %v1398_v5 }
 0x2d3   :  { %5401 = vmatprep.mubr.msk.f32.mxu1 %vm6479_vm0, %v6480_v8  ;;  %5488 = vmatprep.mubr.msk.f32.mxu0 %vm6479_vm0, %v6480_v8 }
 0x2d6   :  { %5402 = vmatmul.mubr.msk.f32.vlgmr.msra.gmra.mrb[28].mxu1 %vm684_vm9, %v7109_v16  ;;  %5489 = vmatmul.mubr.msk.f32.vlgmr.msra.gmra.mrb[42].mxu0 %vm684_vm9, %v1870_v43  ;;  %v1872_v16 = vmul.f32 %v1848_v36, %v7237_v61  ;;  %v1600_v61 = vpop.permute.xlu1 %1599 }
 0x2d7   :  { %5404 = vmatprep.mubr.msk.f32.mxu1 %vm6479_vm0, %v6480_v8  ;;  %5491 = vmatprep.mubr.msk.f32.mxu0 %vm6479_vm0, %v6480_v8 }
 0x2d8   :  { %5860 = vmatpush3.bf16.msra.mxu1 %v5859_v53 }
 0x2d9   :  { %5861 = vmatprep.subr.bf16.mxu1 %v6478_v1 }
 0x2da   :  { %5405 = vmatmul.mubr.msk.f32.gmra.mrb[30].mxu1 %vm684_vm9, %v7132_v34  ;;  %5492 = vmatmul.mubr.msk.f32.gmra.mrb[44].mxu0 %vm684_vm9, %v1871_v20  ;;  %v1873_v34 = vmul.f32 %v1853_v27, %v7262_v12  ;;  %v1605_v12 = vpop.permute.xlu1 %1604 }
 0x2db   :  { %5407 = vmatprep.mubr.msk.f32.mxu1 %vm6479_vm0, %v6480_v8  ;;  %5494 = vmatprep.mubr.msk.f32.mxu0 %vm6479_vm0, %v6480_v8  ;;  %v1633_v44 = vmul.f32 %v1605_v12, %v7336_v10 }
 0x2dc   :  { %5863 = vmatpush3.bf16.msra.mxu1 %v5862_v21 }
 0x2dd   :  { %5870 = vmatprep.subr.bf16.mxu1 %v6478_v1 }
 0x2de   :  { %5408 = vmatmul.mubr.msk.f32.gmra.mrb[32].mxu1 %vm684_vm9, %v7165_v49  ;;  %5495 = vmatmul.mubr.msk.f32.gmra.mrb[46].mxu0 %vm684_vm9, %v1872_v16  ;;  %v1874_v49 = vmul.f32 %v1858_v25, %v7287_v39 }
 0x2df   :  { %5410 = vmatprep.mubr.msk.f32.mxu1 %vm6479_vm0, %v6480_v8  ;;  %5497 = vmatprep.mubr.msk.f32.mxu0 %vm6479_vm0, %v6480_v8 }
 0x2e2   :  { %5411 = vmatmul.mubr.msk.f32.gmra.mrb[34].mxu1 %vm684_vm9, %v7190_v18  ;;  %5498 = vmatmul.mubr.msk.f32.gmra.mrb[48].mxu0 %vm684_vm9, %v1873_v34  ;;  %v1875_v18 = vmul.f32 %v1863_v48, %v7325_v59  ;;  %v1610_v59 = vpop.permute.xlu1 %1609 }
 0x2e3   :  { %5413 = vmatprep.mubr.msk.f32.mxu1 %vm6479_vm0, %v6480_v8  ;;  %5500 = vmatprep.mubr.msk.f32.mxu0 %vm6479_vm0, %v6480_v8  ;;  %v1634_v37 = vmul.f32 %v1610_v59, %v7339_v29 }
 0x2e6   :  { %5414 = vmatmul.mubr.msk.f32.gmra.mrb[36].mxu1 %vm684_vm9, %v7217_v35  ;;  %5501 = vmatmul.mubr.msk.f32.gmra.mrb[50].mxu0 %vm684_vm9, %v1874_v49  ;;  %v1868_v35 = vpop.permute.xlu0 %1867  ;;  %v1615_v32 = vpop.permute.xlu1 %1614 }
 0x2e7   :  { %5416 = vmatprep.mubr.msk.f32.mxu1 %vm6479_vm0, %v6480_v8  ;;  %5503 = vmatprep.mubr.msk.f32.mxu0 %vm6479_vm0, %v6480_v8  ;;  %v1876_v39 = vmul.f32 %v1868_v35, %v1792_v30 }
 0x2ea   :  { %5417 = vmatmul.mubr.msk.f32.gmra.mrb[38].mxu1 %vm684_vm9, %v7244_v51  ;;  %5504 = vmatmul.mubr.msk.f32.gmra.mrb[52].mxu0 %vm684_vm9, %v1875_v18  ;;  %v1632_v51 = vmul.f32 %v1600_v61, %v7162_v47  ;;  %v1620_v7 = vpop.permute.xlu1 %1619  ;;  %v1635_v47 = vmul.f32 %v1615_v32, %v7347_v31  ;;  %v1554_v31 = vsel %vm1553_vm14, %v1544_v22, 0.0 }
 0x2eb   :  { %5419 = vmatprep.mubr.msk.f32.mxu1 %vm6479_vm0, %v6480_v8  ;;  %5506 = vmatprep.mubr.msk.f32.mxu0 %vm6479_vm0, %v6480_v8  ;;  %v1636_v10 = vmul.f32 %v1620_v7, %v7358_v40 }
 0x2ee   :  { %5420 = vmatmul.mubr.msk.f32.gmra.mrb[40].mxu1 %vm684_vm9, %v7269_v26  ;;  %5507 = vmatmul.mubr.msk.f32.gmra.mrb[54].mxu0 %vm684_vm9, %v1876_v39  ;;  %v1625_v63 = vpop.permute.xlu1 %1624 }
 0x2ef   :  { %5459 = vmatprep.mubr.msk.f32.mxu1 %vm6479_vm0, %v6480_v8  ;;  %5540 = vmatprep.mubr.msk.f32.mxu0 %vm6479_vm0, %v6480_v8  ;;  %v1637_v29 = vmul.f32 %v1625_v63, %v7363_v14 }
 0x2f2   :  { %5460 = vmatmul.mubr.msk.f32.vlgmr.msra.gmra.mrb[42].mxu1 %vm684_vm9, %v1632_v51  ;;  %v1630_v2 = vpop.permute.xlu1 %1629 }
 0x2f3   :  { %5462 = vmatprep.mubr.msk.f32.mxu1 %vm6479_vm0, %v6480_v8  ;;  %v1638_v40 = vmul.f32 %v1630_v2, %v1554_v31 }
 0x2f6   :  { %5463 = vmatmul.mubr.msk.f32.gmra.mrb[44].mxu1 %vm684_vm9, %v1633_v44 }
 0x2f7   :  { %5465 = vmatprep.mubr.msk.f32.mxu1 %vm6479_vm0, %v6480_v8 }
 0x2fa   :  { %5466 = vmatmul.mubr.msk.f32.gmra.mrb[46].mxu1 %vm684_vm9, %v1634_v37 }
 0x2fb   :  { %5468 = vmatprep.mubr.msk.f32.mxu1 %vm6479_vm0, %v6480_v8 }
 0x2fe   :  { %5469 = vmatmul.mubr.msk.f32.gmra.mrb[48].mxu1 %vm684_vm9, %v1635_v47 }
 0x2ff   :  { %5471 = vmatprep.mubr.msk.f32.mxu1 %vm6479_vm0, %v6480_v8 }
 0x302   :  { %5472 = vmatmul.mubr.msk.f32.gmra.mrb[50].mxu1 %vm684_vm9, %v1636_v10 }
 0x303   :  { %5474 = vmatprep.mubr.msk.f32.mxu1 %vm6479_vm0, %v6480_v8 }
 0x306   :  { %5475 = vmatmul.mubr.msk.f32.gmra.mrb[52].mxu1 %vm684_vm9, %v1637_v29 }
 0x307   :  { %5477 = vmatprep.mubr.msk.f32.mxu1 %vm6479_vm0, %v6480_v8 }
 0x30a   :  { %5478 = vmatmul.mubr.msk.f32.gmra.mrb[54].mxu1 %vm684_vm9, %v1638_v40 }
 0x30b   :  { %5523 = vmatprep.mubr.msk.f32.mxu1 %vm6479_vm0, %v6480_v8 }
 0x370   :  { %v1125_v46 = vpop.f32.mrb[14].mxu0  ;;  %v772_v24 = vpop.f32.mrb[0].mxu1 }
 0x371   :  { %v5374_v13 = vpop.f32.mrb[15].mxu0  ;;  %v5316_v14 = vpop.f32.mrb[1].mxu1 }
 0x375   :  { %v777_v45 = vpop.f32.mrb[2].mxu1  ;;  %v1130_v26 = vpop.f32.mrb[16].mxu0 }
 0x376   :  { %v5319_v50 = vpop.f32.mrb[3].mxu1  ;;  %v5377_v22 = vpop.f32.mrb[17].mxu0 }
 0x379   :  { %v782_v19 = vpop.f32.mrb[4].mxu1  ;;  %v1135_v52 = vpop.f32.mrb[18].mxu0 }
 0x37a   :  { %v5322_v4 = vpop.f32.mrb[5].mxu1  ;;  %v5380_v58 = vpop.f32.mrb[19].mxu0 }
 0x37d   :  { %v787_v23 = vpop.f32.mrb[6].mxu1  ;;  %v1140_v55 = vpop.f32.mrb[20].mxu0 }
 0x37e   :  { %v5325_v9 = vpop.f32.mrb[7].mxu1  ;;  %v5383_v28 = vpop.f32.mrb[21].mxu0 }
 0x381   :  { %v792_v38 = vpop.f32.mrb[8].mxu1  ;;  %v1145_v56 = vpop.f32.mrb[22].mxu0 }
 0x382   :  { %v5328_v3 = vpop.f32.mrb[9].mxu1  ;;  %v5386_v15 = vpop.f32.mrb[23].mxu0 }
 0x385   :  { %v797_v41 = vpop.f32.mrb[10].mxu1  ;;  %v1150_v54 = vpop.f32.mrb[24].mxu0 }
 0x386   :  { %v5331_v57 = vpop.f32.mrb[11].mxu1  ;;  %v5389_v42 = vpop.f32.mrb[25].mxu0 }
 0x389   :  { %v802_v17 = vpop.f32.mrb[12].mxu1  ;;  %v1155_v5 = vpop.f32.mrb[26].mxu0 }
 0x38a   :  { %v5334_v62 = vpop.f32.mrb[13].mxu1  ;;  %v5392_v33 = vpop.f32.mrb[27].mxu0 }
 0x38d   :  { %v893_v36 = vpop.f32.mrb[14].mxu1  ;;  %v1491_v43 = vpop.f32.mrb[28].mxu0 }
 0x38e   :  { %v894_v53 = vadd.f32 %v893_v36, %v772_v24  ;;  %v5345_v60 = vpop.f32.mrb[15].mxu1  ;;  %v5432_v0 = vpop.f32.mrb[29].mxu0 }
 0x390   :  { %v1159_v20 = vadd.f32 %v1125_v46, %v894_v53 }
 0x391   :  { %v898_v21 = vpop.f32.mrb[16].mxu1  ;;  %v1496_v27 = vpop.f32.mrb[30].mxu0 }
 0x392   :  { %v899_v16 = vadd.f32 %v898_v21, %v777_v45  ;;  %v5348_v25 = vpop.f32.mrb[17].mxu1  ;;  %v5435_v34 = vpop.f32.mrb[31].mxu0 }
 0x394   :  { %v1160_v61 = vadd.f32 %v1130_v26, %v899_v16 }
 0x395   :  { %v903_v49 = vpop.f32.mrb[18].mxu1  ;;  %v1501_v48 = vpop.f32.mrb[32].mxu0 }
 0x396   :  { %v904_v18 = vadd.f32 %v903_v49, %v782_v19  ;;  %v5351_v12 = vpop.f32.mrb[19].mxu1  ;;  %v5438_v30 = vpop.f32.mrb[33].mxu0 }
 0x398   :  { %v1161_v35 = vadd.f32 %v1135_v52, %v904_v18 }
 0x399   :  { %v908_v39 = vpop.f32.mrb[20].mxu1  ;;  %v1506_v59 = vpop.f32.mrb[34].mxu0 }
 0x39a   :  { %v909_v51 = vadd.f32 %v908_v39, %v787_v23  ;;  %v5354_v44 = vpop.f32.mrb[21].mxu1  ;;  %v5441_v32 = vpop.f32.mrb[35].mxu0 }
 0x39c   :  { %v1162_v37 = vadd.f32 %v1140_v55, %v909_v51 }
 0x39d   :  { %v913_v7 = vpop.f32.mrb[22].mxu1  ;;  %v1511_v47 = vpop.f32.mrb[36].mxu0 }
 0x39e   :  { %v914_v10 = vadd.f32 %v913_v7, %v792_v38  ;;  %v5357_v63 = vpop.f32.mrb[23].mxu1  ;;  %v5444_v29 = vpop.f32.mrb[37].mxu0 }
 0x39f   :  { %v7541_v29 = vld [vmem:[#allocation5] ss:$0 sm:$0xff] }
 0x3a0   :  { %v1163_v31 = vadd.f32 %v1145_v56, %v914_v10 }
 0x3a1   :  { %v918_v2 = vpop.f32.mrb[24].mxu1  ;;  %v1516_v40 = vpop.f32.mrb[38].mxu0 }
 0x3a2   :  { %v919_v46 = vadd.f32 %v918_v2, %v797_v41  ;;  %v5360_v24 = vpop.f32.mrb[25].mxu1  ;;  %v5447_v13 = vpop.f32.mrb[39].mxu0 }
 0x3a4   :  { %v1164_v14 = vadd.f32 %v1150_v54, %v919_v46 }
 0x3a5   :  { %v923_v45 = vpop.f32.mrb[26].mxu1  ;;  %v1521_v26 = vpop.f32.mrb[40].mxu0 }
 0x3a6   :  { %v924_v50 = vadd.f32 %v923_v45, %v802_v17  ;;  %v5363_v22 = vpop.f32.mrb[27].mxu1  ;;  %v5450_v19 = vpop.f32.mrb[41].mxu0 }
 0x3a8   :  { %v1165_v52 = vadd.f32 %v1155_v5, %v924_v50 }
 0x3a9   :  { %v1251_v4 = vpop.f32.mrb[28].mxu1  ;;  %v1969_v58 = vpop.f32.mrb[42].mxu0 }
 0x3aa   :  { %v1285_v23 = vadd.f32 %v1251_v4, %v1159_v20  ;;  %v5403_v55 = vpop.f32.mrb[29].mxu1  ;;  %v5490_v9 = vpop.f32.mrb[43].mxu0 }
 0x3ac   :  { %v1525_v28 = vadd.f32 %v1491_v43, %v1285_v23 }
 0x3ad   :  { %v1256_v38 = vpop.f32.mrb[30].mxu1  ;;  %v1974_v56 = vpop.f32.mrb[44].mxu0 }
 0x3ae   :  { %v1286_v3 = vadd.f32 %v1256_v38, %v1160_v61  ;;  %v5406_v15 = vpop.f32.mrb[31].mxu1  ;;  %v5493_v41 = vpop.f32.mrb[45].mxu0 }
 0x3b0   :  { %v1526_v57 = vadd.f32 %v1496_v27, %v1286_v3 }
 0x3b1   :  { %v1261_v42 = vpop.f32.mrb[32].mxu1  ;;  %v1979_v54 = vpop.f32.mrb[46].mxu0 }
 0x3b2   :  { %v1287_v62 = vadd.f32 %v1261_v42, %v1161_v35  ;;  %v5409_v33 = vpop.f32.mrb[33].mxu1  ;;  %v5496_v17 = vpop.f32.mrb[47].mxu0 }
 0x3b4   :  { %v1527_v36 = vadd.f32 %v1501_v48, %v1287_v62 }
 0x3b5   :  { %v1266_v53 = vpop.f32.mrb[34].mxu1  ;;  %v1984_v5 = vpop.f32.mrb[48].mxu0 }
 0x3b6   :  { %v1288_v60 = vadd.f32 %v1266_v53, %v1162_v37  ;;  %v5412_v0 = vpop.f32.mrb[35].mxu1  ;;  %v5499_v20 = vpop.f32.mrb[49].mxu0 }
 0x3b8   :  { %v1528_v21 = vadd.f32 %v1506_v59, %v1288_v60 }
 0x3b9   :  { %v1271_v16 = vpop.f32.mrb[36].mxu1  ;;  %v1989_v43 = vpop.f32.mrb[50].mxu0 }
 0x3ba   :  { %v1289_v25 = vadd.f32 %v1271_v16, %v1163_v31  ;;  %v5415_v34 = vpop.f32.mrb[37].mxu1  ;;  %v5502_v61 = vpop.f32.mrb[51].mxu0 }
 0x3bc   :  { %v1529_v49 = vadd.f32 %v1511_v47, %v1289_v25 }
 0x3bd   :  { %v1276_v18 = vpop.f32.mrb[38].mxu1  ;;  %v1994_v27 = vpop.f32.mrb[52].mxu0 }
 0x3be   :  { %v1290_v12 = vadd.f32 %v1276_v18, %v1164_v14  ;;  %v5418_v30 = vpop.f32.mrb[39].mxu1  ;;  %v5505_v35 = vpop.f32.mrb[53].mxu0 }
 0x3c0   :  { %v1530_v39 = vadd.f32 %v1516_v40, %v1290_v12 }
 0x3c1   :  { %v1281_v51 = vpop.f32.mrb[40].mxu1  ;;  %v7539_v48 = vpop.f32.mrb[54].mxu0 }
 0x3c2   :  { %v1291_v44 = vadd.f32 %v1281_v51, %v1165_v52  ;;  %v5421_v32 = vpop.f32.mrb[41].mxu1  ;;  %v5508_v37 = vpop.f32.mrb[55].mxu0 }
 0x3c4   :  { %v1531_v7 = vadd.f32 %v1521_v26, %v1291_v44 }
 0x3c5   :  { %v1731_v59 = vpop.f32.mrb[42].mxu1 }
 0x3c6   :  { %v1765_v10 = vadd.f32 %v1731_v59, %v1525_v28  ;;  %v5461_v63 = vpop.f32.mrb[43].mxu1 }
 0x3c8   :  { %v2003_v31 = vadd.f32 %v1969_v58, %v1765_v10 }
 0x3c9   :  { %v1736_v47 = vpop.f32.mrb[44].mxu1 }
 0x3ca   :  { %v2017_v2 = vadd.f32 %v7541_v29, %v2003_v31  ;;  %v1766_v46 = vadd.f32 %v1736_v47, %v1526_v57  ;;  %v5464_v24 = vpop.f32.mrb[45].mxu1 }
 0x3cc   :  { %v2004_v13 = vadd.f32 %v1974_v56, %v1766_v46  ;;  %v2024_v40 = vmax.f32 %v2017_v2, 0.0 }
 0x3cd   :  { %v1741_v14 = vpop.f32.mrb[46].mxu1 }
 0x3ce   :  { %v2018_v45 = vadd.f32 %v7541_v29, %v2004_v13  ;;  %v1767_v50 = vadd.f32 %v1741_v14, %v1527_v36  ;;  %v5467_v22 = vpop.f32.mrb[47].mxu1  ;;  %v2038_v52 = vrot.slane %v2024_v40, 1  ;;  %v2059_v4 = vrot.slane %v2024_v40, 2 }
 0x3d0   :  { %v2025_v19 = vmax.f32 %v2018_v45, 0.0  ;;  %v2005_v26 = vadd.f32 %v1979_v54, %v1767_v50 }
 0x3d1   :  { %v1746_v23 = vpop.f32.mrb[48].mxu1 }
 0x3d2   :  { %v2039_v55 = vrot.slane %v2025_v19, 1  ;;  %v2060_v9 = vrot.slane %v2025_v19, 2  ;;  %v2019_v58 = vadd.f32 %v7541_v29, %v2005_v26  ;;  %v1768_v28 = vadd.f32 %v1746_v23, %v1528_v21  ;;  %v5470_v38 = vpop.f32.mrb[49].mxu1 }
 0x3d3   :  { %v7563_v23 = vshrl.u32 %v273_v6, 7 }
 0x3d4   :  { %v2026_v3 = vmax.f32 %v2019_v58, 0.0  ;;  %v2006_v15 = vadd.f32 %v1984_v5, %v1768_v28  ;;  %v2040_v56 = vsel %vm1292_vm10, %v2038_v52, %v2039_v55  ;;  %v2061_v41 = vsel %vm1532_vm12, %v2059_v4, %v2060_v9 }
 0x3d5   :  { %v1751_v57 = vpop.f32.mrb[50].mxu1  ;;  %v2080_v42 = vmax.f32 %v2024_v40, %v2040_v56  ;;  %v2098_v38 = vmul.u32 3, %v7563_v23 }
 0x3d6   :  { %v2041_v62 = vrot.slane %v2026_v3, 1  ;;  %v2062_v33 = vrot.slane %v2026_v3, 2  ;;  %v2020_v54 = vadd.f32 %v7541_v29, %v2006_v15  ;;  %v1769_v17 = vadd.f32 %v1751_v57, %v1529_v49  ;;  %v5473_v36 = vpop.f32.mrb[51].mxu1 }
 0x3d7   :  { %v2087_v53 = vmax.f32 %v2080_v42, %v2061_v41  ;;  %vm2101_vm15 = vcmp.eq.s32.totalorder %v7016_v11, %v2098_v38  ;;  %v2097_v57 = vadd.s32 16, %v7563_v23 }
 0x3d8   :  { %v2027_v60 = vmax.f32 %v2020_v54, 0.0  ;;  %v2007_v0 = vadd.f32 %v1989_v43, %v1769_v17  ;;  %v2042_v20 = vsel %vm1292_vm10, %v2039_v55, %v2041_v62  ;;  %v2063_v21 = vsel %vm1532_vm12, %v2060_v9, %v2062_v33 }
 0x3d9   :  { %v1756_v5 = vpop.f32.mrb[52].mxu1  ;;  %v2081_v16 = vmax.f32 %v2025_v19, %v2042_v20  ;;  %v2100_v54 = vmul.u32 3, %v2097_v57  ;;  %v2328_v57 = vpop.permute.xlu0 %2327 }
 0x3da   :  { %v2043_v25 = vrot.slane %v2027_v60, 1  ;;  %v2064_v34 = vrot.slane %v2027_v60, 2  ;;  %v2021_v61 = vadd.f32 %v7541_v29, %v2007_v0  ;;  %v1770_v18 = vadd.f32 %v1756_v5, %v1530_v39  ;;  %v5476_v12 = vpop.f32.mrb[53].mxu1  ;;  %v2291_v0 = vld [vmem:[#allocation7] sm:$0xff]  ;;  %v2341_v5 = vld [vmem:[#allocation7 + $0x30] sm:$0xff] }
 0x3db   :  { %v2088_v30 = vmax.f32 %v2081_v16, %v2063_v21  ;;  %vm2103_vm4 = vcmp.eq.s32.totalorder %v7016_v11, %v2100_v54  ;;  %v2292_v21 = vld [vmem:[#allocation7 + $0x8] sm:$0xff]  ;;  %v2342_v16 = vld [vmem:[#allocation7 + $0x38] sm:$0xff] }
 0x3dc   :  { %v2028_v35 = vmax.f32 %v2021_v61, 0.0  ;;  %v2008_v51 = vadd.f32 %v1994_v27, %v1770_v18  ;;  %v2044_v49 = vsel %vm1292_vm10, %v2041_v62, %v2043_v25  ;;  %v2065_v44 = vsel %vm1532_vm12, %v2062_v33, %v2064_v34 }
 0x3dd   :  { %v1761_v43 = vpop.f32.mrb[54].mxu1  ;;  %v5871_v32 = vpack.c.bf16 %v2088_v30, %v2087_v53  ;;  %v2082_v37 = vmax.f32 %v2026_v3, %v2044_v49  ;;  %v2096_v3 = vadd.s32 8, %v7563_v23  ;;  %v7576_v33 = vsel %vm2101_vm15, 1.0, %v6480_v8  ;;  %v2339_v53 = vld [vmem:[#allocation7 + $0x20] sm:$0xff]  ;;  %v2276_v54 = vpop.permute.xlu0 %2275 }
 0x3de   :  { %v2045_v59 = vrot.slane %v2028_v35, 1  ;;  %v2066_v10 = vrot.slane %v2028_v35, 2  ;;  %v2022_v63 = vadd.f32 %v7541_v29, %v2008_v51  ;;  %v1771_v31 = vadd.f32 %v1761_v43, %v1531_v7  ;;  %v5479_v47 = vpop.f32.mrb[55].mxu1 }
 0x3df   :  { %5872 = vmatpush3.bf16.msra.mxu1 %v5871_v32  ;;  %v2089_v2 = vmax.f32 %v2082_v37, %v2065_v44  ;;  %v2099_v6 = vmul.u32 3, %v2096_v3  ;;  %v4965_v36 = vsel %vm2103_vm4, 1.0, %v6480_v8  ;;  %v5883_v61 = vpack.c.bf16 %v2342_v16, %v2341_v5 }
 0x3e0   :  { %v2029_v39 = vmax.f32 %v2022_v63, 0.0  ;;  %v2009_v46 = vadd.f32 %v7539_v48, %v1771_v31  ;;  %5873 = vmatprep.subr.bf16.mxu1 %v6478_v1  ;;  %v2046_v27 = vsel %vm1292_vm10, %v2043_v25, %v2045_v59  ;;  %v2067_v24 = vsel %vm1532_vm12, %v2064_v34, %v2066_v10  ;;  %v2293_v34 = vld [vmem:[#allocation7 + $0x10] sm:$0xff] }
 0x3e1   :  { %v2083_v13 = vmax.f32 %v2027_v60, %v2046_v27  ;;  %vm2102_vm3 = vcmp.eq.s32.totalorder %v7016_v11, %v2099_v6  ;;  %v2340_v60 = vld [vmem:[#allocation7 + $0x28] sm:$0xff]  ;;  %v5886_v25 = vpack.c.bf16 %v2292_v21, %v2291_v0  ;;  %v2294_v11 = vld [vmem:[#allocation7 + $0x18] sm:$0xff] }
 0x3e2   :  { %v2047_v40 = vrot.slane %v2029_v39, 1  ;;  %v2068_v14 = vrot.slane %v2029_v39, 2  ;;  %v2023_v45 = vadd.f32 %v7541_v29, %v2009_v46  ;;  %v4964_v17 = vsel %vm2102_vm3, 1.0, %v6480_v8  ;;  %v2569_v0 = vld [vmem:[#allocation7 + $0x48] sm:$0xff] }
 0x3e3   :  { %v2090_v50 = vmax.f32 %v2083_v13, %v2067_v24  ;;  %v5880_v20 = vpack.c.bf16 %v2340_v60, %v2339_v53  ;;  %v5889_v18 = vpack.c.bf16 %v2294_v11, %v2293_v34  ;;  %v2568_v60 = vld [vmem:[#allocation7 + $0x40] sm:$0xff]  ;;  %v2666_v34 = vld [vmem:[#allocation7 + $0x68] sm:$0xff] }
 0x3e4   :  { %v2030_v22 = vmax.f32 %v2023_v45, 0.0  ;;  %v2048_v7 = vsel %vm1292_vm10, %v2045_v59, %v2047_v40  ;;  %v2069_v19 = vsel %vm1532_vm12, %v2066_v10, %v2068_v14  ;;  %v5892_v11 = vpack.c.bf16 %v2569_v0, %v2568_v60 }
 0x3e5   :  { %v5874_v26 = vpack.c.bf16 %v2090_v50, %v2089_v2  ;;  %v2084_v52 = vmax.f32 %v2028_v35, %v2048_v7  ;;  %5881 = vmatpush3.bf16.msra.mxu0 %v5880_v20 }
 0x3e6   :  { %v2049_v48 = vrot.slane %v2030_v22, 1  ;;  %v2070_v4 = vrot.slane %v2030_v22, 2  ;;  %5882 = vmatprep.subr.bf16.mxu0 %v6478_v1 }
 0x3e7   :  { %5875 = vmatpush3.bf16.msra.mxu1 %v5874_v26  ;;  %v2091_v55 = vmax.f32 %v2084_v52, %v2069_v19 }
 0x3e8   :  { %5876 = vmatprep.subr.bf16.mxu1 %v6478_v1  ;;  %v2050_v9 = vsel %vm1292_vm10, %v2047_v40, %v2049_v48  ;;  %v2071_v29 = vsel %vm1532_vm12, %v2068_v14, %v2070_v4  ;;  %v2058_v28 = vsel %vm1313_vm11, %v2049_v48, 0.0  ;;  %v2079_v42 = vsel %vm1553_vm14, %v2070_v4, 0.0 }
 0x3e9   :  { %v2085_v58 = vmax.f32 %v2029_v39, %v2050_v9  ;;  %v2086_v56 = vmax.f32 %v2030_v22, %v2058_v28  ;;  %5884 = vmatpush3.bf16.msra.mxu0 %v5883_v61  ;;  %v2570_v61 = vld [vmem:[#allocation7 + $0x50] sm:$0xff] }
 0x3ea   :  { %5891 = vmatprep.subr.bf16.mxu0 %v6478_v1 }
 0x3eb   :  { %v2092_v15 = vmax.f32 %v2085_v58, %v2071_v29  ;;  %v2093_v62 = vmax.f32 %v2086_v56, %v2079_v42  ;;  %v2323_v56 = vpop.permute.xlu1 %2322 }
 0x3ed   :  { %v5877_v41 = vpack.c.bf16 %v2092_v15, %v2091_v55 }
 0x3ef   :  { %5878 = vmatpush3.bf16.msra.mxu1 %v5877_v41  ;;  %v7601_v6 = vpop.permute.xlu1 %2332 }
 0x3f0   :  { %5521 = vmatprep.subr.mxu1 %v6480_v8 }
 0x3f3   :  { %5522 = vmatpush3.msk.msra.mxu1 %vm1532_vm12, %v2093_v62  ;;  %v7603_v42 = vpop.permute.xlu1 %2551 }
 0x3f4   :  { %5524 = vmatmul.mubr.msk.f32.vlgmr.msra.gmra.mrb[56].mxu1 %vm2110_vm1, %v7576_v33  ;;  %5885 = vmatprep.subr.bf16.mxu1 %v6478_v1 }
 0x3f5   :  { %5526 = vmatprep.mubr.msk.f32.mxu1 %vm6479_vm0, %v6480_v8  ;;  %5887 = vmatpush3.bf16.msra.mxu1 %v5886_v25  ;;  %v2665_v25 = vld [vmem:[#allocation7 + $0x60] sm:$0xff] }
 0x3f6   :  { %5888 = vmatprep.subr.bf16.mxu1 %v6478_v1 }
 0x3f8   :  { %5527 = vmatmul.mubr.msk.f32.gmra.mrb[58].mxu1 %vm2110_vm1, %v4964_v17 }
 0x3f9   :  { %5529 = vmatprep.mubr.msk.f32.mxu1 %vm6479_vm0, %v6480_v8  ;;  %5890 = vmatpush3.bf16.msra.mxu1 %v5889_v18  ;;  %v2571_v18 = vld [vmem:[#allocation7 + $0x58] sm:$0xff] }
 0x3fa   :  { %5897 = vmatprep.subr.bf16.mxu1 %v6478_v1 }
 0x3fc   :  { %5530 = vmatmul.mubr.msk.f32.gmra.mrb[60].mxu1 %vm2110_vm1, %v4965_v36 }
 0x3fd   :  { %5557 = vmatprep.mubr.msk.f32.mxu1 %vm6479_vm0, %v6480_v8 }
 0x4c7   :  { %v2189_v12 = vpop.f32.mrb[56].mxu1 }
 0x4c8   :  { %v5525_v30 = vpop.f32.mrb[57].mxu1  ;;  %v2217_v35 = vmul.f32 %v2189_v12, %v2189_v12  ;;  %v2203_v49 = vsel %vm684_vm9, %v2189_v12, 0.0 }
 0x4ca   :  { %v2220_v59 = vsel %vm684_vm9, %v2217_v35, 0.0 }
 0x4cb   :  { %v2194_v51 = vpop.f32.mrb[58].mxu1 }
 0x4cc   :  { %v2204_v44 = vsel %vm684_vm9, %v2194_v51, 0.0  ;;  %v2218_v43 = vmul.f32 %v2194_v51, %v2194_v51  ;;  %v5528_v32 = vpop.f32.mrb[59].mxu1 }
 0x4cd   :  { %v2205_v37 = vadd.f32 %v2204_v44, %v2203_v49 }
 0x4ce   :  { %v2221_v10 = vsel %vm684_vm9, %v2218_v43, 0.0 }
 0x4cf   :  { %v2222_v63 = vadd.f32 %v2221_v10, %v2220_v59  ;;  %v2199_v31 = vpop.f32.mrb[60].mxu1  ;;  %v2668_v59 = vld [vmem:[#allocation7 + $0x78] sm:$0xff] }
 0x4d0   :  { %v2207_v47 = vsel %vm2206_vm5, %v2199_v31, 0.0  ;;  %v2219_v2 = vmul.f32 %v2199_v31, %v2199_v31  ;;  %v5531_v39 = vpop.f32.mrb[61].mxu1 }
 0x4d1   :  { %v2208_v46 = vadd.f32 %v2207_v47, %v2205_v37  ;;  %v2667_v37 = vld [vmem:[#allocation7 + $0x70] sm:$0xff]  ;;  %v5895_v39 = vpack.c.bf16 %v2571_v18, %v2570_v61 }
 0x4d2   :  { %v2223_v27 = vsel %vm2206_vm5, %v2219_v2, 0.0  ;;  %v2281_v2 = vpop.permute.xlu0 %2280 }
 0x4d3   :  { %v2209_v24 = vrot.slane %v2208_v46, 4  ;;  %v2224_v13 = vadd.f32 %v2223_v27, %v2222_v63 }
 0x4d5   :  { %v2210_v40 = vadd.f32 %v2209_v24, %v2208_v46  ;;  %v2225_v14 = vrot.slane %v2224_v13, 4  ;;  %v5901_v24 = vpack.c.bf16 %v2668_v59, %v2667_v37 }
 0x4d7   :  { %v2211_v45 = vrot.slane %v2210_v40, 2  ;;  %v2226_v50 = vadd.f32 %v2225_v14, %v2224_v13 }
 0x4d9   :  { %v2212_v22 = vadd.f32 %v2211_v45, %v2210_v40  ;;  %v2227_v7 = vrot.slane %v2226_v50, 2 }
 0x4db   :  { %v2213_v19 = vrot.slane %v2212_v22, 1  ;;  %v2228_v26 = vadd.f32 %v2227_v7, %v2226_v50 }
 0x4dd   :  { %v2214_v52 = vadd.f32 %v2213_v19, %v2212_v22  ;;  %v2229_v48 = vrot.slane %v2228_v26, 1 }
 0x4df   :  { %v2216_v4 = vmul.f32 0.055555556, %v2214_v52  ;;  %v2230_v55 = vadd.f32 %v2229_v48, %v2228_v26 }
 0x4e1   :  { %v2231_v9 = vmul.f32 0.055555556, %v2230_v55  ;;  %v2232_v29 = vmul.f32 %v2216_v4, %v2216_v4  ;;  %v2235_v58 = vsub.f32 %v2189_v12, %v2216_v4  ;;  %v2236_v28 = vsub.f32 %v2194_v51, %v2216_v4  ;;  %v7618_v51 = vpop.permute.xlu1 %2556 }
 0x4e2   :  { %v2237_v38 = vsub.f32 %v2199_v31, %v2216_v4  ;;  %v5898_v31 = vpack.c.bf16 %v2666_v34, %v2665_v25  ;;  %v2947_v25 = vld [vmem:[#allocation7 + $0xb8] sm:$0xff] }
 0x4e3   :  { %v2233_v3 = vsub.f32 %v2231_v9, %v2232_v29 }
 0x4e5   :  { %v2234_v15 = vmax.f32 %v2233_v3, 0.0  ;;  %v2562_v48 = vpop.permute.xlu1 %2561 }
 0x4e7   :  { %v2238_v41 = vadd.f32 1e-05, %v2234_v15  ;;  %v2804_v15 = vld [vmem:[#allocation7 + $0x80] sm:$0xff] }
 0x4e9   :  { %6038 = vrsqrt.f32 %v2238_v41 }
 0x4f3   :  { %v6039_v62 = vpop.eup %6038 }
 0x4f4   :  { %v7605_v17 = vmul.f32 %v6039_v62, %v2235_v58  ;;  %v7607_v36 = vmul.f32 %v6039_v62, %v2236_v28  ;;  %v7609_v53 = vmul.f32 %v6039_v62, %v2237_v38  ;;  %v2286_v58 = vpop.permute.xlu0 %2285  ;;  %v2944_v62 = vld [vmem:[#allocation7 + $0xa0] sm:$0xff] }
 0x4f6   :  { %v2295_v20 = vrot.slane %v7605_v17, 6  ;;  %v2248_v21 = vrot.slane %v7605_v17, 5  ;;  %v2296_v5 = vrot.slane %v7607_v36, 6  ;;  %v2249_v16 = vrot.slane %v7607_v36, 5 }
 0x4f7   :  { %v2522_v12 = vrot.slane %v7605_v17, 7  ;;  %v2523_v30 = vrot.slane %v7607_v36, 7  ;;  %v2525_v35 = vrot.slane %v7609_v53, 7  ;;  %v2758_v47 = vrot.slane %v7605_v17, 1 }
 0x4f8   :  { %v2301_v49 = vsel %vm346_vm2, 0.0, %v2295_v20  ;;  %v2254_v44 = vsel %vm464_vm13, 0.0, %v2248_v21  ;;  %v2297_v43 = vsel %vm346_vm2, %v2295_v20, %v2296_v5  ;;  %v2250_v32 = vsel %vm464_vm13, %v2248_v21, %v2249_v16  ;;  %v2806_v21 = vld [vmem:[#allocation7 + $0x90] sm:$0xff]  ;;  %v2788_v61 = vpop.permute.xlu0 %2787 }
 0x4f9   :  { %v2335_v10 = vmul.f32 %v2323_v56, %v2301_v49  ;;  %v2288_v63 = vmul.f32 %v2276_v54, %v2254_v44  ;;  %v2524_v46 = vsel %vm927_vm8, %v2522_v12, %v2523_v30  ;;  %v2336_v27 = vmul.f32 %v2328_v57, %v2297_v43  ;;  %v2805_v57 = vld [vmem:[#allocation7 + $0x88] sm:$0xff]  ;;  %v3087_v43 = vld [vmem:[#allocation7 + $0xd0] sm:$0xff] }
 0x4fa   :  { %v7629_v13 = vsel %vm927_vm8, %v2523_v30, %v2525_v35  ;;  %v2759_v40 = vrot.slane %v7607_v36, 1  ;;  %v2289_v14 = vmul.f32 %v2281_v2, %v2250_v32  ;;  %v2900_v45 = vrot.slane %v7605_v17, 2  ;;  %v2945_v54 = vld [vmem:[#allocation7 + $0xa8] sm:$0xff]  ;;  %v3088_v32 = vld [vmem:[#allocation7 + $0xd8] sm:$0xff] }
 0x4fb   :  { %5541 = vmatmul.mubr.msk.f32.vlgmr.msra.gmra.mrb[56].mxu0 %vm684_vm9, %v2335_v10  ;;  %5558 = vmatmul.mubr.msk.f32.vlgmr.msra.gmra.mrb[62].mxu1 %vm684_vm9, %v2288_v63  ;;  %v2901_v50 = vrot.slane %v7607_v36, 2  ;;  %v2761_v22 = vrot.slane %v7609_v53, 1  ;;  %v2903_v19 = vrot.slane %v7609_v53, 2  ;;  %v3040_v26 = vrot.slane %v7605_v17, 3  ;;  %v3086_v30 = vld [vmem:[#allocation7 + $0xc8] sm:$0xff] }
 0x4fc   :  { %5543 = vmatprep.mubr.msk.f32.mxu0 %vm6479_vm0, %v6480_v8  ;;  %5560 = vmatprep.mubr.msk.f32.mxu1 %vm6479_vm0, %v6480_v8  ;;  %v7640_v7 = vsel %vm1292_vm10, %v2758_v47, %v2759_v40  ;;  %v3041_v52 = vrot.slane %v7607_v36, 3  ;;  %v3043_v29 = vrot.slane %v7609_v53, 3  ;;  %v2337_v38 = vmul.f32 %v7601_v6, %v2296_v5  ;;  %v2793_v6 = vpop.permute.xlu1 %2792  ;;  %v2807_v5 = vld [vmem:[#allocation7 + $0x98] sm:$0xff] }
 0x4fd   :  { %5893 = vmatpush3.bf16.msra.mxu0 %v5892_v11  ;;  %5899 = vmatpush3.bf16.msra.mxu1 %v5898_v31  ;;  %v7648_v4 = vsel %vm1532_vm12, %v2900_v45, %v2901_v50  ;;  %v7653_v55 = vsel %vm1292_vm10, %v2759_v40, %v2761_v22  ;;  %v7658_v9 = vsel %vm1532_vm12, %v2901_v50, %v2903_v19  ;;  %v2530_v41 = vsel %vm927_vm8, 0.0, %v2522_v12  ;;  %v3085_v12 = vld [vmem:[#allocation7 + $0xc0] sm:$0xff] }
 0x4fe   :  { %5894 = vmatprep.subr.bf16.mxu0 %v6478_v1  ;;  %5900 = vmatprep.subr.bf16.mxu1 %v6478_v1  ;;  %v7666_v28 = vsel %vm1313_vm11, %v3040_v26, %v3041_v52  ;;  %v2290_v3 = vmul.f32 %v2286_v58, %v2249_v16  ;;  %v7670_v56 = vsel %vm1313_vm11, %v3041_v52, %v3043_v29  ;;  %v2946_v16 = vld [vmem:[#allocation7 + $0xb0] sm:$0xff]  ;;  %v2766_v47 = vsel %vm927_vm8, %v2761_v22, 0.0 }
 0x4ff   :  { %5544 = vmatmul.mubr.msk.f32.gmra.mrb[58].mxu0 %vm684_vm9, %v2336_v27  ;;  %5561 = vmatmul.mubr.msk.f32.gmra.mrb[64].mxu1 %vm684_vm9, %v2289_v14  ;;  %v2564_v60 = vmul.f32 %v7603_v42, %v2530_v41  ;;  %v5904_v0 = vpack.c.bf16 %v2805_v57, %v2804_v15  ;;  %v5910_v20 = vpack.c.bf16 %v2945_v54, %v2944_v62  ;;  %v3047_v27 = vsel %vm1292_vm10, %v7670_v56, 0.0 }
 0x500   :  { %5546 = vmatprep.mubr.msk.f32.mxu0 %vm6479_vm0, %v6480_v8  ;;  %5563 = vmatprep.mubr.msk.f32.mxu1 %vm6479_vm0, %v6480_v8  ;;  %v2565_v34 = vmul.f32 %v7618_v51, %v2524_v46  ;;  %v5907_v42 = vpack.c.bf16 %v2807_v5, %v2806_v21  ;;  %v5913_v11 = vpack.c.bf16 %v2947_v25, %v2946_v16  ;;  %v2928_v18 = vpop.permute.xlu1 %2927 }
 0x501   :  { %5896 = vmatpush3.bf16.msra.mxu0 %v5895_v39  ;;  %5902 = vmatpush3.bf16.msra.mxu1 %v5901_v24  ;;  %v2800_v51 = vmul.f32 %v2788_v61, %v7640_v7  ;;  %v2940_v49 = vmul.f32 %v2928_v18, %v7648_v4  ;;  %v5916_v44 = vpack.c.bf16 %v3086_v30, %v3085_v12 }
 0x502   :  { %5903 = vmatprep.subr.bf16.mxu0 %v6478_v1  ;;  %5909 = vmatprep.subr.bf16.mxu1 %v6478_v1  ;;  %v2801_v37 = vmul.f32 %v2793_v6, %v7653_v55  ;;  %v5919_v10 = vpack.c.bf16 %v3088_v32, %v3087_v43 }
 0x503   :  { %5547 = vmatmul.mubr.msk.f32.gmra.mrb[60].mxu0 %vm684_vm9, %v2337_v38  ;;  %5564 = vmatmul.mubr.msk.f32.gmra.mrb[66].mxu1 %vm684_vm9, %v2290_v3 }
 0x504   :  { %5574 = vmatprep.mubr.msk.f32.mxu0 %vm6479_vm0, %v6480_v8  ;;  %5591 = vmatprep.mubr.msk.f32.mxu1 %vm6479_vm0, %v6480_v8  ;;  %v2933_v35 = vpop.permute.xlu1 %2932 }
 0x505   :  { %v2941_v59 = vmul.f32 %v2933_v35, %v7658_v9 }
 0x507   :  { %5575 = vmatmul.mubr.msk.f32.vlgmr.msra.gmra.mrb[62].mxu0 %vm684_vm9, %v2564_v60  ;;  %5592 = vmatmul.mubr.msk.f32.vlgmr.msra.gmra.mrb[68].mxu1 %vm684_vm9, %v7605_v17  ;;  %v2566_v17 = vmul.f32 %v2562_v48, %v7629_v13 }
 0x508   :  { %5577 = vmatprep.mubr.msk.f32.mxu0 %vm6479_vm0, %v6480_v8  ;;  %5594 = vmatprep.mubr.msk.f32.mxu1 %vm6479_vm0, %v6480_v8  ;;  %v2938_v31 = vpop.permute.xlu1 %2937 }
 0x509   :  { %5905 = vmatpush3.bf16.msra.mxu0 %v5904_v0  ;;  %5911 = vmatpush3.bf16.msra.mxu1 %v5910_v20  ;;  %v2942_v2 = vmul.f32 0.0, %v2938_v31 }
 0x50a   :  { %5906 = vmatprep.subr.bf16.mxu0 %v6478_v1  ;;  %5912 = vmatprep.subr.bf16.mxu1 %v6478_v1 }
 0x50b   :  { %5578 = vmatmul.mubr.msk.f32.gmra.mrb[64].mxu0 %vm684_vm9, %v2565_v34  ;;  %5595 = vmatmul.mubr.msk.f32.gmra.mrb[70].mxu1 %vm684_vm9, %v7607_v36  ;;  %v2798_v36 = vpop.permute.xlu0 %2797 }
 0x50c   :  { %5580 = vmatprep.mubr.msk.f32.mxu0 %vm6479_vm0, %v6480_v8  ;;  %5597 = vmatprep.mubr.msk.f32.mxu1 %vm6479_vm0, %v6480_v8  ;;  %v2802_v39 = vmul.f32 %v2798_v36, %v2766_v47 }
 0x50d   :  { %5908 = vmatpush3.bf16.msra.mxu0 %v5907_v42  ;;  %5914 = vmatpush3.bf16.msra.mxu1 %v5913_v11 }
 0x50e   :  { %5915 = vmatprep.subr.bf16.mxu0 %v6478_v1  ;;  %5921 = vmatprep.subr.bf16.mxu1 %v6478_v1 }
 0x50f   :  { %5581 = vmatmul.mubr.msk.f32.gmra.mrb[66].mxu0 %vm684_vm9, %v2566_v17  ;;  %5598 = vmatmul.mubr.msk.f32.gmra.mrb[72].mxu1 %vm684_vm9, %v7609_v53  ;;  %v3069_v63 = vpop.permute.xlu0 %3068 }
 0x510   :  { %5608 = vmatprep.mubr.msk.f32.mxu0 %vm6479_vm0, %v6480_v8  ;;  %5625 = vmatprep.mubr.msk.f32.mxu1 %vm6479_vm0, %v6480_v8  ;;  %v3081_v46 = vmul.f32 %v3069_v63, %v7666_v28 }
 0x513   :  { %5609 = vmatmul.mubr.msk.f32.vlgmr.msra.gmra.mrb[68].mxu0 %vm684_vm9, %v2800_v51  ;;  %5626 = vmatmul.mubr.msk.f32.vlgmr.msra.gmra.mrb[74].mxu1 %vm684_vm9, %v2940_v49  ;;  %v3074_v53 = vpop.permute.xlu0 %3073 }
 0x514   :  { %5611 = vmatprep.mubr.msk.f32.mxu0 %vm6479_vm0, %v6480_v8  ;;  %5628 = vmatprep.mubr.msk.f32.mxu1 %vm6479_vm0, %v6480_v8  ;;  %v3082_v24 = vmul.f32 %v3074_v53, %v3047_v27 }
 0x515   :  { %5917 = vmatpush3.bf16.msra.mxu0 %v5916_v44 }
 0x516   :  { %5918 = vmatprep.subr.bf16.mxu0 %v6478_v1 }
 0x517   :  { %5612 = vmatmul.mubr.msk.f32.gmra.mrb[70].mxu0 %vm684_vm9, %v2801_v37  ;;  %5629 = vmatmul.mubr.msk.f32.gmra.mrb[76].mxu1 %vm684_vm9, %v2941_v59  ;;  %v3079_v13 = vpop.permute.xlu0 %3078 }
 0x518   :  { %5614 = vmatprep.mubr.msk.f32.mxu0 %vm6479_vm0, %v6480_v8  ;;  %5631 = vmatprep.mubr.msk.f32.mxu1 %vm6479_vm0, %v6480_v8  ;;  %v3083_v40 = vmul.f32 0.0, %v3079_v13 }
 0x519   :  { %5920 = vmatpush3.bf16.msra.mxu0 %v5919_v10 }
 0x51a   :  { %5924 = vmatprep.subr.bf16.mxu0 %v6478_v1 }
 0x51b   :  { %5615 = vmatmul.mubr.msk.f32.gmra.mrb[72].mxu0 %vm684_vm9, %v2802_v39  ;;  %5632 = vmatmul.mubr.msk.f32.gmra.mrb[78].mxu1 %vm684_vm9, %v2942_v2  ;;  %v5009_v2 = vld [vmem:[#allocation8] ss:$0 sm:$0xff] }
 0x51c   :  { %5642 = vmatprep.mubr.msk.f32.mxu0 %vm6479_vm0, %v6480_v8  ;;  %5657 = vmatprep.mubr.msk.f32.mxu1 %vm6479_vm0, %v6480_v8 }
 0x51f   :  { %5643 = vmatmul.mubr.msk.f32.vlgmr.msra.gmra.mrb[74].mxu0 %vm684_vm9, %v3081_v46 }
 0x520   :  { %5645 = vmatprep.mubr.msk.f32.mxu0 %vm6479_vm0, %v6480_v8 }
 0x523   :  { %5646 = vmatmul.mubr.msk.f32.gmra.mrb[76].mxu0 %vm684_vm9, %v3082_v24 }
 0x524   :  { %5648 = vmatprep.mubr.msk.f32.mxu0 %vm6479_vm0, %v6480_v8 }
 0x527   :  { %5649 = vmatmul.mubr.msk.f32.gmra.mrb[78].mxu0 %vm684_vm9, %v3083_v40 }
 0x528   :  { %5668 = vmatprep.mubr.msk.f32.mxu0 %vm6479_vm0, %v6480_v8 }
 0x5ce   :  { %v2418_v14 = vpop.f32.mrb[56].mxu0  ;;  %v2507_v45 = vpop.f32.mrb[62].mxu1 }
 0x5cf   :  { %v2508_v50 = vadd.f32 %v2507_v45, %v2418_v14  ;;  %v5542_v22 = vpop.f32.mrb[57].mxu0  ;;  %v5559_v7 = vpop.f32.mrb[63].mxu1 }
 0x5d2   :  { %v2423_v19 = vpop.f32.mrb[58].mxu0  ;;  %v2512_v26 = vpop.f32.mrb[64].mxu1 }
 0x5d3   :  { %v2513_v52 = vadd.f32 %v2512_v26, %v2423_v19  ;;  %v5545_v48 = vpop.f32.mrb[59].mxu0  ;;  %v5562_v4 = vpop.f32.mrb[65].mxu1 }
 0x5d6   :  { %v2428_v55 = vpop.f32.mrb[60].mxu0  ;;  %v2517_v9 = vpop.f32.mrb[66].mxu1 }
 0x5d7   :  { %v2518_v29 = vadd.f32 %v2517_v9, %v2428_v55  ;;  %v5548_v58 = vpop.f32.mrb[61].mxu0  ;;  %v5565_v28 = vpop.f32.mrb[67].mxu1 }
 0x5da   :  { %v2647_v38 = vpop.f32.mrb[62].mxu0  ;;  %v2741_v3 = vpop.f32.mrb[68].mxu1 }
 0x5db   :  { %v2661_v15 = vadd.f32 %v2647_v38, %v2508_v50  ;;  %v5576_v56 = vpop.f32.mrb[63].mxu0  ;;  %v5593_v41 = vpop.f32.mrb[69].mxu1 }
 0x5dd   :  { %v2755_v57 = vadd.f32 %v2741_v3, %v2661_v15 }
 0x5de   :  { %v2652_v62 = vpop.f32.mrb[64].mxu0  ;;  %v2746_v54 = vpop.f32.mrb[70].mxu1 }
 0x5df   :  { %v2662_v6 = vadd.f32 %v2652_v62, %v2513_v52  ;;  %v5579_v60 = vpop.f32.mrb[65].mxu0  ;;  %v5596_v0 = vpop.f32.mrb[71].mxu1 }
 0x5e0   :  { %v3343_v0 = vld [vmem:[#allocation10 + $0x20] sm:$0xff] }
 0x5e1   :  { %v2756_v20 = vadd.f32 %v2746_v54, %v2662_v6 }
 0x5e2   :  { %v2657_v21 = vpop.f32.mrb[66].mxu0  ;;  %v2751_v5 = vpop.f32.mrb[72].mxu1 }
 0x5e3   :  { %v2663_v16 = vadd.f32 %v2657_v21, %v2518_v29  ;;  %v5582_v25 = vpop.f32.mrb[67].mxu0  ;;  %v5599_v34 = vpop.f32.mrb[73].mxu1  ;;  %v3345_v21 = vld [vmem:[#allocation10 + $0x30] sm:$0xff] }
 0x5e4   :  { %v3338_v25 = vld [vmem:[#allocation10] sm:$0xff]  ;;  %v3339_v34 = vld [vmem:[#allocation10 + $0x8] sm:$0xff] }
 0x5e5   :  { %v2757_v42 = vadd.f32 %v2751_v5, %v2663_v16  ;;  %v3346_v16 = vld [vmem:[#allocation10 + $0x38] sm:$0xff] }
 0x5e6   :  { %v2883_v11 = vpop.f32.mrb[68].mxu0  ;;  %v3023_v61 = vpop.f32.mrb[74].mxu1 }
 0x5e7   :  { %v2897_v18 = vadd.f32 %v2883_v11, %v2755_v57  ;;  %v5610_v17 = vpop.f32.mrb[69].mxu0  ;;  %v5627_v12 = vpop.f32.mrb[75].mxu1  ;;  %v3340_v11 = vld [vmem:[#allocation10 + $0x10] sm:$0xff] }
 0x5e9   :  { %v3037_v30 = vadd.f32 %v3023_v61, %v2897_v18  ;;  %v5928_v61 = vpack.c.bf16 %v3346_v16, %v3345_v21  ;;  %v3341_v18 = vld [vmem:[#allocation10 + $0x18] sm:$0xff] }
 0x5ea   :  { %v2888_v36 = vpop.f32.mrb[70].mxu0  ;;  %v3028_v35 = vpop.f32.mrb[76].mxu1  ;;  %v5934_v17 = vpack.c.bf16 %v3341_v18, %v3340_v11  ;;  %v3627_v21 = vld [vmem:[#allocation13 + $0x18] sm:$0xff] }
 0x5eb   :  { %v2898_v51 = vadd.f32 %v2888_v36, %v2756_v20  ;;  %v5613_v49 = vpop.f32.mrb[71].mxu0  ;;  %v5630_v44 = vpop.f32.mrb[77].mxu1  ;;  %v3344_v20 = vld [vmem:[#allocation10 + $0x28] sm:$0xff]  ;;  %v5017_v18 = vld [vmem:[#allocation11] ss:$0 sm:$0xff] }
 0x5ec   :  { %v5925_v5 = vpack.c.bf16 %v3344_v20, %v3343_v0  ;;  %v3626_v0 = vld [vmem:[#allocation13 + $0x10] sm:$0xff] }
 0x5ed   :  { %v3038_v43 = vadd.f32 %v3028_v35, %v2898_v51 }
 0x5ee   :  { %v2893_v32 = vpop.f32.mrb[72].mxu0  ;;  %v3033_v37 = vpop.f32.mrb[78].mxu1  ;;  %5926 = vmatpush3.bf16.msra.mxu0 %v5925_v5  ;;  %v5952_v5 = vpack.c.bf16 %v3627_v21, %v3626_v0 }
 0x5ef   :  { %v2899_v59 = vadd.f32 %v2893_v32, %v2757_v42  ;;  %v5616_v10 = vpop.f32.mrb[73].mxu0  ;;  %v5633_v63 = vpop.f32.mrb[79].mxu1  ;;  %v5931_v42 = vpack.c.bf16 %v3339_v34, %v3338_v25  ;;  %5927 = vmatprep.subr.bf16.mxu0 %v6478_v1 }
 0x5f1   :  { %v3039_v31 = vadd.f32 %v3033_v37, %v2899_v59 }
 0x5f2   :  { %v3164_v47 = vpop.f32.mrb[74].mxu0  ;;  %5929 = vmatpush3.bf16.msra.mxu0 %v5928_v61 }
 0x5f3   :  { %v3178_v39 = vadd.f32 %v3164_v47, %v3037_v30  ;;  %v5644_v53 = vpop.f32.mrb[75].mxu0  ;;  %5936 = vmatprep.subr.bf16.mxu0 %v6478_v1 }
 0x5f5   :  { %v3188_v46 = vadd.f32 %v5009_v2, %v3178_v39 }
 0x5f6   :  { %v3169_v27 = vpop.f32.mrb[76].mxu0 }
 0x5f7   :  { %v3179_v24 = vadd.f32 %v3169_v27, %v3038_v43  ;;  %v5647_v13 = vpop.f32.mrb[77].mxu0  ;;  %v3191_v40 = vmax.f32 %v3188_v46, 0.0 }
 0x5f9   :  { %v3189_v14 = vadd.f32 %v5009_v2, %v3179_v24  ;;  %v3197_v19 = vrot.slane %v3191_v40, 1  ;;  %v3206_v26 = vrot.slane %v3191_v40, 2 }
 0x5fa   :  { %v3174_v45 = vpop.f32.mrb[78].mxu0 }
 0x5fb   :  { %v3192_v50 = vmax.f32 %v3189_v14, 0.0  ;;  %v3180_v22 = vadd.f32 %v3174_v45, %v3039_v31  ;;  %v5650_v7 = vpop.f32.mrb[79].mxu0  ;;  %v3508_v14 = vld [vmem:[#allocation10 + $0x40] sm:$0xff]  ;;  %v3509_v45 = vld [vmem:[#allocation10 + $0x48] sm:$0xff] }
 0x5fc   :  { %v5937_v7 = vpack.c.bf16 %v3509_v45, %v3508_v14  ;;  %v3783_v45 = vld [vmem:[#allocation13 + $0x40] sm:$0xff] }
 0x5fd   :  { %v3198_v52 = vrot.slane %v3192_v50, 1  ;;  %v3207_v48 = vrot.slane %v3192_v50, 2  ;;  %v3190_v4 = vadd.f32 %v5009_v2, %v3180_v22 }
 0x5ff   :  { %v3199_v55 = vsel %vm1292_vm10, %v3197_v19, %v3198_v52  ;;  %v3193_v9 = vmax.f32 %v3190_v4, 0.0  ;;  %v3208_v29 = vsel %vm1532_vm12, %v3206_v26, %v3207_v48  ;;  %v3510_v26 = vld [vmem:[#allocation10 + $0x50] sm:$0xff] }
 0x600   :  { %v3213_v58 = vmax.f32 %v3191_v40, %v3199_v55 }
 0x601   :  { %v3200_v28 = vrot.slane %v3193_v9, 1  ;;  %v3209_v38 = vrot.slane %v3193_v9, 2 }
 0x602   :  { %v3216_v3 = vmax.f32 %v3213_v58, %v3208_v29 }
 0x603   :  { %v3201_v15 = vsel %vm1292_vm10, %v3198_v52, %v3200_v28  ;;  %v3210_v56 = vsel %vm1532_vm12, %v3207_v48, %v3209_v38  ;;  %v3205_v57 = vsel %vm927_vm8, %v3200_v28, 0.0  ;;  %v3511_v52 = vld [vmem:[#allocation10 + $0x58] sm:$0xff]  ;;  %v7774_v38 = vpop.permute.xlu0 %3503 }
 0x604   :  { %v3214_v41 = vmax.f32 %v3192_v50, %v3201_v15  ;;  %v3215_v54 = vmax.f32 %v3193_v9, %v3205_v57  ;;  %v5940_v55 = vpack.c.bf16 %v3511_v52, %v3510_v26  ;;  %v7768_v9 = vpop.permute.xlu1 %3334  ;;  %v3629_v15 = vld [vmem:[#allocation13 + $0x20] sm:$0xff]  ;;  %v3785_v52 = vld [vmem:[#allocation13 + $0x50] sm:$0xff] }
 0x606   :  { %v3217_v62 = vmax.f32 %v3214_v41, %v3210_v56  ;;  %v3218_v60 = vmax.f32 %v3215_v54, 0.0  ;;  %v3630_v56 = vld [vmem:[#allocation13 + $0x28] sm:$0xff]  ;;  %v3631_v41 = vld [vmem:[#allocation13 + $0x30] sm:$0xff]  ;;  %v3624_v54 = vld [vmem:[#allocation13] sm:$0xff] }
 0x607   :  { %v5943_v57 = vpack.c.bf16 %v3630_v56, %v3629_v15  ;;  %v3904_v56 = vld [vmem:[#allocation16 + $0x20] sm:$0xff] }
 0x608   :  { %v5922_v6 = vpack.c.bf16 %v3217_v62, %v3216_v3  ;;  %v3632_v62 = vld [vmem:[#allocation13 + $0x38] sm:$0xff] }
 0x609   :  { %v5946_v20 = vpack.c.bf16 %v3632_v62, %v3631_v41  ;;  %v3905_v41 = vld [vmem:[#allocation16 + $0x28] sm:$0xff] }
 0x60a   :  { %5923 = vmatpush3.bf16.msra.mxu1 %v5922_v6  ;;  %v3625_v6 = vld [vmem:[#allocation13 + $0x8] sm:$0xff]  ;;  %v5961_v62 = vpack.c.bf16 %v3905_v41, %v3904_v56 }
 0x60b   :  { %5655 = vmatprep.subr.mxu1 %v6480_v8  ;;  %v5026_v41 = vld [vmem:[%s7962_s15 + $0x20] sm:$0xff] }
 0x60e   :  { %5656 = vmatpush3.msk.msra.mxu1 %vm346_vm2, %v3218_v60  ;;  %v5949_v60 = vpack.c.bf16 %v3625_v6, %v3624_v54  ;;  %v3907_v54 = vld [vmem:[#allocation16 + $0x38] sm:$0xff]  ;;  %v3899_v6 = vld [vmem:[#allocation16] sm:$0xff] }
 0x60f   :  { %5658 = vmatmul.mubr.msk.f32.vlgmr.msra.gmra.mrb[80].mxu1 %vm3219_vm6, %v7576_v33  ;;  %5930 = vmatprep.subr.bf16.mxu1 %v6478_v1 }
 0x610   :  { %5679 = vmatprep.mubr.msk.f32.mxu1 %vm6479_vm0, %v6480_v8  ;;  %5932 = vmatpush3.bf16.msra.mxu1 %v5931_v42 }
 0x611   :  { %5933 = vmatprep.subr.bf16.mxu1 %v6478_v1 }
 0x614   :  { %5935 = vmatpush3.bf16.msra.mxu1 %v5934_v17 }
 0x615   :  { %5942 = vmatprep.subr.bf16.mxu1 %v6478_v1 }
 0x6e2   :  { %v3291_v12 = vpop.f32.mrb[80].mxu1 }
 0x6e3   :  { %v3296_v30 = vsel %vm3295_vm7, %v3291_v12, 0.0  ;;  %v3305_v36 = vmul.f32 %v3291_v12, %v3291_v12  ;;  %v5659_v35 = vpop.f32.mrb[81].mxu1 }
 0x6e4   :  { %v3297_v51 = vrot.slane %v3296_v30, 4 }
 0x6e5   :  { %v3306_v49 = vsel %vm3295_vm7, %v3305_v36, 0.0 }
 0x6e6   :  { %v3298_v44 = vadd.f32 %v3297_v51, %v3296_v30  ;;  %v3307_v43 = vrot.slane %v3306_v49, 4 }
 0x6e8   :  { %v3299_v32 = vrot.slane %v3298_v44, 2  ;;  %v3308_v37 = vadd.f32 %v3307_v43, %v3306_v49 }
 0x6ea   :  { %v3300_v59 = vadd.f32 %v3299_v32, %v3298_v44  ;;  %v3309_v10 = vrot.slane %v3308_v37, 2 }
 0x6ec   :  { %v3301_v63 = vrot.slane %v3300_v59, 1  ;;  %v3310_v31 = vadd.f32 %v3309_v10, %v3308_v37 }
 0x6ee   :  { %v3302_v47 = vadd.f32 %v3301_v63, %v3300_v59  ;;  %v3311_v2 = vrot.slane %v3310_v31, 1 }
 0x6f0   :  { %v3304_v39 = vmul.f32 0.16666667, %v3302_v47  ;;  %v3312_v53 = vadd.f32 %v3311_v2, %v3310_v31 }
 0x6f2   :  { %v3313_v46 = vmul.f32 0.16666667, %v3312_v53  ;;  %v3314_v27 = vmul.f32 %v3304_v39, %v3304_v39  ;;  %v3317_v50 = vsub.f32 %v3291_v12, %v3304_v39 }
 0x6f4   :  { %v3315_v24 = vsub.f32 %v3313_v46, %v3314_v27 }
 0x6f6   :  { %v3316_v13 = vmax.f32 %v3315_v24, 0.0 }
 0x6f8   :  { %v3318_v40 = vadd.f32 1e-05, %v3316_v13 }
 0x6fa   :  { %6040 = vrsqrt.f32 %v3318_v40 }
 0x704   :  { %v6041_v22 = vpop.eup %6040 }
 0x705   :  { %v3320_v19 = vmul.f32 %v6041_v22, %v3317_v50  ;;  %v3784_v50 = vld [vmem:[#allocation13 + $0x48] sm:$0xff] }
 0x707   :  { %v3323_v48 = vrot.slane %v3320_v19, 7  ;;  %v3492_v4 = vrot.slane %v3320_v19, 1  ;;  %5669 = vmatmul.mubr.msk.f32.vlgmr.msra.gmra.mrb[80].mxu0 %vm684_vm9, %v3320_v19  ;;  %v5955_v19 = vpack.c.bf16 %v3784_v50, %v3783_v45  ;;  %v4058_v50 = vld [vmem:[#allocation16 + $0x40] sm:$0xff] }
 0x708   :  { %5938 = vmatpush3.bf16.msra.mxu0 %v5937_v7  ;;  %5690 = vmatprep.mubr.msk.f32.mxu0 %vm6479_vm0, %v6480_v8 }
 0x709   :  { %v3325_v29 = vsel %vm927_vm8, 0.0, %v3323_v48  ;;  %5939 = vmatprep.subr.bf16.mxu0 %v6478_v1  ;;  %v3494_v58 = vsel %vm1313_vm11, %v3492_v4, 0.0  ;;  %v3786_v48 = vld [vmem:[#allocation13 + $0x58] sm:$0xff] }
 0x70a   :  { %v3337_v28 = vmul.f32 %v7768_v9, %v3325_v29  ;;  %v3506_v3 = vmul.f32 %v7774_v38, %v3494_v58  ;;  %v5958_v29 = vpack.c.bf16 %v3786_v48, %v3785_v52  ;;  %v4060_v48 = vld [vmem:[#allocation16 + $0x50] sm:$0xff] }
 0x70c   :  { %5941 = vmatpush3.bf16.msra.mxu0 %v5940_v55  ;;  %5680 = vmatmul.mubr.msk.f32.vlgmr.msra.gmra.mrb[82].mxu1 %vm684_vm9, %v3337_v28 }
 0x70d   :  { %5948 = vmatprep.subr.bf16.mxu0 %v6478_v1  ;;  %5701 = vmatprep.mubr.msk.f32.mxu1 %vm6479_vm0, %v6480_v8 }
 0x70e   :  { %5944 = vmatpush3.bf16.msra.mxu1 %v5943_v57  ;;  %v3906_v57 = vld [vmem:[#allocation16 + $0x30] sm:$0xff] }
 0x70f   :  { %5691 = vmatmul.mubr.msk.f32.vlgmr.msra.gmra.mrb[82].mxu0 %vm684_vm9, %v3506_v3  ;;  %5945 = vmatprep.subr.bf16.mxu1 %v6478_v1  ;;  %v5964_v21 = vpack.c.bf16 %v3907_v54, %v3906_v57  ;;  %v5027_v57 = vld [vmem:[%s7962_s15 + $0x28] sm:$0xff] }
 0x710   :  { %5712 = vmatprep.mubr.msk.f32.mxu0 %vm6479_vm0, %v6480_v8  ;;  %5950 = vmatpush3.bf16.msra.mxu0 %v5949_v60  ;;  %v3900_v60 = vld [vmem:[#allocation16 + $0x8] sm:$0xff]  ;;  %v5979_v54 = vpack.c.bf16 %v5027_v57, %v5026_v41 }
 0x711   :  { %5951 = vmatprep.subr.bf16.mxu0 %v6478_v1  ;;  %v5967_v0 = vpack.c.bf16 %v3900_v60, %v3899_v6  ;;  %v5029_v6 = vld [vmem:[%s7962_s15 + $0x38] sm:$0xff]  ;;  %v4174_v60 = vld [vmem:[%s7962_s15] sm:$0xff] }
 0x712   :  { %5947 = vmatpush3.bf16.msra.mxu1 %v5946_v20  ;;  %v3901_v20 = vld [vmem:[#allocation16 + $0x10] sm:$0xff] }
 0x713   :  { %5954 = vmatprep.subr.bf16.mxu1 %v6478_v1 }
 0x714   :  { %5953 = vmatpush3.bf16.msra.mxu0 %v5952_v5  ;;  %v3902_v5 = vld [vmem:[#allocation16 + $0x18] sm:$0xff] }
 0x715   :  { %5960 = vmatprep.subr.bf16.mxu0 %v6478_v1 }
 0x7da   :  { %v3415_v16 = vpop.f32.mrb[80].mxu0 }
 0x7db   :  { %v5670_v25 = vpop.f32.mrb[81].mxu0 }
 0x7df   :  { %v3488_v34 = vpop.f32.mrb[82].mxu1 }
 0x7e0   :  { %v3489_v42 = vadd.f32 %v3488_v34, %v3415_v16  ;;  %v5681_v11 = vpop.f32.mrb[83].mxu1  ;;  %v5970_v16 = vpack.c.bf16 %v3902_v5, %v3901_v20 }
 0x7e2   :  { %v3581_v61 = vpop.f32.mrb[82].mxu0 }
 0x7e3   :  { %v3585_v17 = vadd.f32 %v3581_v61, %v3489_v42  ;;  %v5692_v12 = vpop.f32.mrb[83].mxu0 }
 0x7e5   :  { %v3593_v30 = vadd.f32 %v5017_v18, %v3585_v17  ;;  %v5021_v17 = vld [vmem:[#allocation14] ss:$0 sm:$0xff] }
 0x7e7   :  { %v3594_v36 = vmax.f32 %v3593_v30, 0.0 }
 0x7e9   :  { %v3595_v35 = vsel %vm3295_vm7, %v3594_v36, 0.0  ;;  %v3603_v51 = vmul.f32 %v3594_v36, %v3594_v36 }
 0x7ea   :  { %v3596_v49 = vrot.slane %v3595_v35, 4 }
 0x7eb   :  { %v3604_v44 = vsel %vm3295_vm7, %v3603_v51, 0.0 }
 0x7ec   :  { %v3597_v43 = vadd.f32 %v3596_v49, %v3595_v35  ;;  %v3605_v32 = vrot.slane %v3604_v44, 4 }
 0x7ee   :  { %v3598_v37 = vrot.slane %v3597_v43, 2  ;;  %v3606_v59 = vadd.f32 %v3605_v32, %v3604_v44 }
 0x7f0   :  { %v3599_v10 = vadd.f32 %v3598_v37, %v3597_v43  ;;  %v3607_v63 = vrot.slane %v3606_v59, 2 }
 0x7f2   :  { %v3600_v31 = vrot.slane %v3599_v10, 1  ;;  %v3608_v47 = vadd.f32 %v3607_v63, %v3606_v59 }
 0x7f4   :  { %v3601_v2 = vadd.f32 %v3600_v31, %v3599_v10  ;;  %v3609_v39 = vrot.slane %v3608_v47, 1 }
 0x7f6   :  { %v3602_v53 = vmul.f32 0.16666667, %v3601_v2  ;;  %v3610_v46 = vadd.f32 %v3609_v39, %v3608_v47 }
 0x7f8   :  { %v3611_v27 = vmul.f32 0.16666667, %v3610_v46  ;;  %v3612_v24 = vmul.f32 %v3602_v53, %v3602_v53  ;;  %v3615_v22 = vsub.f32 %v3594_v36, %v3602_v53 }
 0x7fa   :  { %v3613_v13 = vsub.f32 %v3611_v27, %v3612_v24 }
 0x7fc   :  { %v3614_v40 = vmax.f32 %v3613_v13, 0.0 }
 0x7fe   :  { %v3616_v14 = vadd.f32 1e-05, %v3614_v40 }
 0x800   :  { %6042 = vrsqrt.f32 %v3616_v14 }
 0x80a   :  { %v6043_v7 = vpop.eup %6042 }
 0x80b   :  { %v3618_v26 = vmul.f32 %v6043_v7, %v3615_v22  ;;  %v4059_v22 = vld [vmem:[#allocation16 + $0x48] sm:$0xff] }
 0x80d   :  { %v3620_v4 = vrot.slane %v3618_v26, 7  ;;  %v3778_v55 = vrot.slane %v3618_v26, 1  ;;  %5702 = vmatmul.mubr.msk.f32.vlgmr.msra.gmra.mrb[84].mxu1 %vm684_vm9, %v3618_v26  ;;  %v5973_v26 = vpack.c.bf16 %v4059_v22, %v4058_v50  ;;  %v5032_v22 = vld [vmem:[%s7962_s15 + $0x40] sm:$0xff] }
 0x80e   :  { %5956 = vmatpush3.bf16.msra.mxu1 %v5955_v19  ;;  %5723 = vmatprep.mubr.msk.f32.mxu1 %vm6479_vm0, %v6480_v8 }
 0x80f   :  { %5957 = vmatprep.subr.bf16.mxu1 %v6478_v1  ;;  %v3622_v58 = vsel %vm927_vm8, 0.0, %v3620_v4  ;;  %v3780_v3 = vsel %vm1313_vm11, %v3778_v55, 0.0  ;;  %v4061_v4 = vld [vmem:[#allocation16 + $0x58] sm:$0xff] }
 0x810   :  { %v3623_v28 = vmul.f32 %v3622_v58, %v7768_v9  ;;  %v3781_v15 = vmul.f32 %v3780_v3, %v7774_v38  ;;  %v5976_v58 = vpack.c.bf16 %v4061_v4, %v4060_v48  ;;  %v5034_v4 = vld [vmem:[%s7962_s15 + $0x50] sm:$0xff] }
 0x812   :  { %5959 = vmatpush3.bf16.msra.mxu1 %v5958_v29  ;;  %5713 = vmatmul.mubr.msk.f32.vlgmr.msra.gmra.mrb[84].mxu0 %vm684_vm9, %v3623_v28 }
 0x813   :  { %5966 = vmatprep.subr.bf16.mxu1 %v6478_v1  ;;  %5734 = vmatprep.mubr.msk.f32.mxu0 %vm6479_vm0, %v6480_v8 }
 0x814   :  { %5962 = vmatpush3.bf16.msra.mxu0 %v5961_v62  ;;  %v5028_v62 = vld [vmem:[%s7962_s15 + $0x30] sm:$0xff] }
 0x815   :  { %5724 = vmatmul.mubr.msk.f32.vlgmr.msra.gmra.mrb[86].mxu1 %vm684_vm9, %v3781_v15  ;;  %5963 = vmatprep.subr.bf16.mxu0 %v6478_v1  ;;  %v5982_v5 = vpack.c.bf16 %v5029_v6, %v5028_v62 }
 0x816   :  { %5745 = vmatprep.mubr.msk.f32.mxu1 %vm6479_vm0, %v6480_v8  ;;  %5968 = vmatpush3.bf16.msra.mxu1 %v5967_v0  ;;  %v4175_v0 = vld [vmem:[%s7962_s15 + $0x8] sm:$0xff] }
 0x817   :  { %5969 = vmatprep.subr.bf16.mxu1 %v6478_v1  ;;  %v5985_v20 = vpack.c.bf16 %v4175_v0, %v4174_v60  ;;  %v5037_v0 = vld [vmem:[#allocation19] ss:$0 sm:$0xff] }
 0x818   :  { %5965 = vmatpush3.bf16.msra.mxu0 %v5964_v21  ;;  %v4176_v21 = vld [vmem:[%s7962_s15 + $0x10] sm:$0xff] }
 0x819   :  { %5972 = vmatprep.subr.bf16.mxu0 %v6478_v1 }
 0x81a   :  { %5971 = vmatpush3.bf16.msra.mxu1 %v5970_v16  ;;  %v4177_v16 = vld [vmem:[%s7962_s15 + $0x18] sm:$0xff] }
 0x81b   :  { %5978 = vmatprep.subr.bf16.mxu1 %v6478_v1 }
 0x8e0   :  { %v3701_v25 = vpop.f32.mrb[84].mxu1 }
 0x8e1   :  { %v5703_v34 = vpop.f32.mrb[85].mxu1 }
 0x8e5   :  { %v3774_v42 = vpop.f32.mrb[84].mxu0 }
 0x8e6   :  { %v3775_v11 = vadd.f32 %v3774_v42, %v3701_v25  ;;  %v5714_v61 = vpop.f32.mrb[85].mxu0  ;;  %v5988_v25 = vpack.c.bf16 %v4177_v16, %v4176_v21 }
 0x8e8   :  { %v3856_v18 = vpop.f32.mrb[86].mxu1 }
 0x8e9   :  { %v3860_v12 = vadd.f32 %v3856_v18, %v3775_v11  ;;  %v5725_v30 = vpop.f32.mrb[87].mxu1 }
 0x8eb   :  { %v3868_v36 = vadd.f32 %v5021_v17, %v3860_v12  ;;  %v5025_v12 = vld [vmem:[#allocation17] ss:$0 sm:$0xff] }
 0x8ed   :  { %v3869_v35 = vmax.f32 %v3868_v36, 0.0 }
 0x8ef   :  { %v3870_v51 = vsel %vm3295_vm7, %v3869_v35, 0.0  ;;  %v3878_v49 = vmul.f32 %v3869_v35, %v3869_v35 }
 0x8f0   :  { %v3871_v44 = vrot.slane %v3870_v51, 4 }
 0x8f1   :  { %v3879_v43 = vsel %vm3295_vm7, %v3878_v49, 0.0 }
 0x8f2   :  { %v3872_v32 = vadd.f32 %v3871_v44, %v3870_v51  ;;  %v3880_v37 = vrot.slane %v3879_v43, 4 }
 0x8f4   :  { %v3873_v59 = vrot.slane %v3872_v32, 2  ;;  %v3881_v10 = vadd.f32 %v3880_v37, %v3879_v43 }
 0x8f6   :  { %v3874_v63 = vadd.f32 %v3873_v59, %v3872_v32  ;;  %v3882_v31 = vrot.slane %v3881_v10, 2 }
 0x8f8   :  { %v3875_v47 = vrot.slane %v3874_v63, 1  ;;  %v3883_v2 = vadd.f32 %v3882_v31, %v3881_v10 }
 0x8fa   :  { %v3876_v39 = vadd.f32 %v3875_v47, %v3874_v63  ;;  %v3884_v53 = vrot.slane %v3883_v2, 1 }
 0x8fc   :  { %v3877_v46 = vmul.f32 0.16666667, %v3876_v39  ;;  %v3885_v27 = vadd.f32 %v3884_v53, %v3883_v2 }
 0x8fe   :  { %v3886_v24 = vmul.f32 0.16666667, %v3885_v27  ;;  %v3887_v13 = vmul.f32 %v3877_v46, %v3877_v46  ;;  %v3890_v7 = vsub.f32 %v3869_v35, %v3877_v46 }
 0x900   :  { %v3888_v40 = vsub.f32 %v3886_v24, %v3887_v13 }
 0x902   :  { %v3889_v14 = vmax.f32 %v3888_v40, 0.0 }
 0x904   :  { %v3891_v45 = vadd.f32 1e-05, %v3889_v14 }
 0x906   :  { %6044 = vrsqrt.f32 %v3891_v45 }
 0x910   :  { %v6045_v19 = vpop.eup %6044 }
 0x911   :  { %v3893_v52 = vmul.f32 %v6045_v19, %v3890_v7  ;;  %v5033_v7 = vld [vmem:[%s7962_s15 + $0x48] sm:$0xff] }
 0x913   :  { %v3895_v55 = vrot.slane %v3893_v52, 7  ;;  %v4053_v29 = vrot.slane %v3893_v52, 1  ;;  %5735 = vmatmul.mubr.msk.f32.vlgmr.msra.gmra.mrb[86].mxu0 %vm684_vm9, %v3893_v52  ;;  %v5991_v52 = vpack.c.bf16 %v5033_v7, %v5032_v22 }
 0x914   :  { %5974 = vmatpush3.bf16.msra.mxu0 %v5973_v26  ;;  %5756 = vmatprep.mubr.msk.f32.mxu0 %vm6479_vm0, %v6480_v8 }
 0x915   :  { %5975 = vmatprep.subr.bf16.mxu0 %v6478_v1  ;;  %v3897_v28 = vsel %vm927_vm8, 0.0, %v3895_v55  ;;  %v4055_v15 = vsel %vm1313_vm11, %v4053_v29, 0.0  ;;  %v5035_v55 = vld [vmem:[%s7962_s15 + $0x58] sm:$0xff] }
 0x916   :  { %v3898_v3 = vmul.f32 %v3897_v28, %v7768_v9  ;;  %v4056_v56 = vmul.f32 %v4055_v15, %v7774_v38  ;;  %v5994_v28 = vpack.c.bf16 %v5035_v55, %v5034_v4  ;;  %v5040_v55 = vld [vmem:[#allocation22] ss:$0 sm:$0xff] }
 0x918   :  { %5977 = vmatpush3.bf16.msra.mxu0 %v5976_v58  ;;  %5746 = vmatmul.mubr.msk.f32.vlgmr.msra.gmra.mrb[88].mxu1 %vm684_vm9, %v3898_v3 }
 0x919   :  { %5984 = vmatprep.subr.bf16.mxu0 %v6478_v1  ;;  %5767 = vmatprep.mubr.msk.f32.mxu1 %vm6479_vm0, %v6480_v8 }
 0x91a   :  { %5980 = vmatpush3.bf16.msra.mxu1 %v5979_v54 }
 0x91b   :  { %5757 = vmatmul.mubr.msk.f32.vlgmr.msra.gmra.mrb[88].mxu0 %vm684_vm9, %v4056_v56  ;;  %5981 = vmatprep.subr.bf16.mxu1 %v6478_v1 }
 0x91c   :  { %5778 = vmatprep.mubr.msk.f32.mxu0 %vm6479_vm0, %v6480_v8  ;;  %5986 = vmatpush3.bf16.msra.mxu0 %v5985_v20 }
 0x91d   :  { %5987 = vmatprep.subr.bf16.mxu0 %v6478_v1 }
 0x91e   :  { %5983 = vmatpush3.bf16.msra.mxu1 %v5982_v5 }
 0x91f   :  { %5990 = vmatprep.subr.bf16.mxu1 %v6478_v1 }
 0x920   :  { %5989 = vmatpush3.bf16.msra.mxu0 %v5988_v25 }
 0x921   :  { %5792 = vmatprep.subr.mxu0 %v6480_v8 }
 0x9e6   :  { %v3976_v34 = vpop.f32.mrb[86].mxu0 }
 0x9e7   :  { %v5736_v42 = vpop.f32.mrb[87].mxu0 }
 0x9eb   :  { %v4049_v11 = vpop.f32.mrb[88].mxu1 }
 0x9ec   :  { %v4050_v61 = vadd.f32 %v4049_v11, %v3976_v34  ;;  %v5747_v18 = vpop.f32.mrb[89].mxu1 }
 0x9ed   :  { %v4530_v18 = vld [vmem:[#allocation20] sm:$0xff] }
 0x9ee   :  { %v4131_v17 = vpop.f32.mrb[88].mxu0 }
 0x9ef   :  { %v4135_v30 = vadd.f32 %v4131_v17, %v4050_v61  ;;  %v5758_v36 = vpop.f32.mrb[89].mxu0  ;;  %v4531_v17 = vld [vmem:[#allocation20 + $0x8] sm:$0xff] }
 0x9f0   :  { %v4533_v36 = vld [vmem:[#allocation20 + $0x18] sm:$0xff] }
 0x9f1   :  { %v4143_v35 = vadd.f32 %v5025_v12, %v4135_v30  ;;  %v4532_v12 = vld [vmem:[#allocation20 + $0x10] sm:$0xff]  ;;  %v5997_v30 = vpack.c.bf16 %v4531_v17, %v4530_v18  ;;  %v4734_v17 = vsub.s32 1, %v7563_v23 }
 0x9f3   :  { %v4144_v51 = vmax.f32 %v4143_v35, 0.0  ;;  %v4615_v35 = vld [vmem:[%s7966_s19] sm:$0xff] }
 0x9f5   :  { %v4145_v49 = vsel %vm3295_vm7, %v4144_v51, 0.0  ;;  %v4153_v44 = vmul.f32 %v4144_v51, %v4144_v51 }
 0x9f6   :  { %v4146_v43 = vrot.slane %v4145_v49, 4 }
 0x9f7   :  { %v4154_v32 = vsel %vm3295_vm7, %v4153_v44, 0.0 }
 0x9f8   :  { %v4147_v37 = vadd.f32 %v4146_v43, %v4145_v49  ;;  %v4155_v59 = vrot.slane %v4154_v32, 4 }
 0x9fa   :  { %v4148_v10 = vrot.slane %v4147_v37, 2  ;;  %v4156_v63 = vadd.f32 %v4155_v59, %v4154_v32 }
 0x9fc   :  { %v4149_v31 = vadd.f32 %v4148_v10, %v4147_v37  ;;  %v4157_v47 = vrot.slane %v4156_v63, 2 }
 0x9fe   :  { %v4150_v2 = vrot.slane %v4149_v31, 1  ;;  %v4158_v39 = vadd.f32 %v4157_v47, %v4156_v63 }
 0xa00   :  { %v4151_v53 = vadd.f32 %v4150_v2, %v4149_v31  ;;  %v4159_v46 = vrot.slane %v4158_v39, 1 }
 0xa02   :  { %v4152_v27 = vmul.f32 0.16666667, %v4151_v53  ;;  %v4160_v24 = vadd.f32 %v4159_v46, %v4158_v39 }
 0xa04   :  { %v4161_v13 = vmul.f32 0.16666667, %v4160_v24  ;;  %v4162_v40 = vmul.f32 %v4152_v27, %v4152_v27  ;;  %v4165_v19 = vsub.f32 %v4144_v51, %v4152_v27  ;;  %v4616_v51 = vld [vmem:[%s7966_s19 + $0x8] sm:$0xff] }
 0xa05   :  { %v6003_v49 = vpack.c.bf16 %v4616_v51, %v4615_v35  ;;  %v4744_v35 = vsub.s32 2, %v7563_v23 }
 0xa06   :  { %v4163_v14 = vsub.f32 %v4161_v13, %v4162_v40 }
 0xa08   :  { %v4164_v45 = vmax.f32 %v4163_v14, 0.0 }
 0xa0a   :  { %v4166_v50 = vadd.f32 1e-05, %v4164_v45 }
 0xa0c   :  { %6046 = vrsqrt.f32 %v4166_v50 }
 0xa16   :  { %v6047_v26 = vpop.eup %6046 }
 0xa17   :  { %v4168_v48 = vmul.f32 %v6047_v26, %v4165_v19 }
 0xa19   :  { %v4170_v29 = vrot.slane %v4168_v48, 7  ;;  %v4328_v58 = vrot.slane %v4168_v48, 1  ;;  %5768 = vmatmul.mubr.msk.f32.vlgmr.msra.gmra.mrb[90].mxu1 %vm684_vm9, %v4168_v48  ;;  %v4618_v48 = vld [vmem:[%s7966_s19 + $0x18] sm:$0xff] }
 0xa1a   :  { %5992 = vmatpush3.bf16.msra.mxu1 %v5991_v52  ;;  %5789 = vmatprep.mubr.msk.f32.mxu1 %vm6479_vm0, %v6480_v8  ;;  %v4617_v52 = vld [vmem:[%s7966_s19 + $0x10] sm:$0xff] }
 0xa1b   :  { %5993 = vmatprep.subr.bf16.mxu1 %v6478_v1  ;;  %v4172_v3 = vsel %vm927_vm8, 0.0, %v4170_v29  ;;  %v4330_v56 = vsel %vm1313_vm11, %v4328_v58, 0.0  ;;  %vm4429_vm8 = vcmask 48128   ;;  %v6006_v4 = vpack.c.bf16 %v4618_v48, %v4617_v52 }
 0xa1c   :  { %v4173_v15 = vmul.f32 %v4172_v3, %v7768_v9  ;;  %v4331_v41 = vmul.f32 %v4330_v56, %v7774_v38 }
 0xa1e   :  { %5995 = vmatpush3.bf16.msra.mxu1 %v5994_v28  ;;  %5779 = vmatmul.mubr.msk.f32.vlgmr.msra.gmra.mrb[90].mxu0 %vm684_vm9, %v4173_v15  ;;  %v5042_v15 = vld [vmem:[#allocation23] ss:$0 sm:$0xff] }
 0xa1f   :  { %5794 = vmatprep.mubr.msk.f32.mxu0 %vm6479_vm0, %v6480_v8  ;;  %5996 = vmatprep.subr.bf16.mxu1 %v6478_v1 }
 0xa21   :  { %5790 = vmatmul.mubr.msk.f32.vlgmr.msra.gmra.mrb[92].mxu1 %vm684_vm9, %v4331_v41 }
 0xa22   :  { %5805 = vmatprep.mubr.msk.f32.mxu1 %vm6479_vm0, %v6480_v8  ;;  %5998 = vmatpush3.bf16.msra.mxu1 %v5997_v30  ;;  %v4716_v30 = vld [vmem:[%s7969_s22] sm:$0x7]  ;;  %s6483_s22 = smov [#allocation26]  }
 0xa23   :  { %5999 = vmatprep.subr.bf16.mxu1 %v6478_v1  ;;  %s4802_s11 = sshll.u32 %s6483_s22, 4  ;;  %s4803_s11 = int_to_ptr.vmem [resolvable:$true] %s4802_s11 }
 0xa24   :  { %s6396_s20 = scalar_lea.vmem %s4803_s11, 32  ;;  %p6401_p9 = scmp.lt.s32.totalorder %s4803_s11, %s4803_s11 }
 0xa25   :  { %p6397_p8 = scmp.ne.s32.totalorder %s4803_s11, %s6396_s20  ;;  %p6402_p10 = scmp.lt.s32.totalorder %s6396_s20, %s6396_s20 }
 0xa27   :  { %p6403_p11 = por %p6402_p10, %p6401_p9 }
 0xa29   :  { %p6404_p12 = pnand %p6403_p11, %p6397_p8 }
 0xaec   :  { %v4251_v57 = vpop.f32.mrb[90].mxu1 }
 0xaed   :  { %v5769_v62 = vpop.f32.mrb[91].mxu1 }
 0xaf1   :  { %v4324_v9 = vpop.f32.mrb[90].mxu0 }
 0xaf2   :  { %v4325_v54 = vadd.f32 %v4324_v9, %v4251_v57  ;;  %v5780_v6 = vpop.f32.mrb[91].mxu0  ;;  %v4715_v9 = vld [vmem:[%s7968_s21] sm:$0x3] }
 0xaf3   :  { %v6482_v6 = vmov 2  }
 0xaf4   :  { %v4406_v60 = vpop.f32.mrb[92].mxu1 }
 0xaf5   :  { %v4410_v20 = vadd.f32 %v4406_v60, %v4325_v54  ;;  %v5791_v21 = vpop.f32.mrb[93].mxu1  ;;  %v6481_v54 = vmov 1  }
 0xaf6   :  { %6035 = vset.pattern.permute.xlu1 %v6481_v54 }
 0xaf7   :  { %v4418_v38 = vadd.f32 %v5037_v0, %v4410_v20 }
 0xaf9   :  { %v4419_v5 = vmax.f32 %v4418_v38, 0.0 }
 0xafb   :  { %v4421_v16 = vrot.slane %v4419_v5, 1  ;;  %v4424_v25 = vrot.slane %v4419_v5, 2 }
 0xafd   :  { %v4423_v34 = vsel %vm1313_vm11, %v4421_v16, 0.0  ;;  %v4426_v11 = vsel %vm1553_vm14, %v4424_v25, 0.0 }
 0xafe   :  { %v4427_v42 = vmax.f32 %v4419_v5, %v4423_v34  ;;  %v4717_v5 = vld [vmem:[#allocation25] sm:$0x1] }
 0xaff   :  { %v4752_v16 = vmul.f32 -2.0, %v4717_v5 }
 0xb00   :  { %v4428_v61 = vmax.f32 %v4427_v42, %v4426_v11 }
 0xb01   :  { %v4753_v25 = vmul.f32 1.442695, %v4752_v16 }
 0xb02   :  { %5793 = vmatpush3.msk.msra.mxu0 %vm1532_vm12, %v4428_v61 }
 0xb03   :  { %5795 = vmatmul.mubr.msk.f32.vlgmr.msra.gmra.mrb[92].mxu0 %vm4429_vm8, %v7576_v33  ;;  %6002 = vmatprep.subr.bf16.mxu0 %v6478_v1  ;;  %v6000_v33 = vpack.c.bf16 %v4533_v36, %v4532_v12  ;;  %v4725_v36 = vsub.s32 0, %v7563_v23 }
 0xb04   :  { %5816 = vmatprep.mubr.msk.f32.mxu0 %vm6479_vm0, %v6480_v8  ;;  %6004 = vmatpush3.bf16.msra.mxu0 %v6003_v49  ;;  %vm4699_vm0 = vcmask 58368   ;;  %v4735_v49 = vrot.slane %v4716_v30, %v4734_v17 }
 0xb05   :  { %6005 = vmatprep.subr.bf16.mxu0 %v6478_v1  ;;  %6001 = vmatpush3.bf16.msra.mxu1 %v6000_v33 }
 0xb08   :  { %6007 = vmatpush3.bf16.msra.mxu0 %v6006_v4 }
 0xbd6   :  { %v4501_v8 = vpop.f32.mrb[92].mxu0 }
 0xbd7   :  { %v4505_v44 = vsel %vm2206_vm5, %v4501_v8, 0.0  ;;  %v4514_v43 = vmul.f32 %v4501_v8, %v4501_v8  ;;  %v5796_v32 = vpop.f32.mrb[93].mxu0 }
 0xbd8   :  { %v4506_v37 = vrot.slane %v4505_v44, 4 }
 0xbd9   :  { %v4515_v59 = vsel %vm2206_vm5, %v4514_v43, 0.0 }
 0xbda   :  { %v4507_v10 = vadd.f32 %v4506_v37, %v4505_v44  ;;  %v4516_v63 = vrot.slane %v4515_v59, 4  ;;  %v4745_v44 = vrot.slane %v4716_v30, %v4744_v35 }
 0xbdc   :  { %v4508_v31 = vrot.slane %v4507_v10, 2  ;;  %v4517_v47 = vadd.f32 %v4516_v63, %v4515_v59 }
 0xbde   :  { %v4509_v2 = vadd.f32 %v4508_v31, %v4507_v10  ;;  %v4518_v39 = vrot.slane %v4517_v47, 2 }
 0xbe0   :  { %v4510_v53 = vrot.slane %v4509_v2, 1  ;;  %v4519_v46 = vadd.f32 %v4518_v39, %v4517_v47 }
 0xbe2   :  { %v4511_v27 = vadd.f32 %v4510_v53, %v4509_v2  ;;  %v4520_v24 = vrot.slane %v4519_v46, 1  ;;  %v4770_v53 = vrot.slane %v4717_v5, %v4725_v36 }
 0xbe4   :  { %v4513_v1 = vmul.f32 0.5, %v4511_v27  ;;  %v4521_v13 = vadd.f32 %v4520_v24, %v4519_v46 }
 0xbe6   :  { %v4522_v40 = vmul.f32 0.5, %v4521_v13  ;;  %v4523_v14 = vmul.f32 %v4513_v1, %v4513_v1  ;;  %v4526_v7 = vsub.f32 %v4501_v8, %v4513_v1  ;;  %v4726_v8 = vrot.slane %v4716_v30, %v4725_v36 }
 0xbe8   :  { %v4524_v45 = vsub.f32 %v4522_v40, %v4523_v14 }
 0xbea   :  { %v4525_v50 = vmax.f32 %v4524_v45, 0.0 }
 0xbec   :  { %v4527_v22 = vadd.f32 1e-05, %v4525_v50 }
 0xbee   :  { %6048 = vrsqrt.f32 %v4527_v22 }
 0xbf8   :  { %v6049_v19 = vpop.eup %6048 }
 0xbf9   :  { %v4529_v26 = vmul.f32 %v6049_v19, %v4526_v7 }
 0xbfb   :  { %5806 = vmatmul.mubr.msk.f32.vlgmr.msra.gmra.mrb[94].mxu1 %vm684_vm9, %v4529_v26 }
 0xcce   :  { %v4610_v29 = vpop.f32.mrb[94].mxu1 }
 0xccf   :  { %v4611_v58 = vadd.f32 %v5040_v55, %v4610_v29  ;;  %v5807_v28 = vpop.f32.mrb[95].mxu1 }
 0xcd1   :  { %v4614_v3 = vmax.f32 %v4611_v58, 0.0 }
 0xcd3   :  { %5817 = vmatmul.mubr.msk.f32.vlgmr.msra.gmra.mrb[94].mxu0 %vm684_vm9, %v4614_v3 }
 0xda6   :  { %v4695_v56 = vpop.f32.mrb[94].mxu0 }
 0xda7   :  { %v4696_v41 = vadd.f32 %v5042_v15, %v4695_v56  ;;  %v5818_v57 = vpop.f32.mrb[95].mxu0 }
 0xda9   :  { %v4700_v62 = vsel %vm4699_vm0, %v4696_v41, -inf }
 0xdaa   :  { %4701 = vmax.xlane.f32.xlu1 %v4700_v62 }
 0xdbb   :  { %4729 = vperm.xlu1 %6035, %v4715_v9  }
 0xdbf   :  { %6036 = vset.pattern.permute.xlu1 %v6482_v6 }
 0xdc0   :  { %4739 = vperm.xlu1 %6036, %v4715_v9  }
 0xe37   :  { %v4702_v60 = vpop.xlane.xlu1 %4701 }
 0xe38   :  { %v4703_v0 = vsub.f32 %v4696_v41, %v4702_v60 }
 0xe3a   :  { %v4704_v20 = vmul.f32 1.442695, %v4703_v0 }
 0xe3b   :  { %v4730_v12 = vpop.permute.xlu1 %4729 }
 0xe3c   :  { %6050 = vpow2.f32 %v4704_v20  ;;  %v4736_v10 = vmul.f32 %v4735_v49, %v4730_v12 }
 0xe3d   :  { %6052 = vpow2.f32 %v4753_v25 }
 0xe3e   :  { %6054 = vlog2.f32 %v4717_v5 }
 0xe3f   :  { %v4740_v37 = vpop.permute.xlu1 %4739 }
 0xe40   :  { %v4746_v31 = vmul.f32 %v4745_v44, %v4740_v37 }
 0xe46   :  { %v6051_v21 = vpop.eup %6050 }
 0xe47   :  { %v4706_v38 = vsel %vm4699_vm0, %v6051_v21, 0.0  ;;  %v6053_v34 = vpop.eup %6052 }
 0xe48   :  { %4707 = vadd.xlane.f32.xlu0 %v4706_v38  ;;  %v4755_v42 = vsub.f32 1.0, %v6053_v34  ;;  %v6055_v11 = vpop.eup %6054 }
 0xe49   :  { %v4749_v61 = vmul.f32 0.6931472, %v6055_v11 }
 0xe4a   :  { %6056 = vlog2.f32 %v4755_v42 }
 0xe4b   :  { %v5044_v51 = vadd.f32 -1.837877, %v4749_v61 }
 0xe4d   :  { %v4751_v43 = vsub.f32 %v5044_v51, %v4717_v5 }
 0xe54   :  { %v6057_v33 = vpop.eup %6056 }
 0xe55   :  { %v4757_v32 = vmul.f32 0.6931472, %v6057_v33 }
 0xe57   :  { %v4758_v47 = vsub.f32 %v4751_v43, %v4757_v32 }
 0xe59   :  { %v4763_v1 = vrot.slane %v4758_v47, %v4725_v36 }
 0xe5e   :  { %4720 = vperm.xlu0 %6033, %v4715_v9  }
 0xe62   :  { %6037 = vset.pattern.permute.xlu0 %v6482_v6 }
 0xed5   :  { %v4708_v18 = vpop.xlane.xlu0 %4707 }
 0xed6   :  { %6058 = vrcp.f32 %v4708_v18 }
 0xed7   :  { %6060 = vlog2.f32 %v4708_v18 }
 0xedd   :  { %v4721_v59 = vpop.permute.xlu0 %4720 }
 0xede   :  { %v4727_v63 = vmul.f32 %v4726_v8, %v4721_v59 }
 0xee0   :  { %v6059_v2 = vpop.eup %6058  ;;  %v4737_v39 = vadd.f32 %v4736_v10, %v4727_v63 }
 0xee1   :  { %v6061_v46 = vpop.eup %6060  ;;  %v4710_v27 = vmul.f32 %v6059_v2, %v6051_v21 }
 0xee2   :  { %v4713_v23 = vmul.f32 0.6931472, %v6061_v46  ;;  %v4747_v24 = vadd.f32 %v4746_v31, %v4737_v39 }
 0xee3   :  { %4711 = vst.msk [vmem:[#allocation26] sm:$0x3] %vm4699_vm0, %v4710_v27 }
 0xee4   :  { %v4714_v13 = vsub.f32 %v4703_v0, %v4713_v23  ;;  %v4772_v40 = vmul.f32 %v4770_v53, %v4747_v24 }
 0xee6   :  { %v4765_v14 = vadd.f32 %v4763_v1, %v4714_v13 }
 0xee8   :  { %v4773_v45 = vadd.f32 %v4772_v40, %v4765_v14 }
 0xeea   :  { %v4774_v50 = vsel %vm4699_vm0, %v4773_v45, -inf }
 0xeeb   :  { %4775 = vmax.xlane.f32.xlu0 %v4774_v50 }
 0xf78   :  { %v4776_v22 = vpop.xlane.xlu0 %4775 }
 0xf79   :  { %v4777_v7 = vsub.f32 %v4773_v45, %v4776_v22 }
 0xf7b   :  { %v4778_v19 = vmul.f32 1.442695, %v4777_v7 }
 0xf7d   :  { %6062 = vpow2.f32 %v4778_v19 }
 0xf87   :  { %v6063_v26 = vpop.eup %6062 }
 0xf88   :  { %v4780_v52 = vsel %vm4699_vm0, %v6063_v26, 0.0 }
 0xf89   :  { %4781 = vadd.xlane.f32.xlu1 %v4780_v52 }
 0xf8a   :  { %6407 = shalt.err (!%p6404_p12)
}
 0xf8b   :  { %s6408_s16 = scalar_lea.hbm %s7971_s24, 32 }
 0xf8c   :  { %p6409_p13 = scmp.ne.s32.totalorder %s7971_s24, %s6408_s16  ;;  %p6412_p0 = scmp.lt.u32.totalorder %s6408_s16, %s7971_s24 }
 0xf8e   :  { %p6414_p1 = pnand %p6412_p0, %p6409_p13 }
 0xf90   :  { %6417 = shalt.err (!%p6414_p1)
}
 0xf91   :  { %4805 = dma.vmem_to_hbm [thread:$0]  %s4803_s11, 32, %s7971_s24, [#allocation4]   ;;  %vm4794_vm9 = vcmask 0  }
 0xf92   :  { %s6484_s4 = smov [#allocation27]  }
 0xf93   :  { %s4812_s5 = sshll.u32 %s6484_s4, 4  ;;  %s4813_s5 = int_to_ptr.vmem [resolvable:$true] %s4812_s5 }
 0xf94   :  { %s6418_s24 = scalar_lea.vmem %s4813_s5, 16  ;;  %s6422_s13 = scalar_lea.vmem %s4813_s5, 32 }
 0xf95   :  { %p6419_p2 = scmp.ne.s32.totalorder %s4813_s5, %s6418_s24  ;;  %p6423_p3 = scmp.lt.s32.totalorder %s4813_s5, %s4813_s5 }
 0xf96   :  { %p6424_p4 = scmp.lt.s32.totalorder %s6422_s13, %s6418_s24 }
 0xf98   :  { %p6425_p5 = por %p6424_p4, %p6423_p3 }
 0xf9a   :  { %p6426_p6 = pnand %p6425_p5, %p6419_p2 }
0x1016   :  { %v4782_v48 = vpop.xlane.xlu1 %4781 }
0x1017   :  { %6064 = vlog2.f32 %v4782_v48 }
0x1021   :  { %v6065_v4 = vpop.eup %6064 }
0x1022   :  { %v4784_v55 = vmul.f32 0.6931472, %v6065_v4 }
0x1024   :  { %v4785_v29 = vadd.f32 %v4784_v55, %v4776_v22 }
0x1026   :  { %v4786_v58 = vsel %vm346_vm2, %v4785_v29, 0.0 }
0x1027   :  { %v4787_v28 = vrot.slane %v4786_v58, 4 }
0x1029   :  { %v4788_v3 = vadd.f32 %v4787_v28, %v4786_v58 }
0x102b   :  { %v4789_v15 = vrot.slane %v4788_v3, 2 }
0x102d   :  { %v4790_v56 = vadd.f32 %v4789_v15, %v4788_v3 }
0x102f   :  { %v4791_v41 = vrot.slane %v4790_v56, 1 }
0x1031   :  { %v4792_v57 = vadd.f32 %v4791_v41, %v4790_v56 }
0x1033   :  { %v4793_v62 = vsub.f32 0.0, %v4792_v57 }
0x1035   :  { %4795 = vst.msk [vmem:[#allocation27] sm:$0x1] %vm4794_vm9, %v4793_v62 }
0x1036   :  { %6429 = shalt.err (!%p6426_p6)
}
0x1037   :  { %s6430_s15 = scalar_lea.hbm %s7972_s25, 16 }
0x1038   :  { %p6431_p7 = scmp.ne.s32.totalorder %s7972_s25, %s6430_s15  ;;  %p6434_p8 = scmp.lt.u32.totalorder %s6430_s15, %s7972_s25 }
0x103a   :  { %p6436_p9 = pnand %p6434_p8, %p6431_p7 }
0x103c   :  { %6439 = shalt.err (!%p6436_p9)
}
0x103d   :  { %4815 = dma.vmem_to_hbm [thread:$0]  %s4813_s5, 16, %s7972_s25, [#allocation28]  }
0x103e   :  { %6456 = dma.done.wait [#allocation4], 32  }
0x103f   :  { %6457 = vsyncadd [#allocation4], 4294967264 }
0x1040   :  { %6458 = dma.done.wait [#allocation28], 16  }
0x1041   :  { %6459 = vsyncadd [#allocation28], 4294967280 }
0x1042   :  { %4822 = vsyncpa [#allocation3], 1 }
0x1043   :  { %4823 = vsyncpa [#allocation6], 1 }
0x1044   :  { %4824 = vsyncpa [#allocation9], 1 }
0x1045   :  { %4825 = vsyncpa [#allocation12], 1 }
0x1046   :  { %4826 = vsyncpa [#allocation15], 1 }
0x1047   :  { %4827 = vsyncpa [#allocation18], 1 }
0x1048   :  { %4828 = vsyncpa [#allocation21], 1 }
0x1049   :  { %4829 = vsyncpa [#allocation24], 1 }
0x104a   :  { %4830 = vsyncpa [#allocation4], 1 }
0x104b   :  { %4831 = vsyncpa [#allocation28], 1 }

</bundles_post_ra>
